<compile_context>
chip_gen: v7x
topology: tpu7x:2x2x1
jax: 0.10.0
libtpu: 0.0.40
codegen_flags: <defaults>
</compile_context>

<pallas_src>
import jax
import jax.numpy as jnp
from jax.experimental import pallas as pl
from jax.experimental.pallas import tpu as pltpu  # noqa: F401  (kept for parity)

HIDDEN_DIM = 32
INPUT_DIM = 2
NUM_LAYERS = 2          # hard-coded as two stacked GRU cells in the kernel
OUTPUT_DIM = 1
GP = 128                # per-gate lane padding: each gate owns a 128-lane block


def gru_kernel(x_ref,                 # (T*B, D)   time-major, flattened (row = t*B + b)
               wih0_ref, bih0_ref,    # (D, 3*GP), (1, 3*GP)
               whh0_ref, bhh0_ref,    # (GP, 3*GP), (1, 3*GP)
               w1_ref, b1_ref,        # (2*GP, 4*GP), (1, 4*GP)   fused layer-1 [r|z|n_i|n_h]
               wfc_ref, bfc_ref,      # (GP, GP), (1, GP)
               out_ref):              # (B, GP)
    B = out_ref.shape[0]
    T = x_ref.shape[0] // B

    # ---- hoisted layer-0 input projection: one matmul covers all timesteps ----
    gi0_all = (jnp.dot(x_ref[...], wih0_ref[...],
                       preferred_element_type=jnp.float32)
               + bih0_ref[...])                              # (T*B, 3*GP)

    # loop-invariant operands, broadcast exactly once
    whh0 = whh0_ref[...]
    bhh0 = jnp.broadcast_to(bhh0_ref[...], (B, 3 * GP))
    w1 = w1_ref[...]
    b1 = jnp.broadcast_to(b1_ref[...], (B, 4 * GP))

    h0 = jnp.zeros((B, GP), jnp.float32)
    h1 = jnp.zeros((B, GP), jnp.float32)

    # T is static -> full unroll; layer-0 matmul of step t+1 only depends on
    # h0(t), so it can overlap with the layer-1 matmul of step t.
    for t in range(T):
        gi0 = gi0_all[t * B:(t + 1) * B]                     # static 8-row slice
        gh0 = jnp.dot(h0, whh0, preferred_element_type=jnp.float32) + bhh0
        r0 = jax.nn.sigmoid(gi0[:, 0:GP] + gh0[:, 0:GP])
        z0 = jax.nn.sigmoid(gi0[:, GP:2 * GP] + gh0[:, GP:2 * GP])
        n0 = jnp.tanh(gi0[:, 2 * GP:3 * GP] + r0 * gh0[:, 2 * GP:3 * GP])
        h0 = (1.0 - z0) * n0 + z0 * h0

        # layer 1: single fused matmul over concat([h0, h1]);
        # output column blocks: [r (gi+gh), z (gi+gh), n_i (gi only), n_h (gh only)]
        cat = jnp.concatenate([h0, h1], axis=1)              # (B, 2*GP)
        g1 = jnp.dot(cat, w1, preferred_element_type=jnp.float32) + b1
        r1 = jax.nn.sigmoid(g1[:, 0:GP])
        z1 = jax.nn.sigmoid(g1[:, GP:2 * GP])
        n1 = jnp.tanh(g1[:, 2 * GP:3 * GP] + r1 * g1[:, 3 * GP:4 * GP])
        h1 = (1.0 - z1) * n1 + z1 * h1

    # fc on the final top-layer hidden state; lane-dense (B, 128) unmasked store
    out_ref[...] = (jnp.dot(h1, wfc_ref[...], preferred_element_type=jnp.float32)
                    + bfc_ref[...])


# ----------------------------- weight packing ------------------------------

def _pack_gates(w, h=HIDDEN_DIM, gp=GP):
    """(K, 3*h) -> (K, 3*gp); gate g occupies lanes [g*gp, g*gp+h), rest zero."""
    k = w.shape[0]
    out = jnp.zeros((k, 3 * gp), jnp.float32)
    for g in range(3):
        out = out.at[:, g * gp:g * gp + h].set(w[:, g * h:(g + 1) * h])
    return out


def _pad_rows(w, k_pad):
    return jnp.pad(w, ((0, k_pad - w.shape[0]), (0, 0)))


def pack_params(params):
    """Natural-layout params -> padded / fused kernel layout."""
    (wih0, whh0, bih0, bhh0, wih1, whh1, bih1, bhh1, wfc, bfc) = params

    wih0_p = _pack_gates(wih0)                        # (D, 3*GP)
    bih0_p = _pack_gates(bih0)                        # (1, 3*GP)
    whh0_p = _pad_rows(_pack_gates(whh0), GP)         # (GP, 3*GP)
    bhh0_p = _pack_gates(bhh0)                        # (1, 3*GP)

    wih1_p = _pad_rows(_pack_gates(wih1), GP)         # (GP, 3*GP)
    whh1_p = _pad_rows(_pack_gates(whh1), GP)         # (GP, 3*GP)
    bih1_p = _pack_gates(bih1)
    bhh1_p = _pack_gates(bhh1)

    # Fused layer-1 weight: rows [0,GP) consume h0 (gi), rows [GP,2GP) consume h1 (gh).
    # Column blocks: [r, z, n_i, n_h].
    w1 = jnp.zeros((2 * GP, 4 * GP), jnp.float32)
    w1 = w1.at[:GP, 0:3 * GP].set(wih1_p)                           # gi -> r, z, n_i
    w1 = w1.at[GP:, 0:2 * GP].set(whh1_p[:, 0:2 * GP])              # gh -> r, z
    w1 = w1.at[GP:, 3 * GP:4 * GP].set(whh1_p[:, 2 * GP:3 * GP])    # gh -> n_h
    b1 = jnp.zeros((1, 4 * GP), jnp.float32)
    b1 = b1.at[:, 0:2 * GP].set(bih1_p[:, 0:2 * GP] + bhh1_p[:, 0:2 * GP])
    b1 = b1.at[:, 2 * GP:3 * GP].set(bih1_p[:, 2 * GP:3 * GP])
    b1 = b1.at[:, 3 * GP:4 * GP].set(bhh1_p[:, 2 * GP:3 * GP])

    wfc_p = jnp.zeros((GP, GP), jnp.float32).at[:HIDDEN_DIM, :OUTPUT_DIM].set(wfc)
    bfc_p = jnp.zeros((1, GP), jnp.float32).at[:, :OUTPUT_DIM].set(bfc)

    return (wih0_p, bih0_p, whh0_p, bhh0_p, w1, b1, wfc_p, bfc_p)


# ------------------------------- wrapper -----------------------------------

def gru_forward(x_bsd, params):
    """x_bsd: (batch, seq, input_dim) float32 — same layout PyTorch forward() takes."""
    B, T, D = x_bsd.shape
    B_pad = max(8, ((B + 7) // 8) * 8)         # fill the 8-sublane f32 tile

    packed = pack_params(params)

    # (B, T, D) -> pad batch -> (T, B_pad, D) -> (T*B_pad, D), row index = t*B_pad + b
    x_p = jnp.pad(x_bsd.astype(jnp.float32), ((0, B_pad - B), (0, 0), (0, 0)))
    x_2d = jnp.transpose(x_p, (1, 0, 2)).reshape(T * B_pad, D)

    out = pl.pallas_call(
        gru_kernel,
        out_shape=jax.ShapeDtypeStruct((B_pad, GP), jnp.float32),
    )(x_2d, *packed)
    return out[:B, :OUTPUT_DIM]


# ------------------------ params + pure-JAX reference -----------------------

def init_params(key):
    """Deterministic init matching PyTorch default U(-1/sqrt(H), 1/sqrt(H))."""
    k = 1.0 / (HIDDEN_DIM ** 0.5)
    keys = jax.random.split(key, 10)

    def u(kk, shape):
        return jax.random.uniform(kk, shape, jnp.float32, -k, k)

    wih0 = u(keys[0], (INPUT_DIM, 3 * HIDDEN_DIM))     # layer 0: input -> gates
    whh0 = u(keys[1], (HIDDEN_DIM, 3 * HIDDEN_DIM))
    bih0 = u(keys[2], (1, 3 * HIDDEN_DIM))
    bhh0 = u(keys[3], (1, 3 * HIDDEN_DIM))
    wih1 = u(keys[4], (HIDDEN_DIM, 3 * HIDDEN_DIM))    # layer 1: hidden -> gates
    whh1 = u(keys[5], (HIDDEN_DIM, 3 * HIDDEN_DIM))
    bih1 = u(keys[6], (1, 3 * HIDDEN_DIM))
    bhh1 = u(keys[7], (1, 3 * HIDDEN_DIM))
    wfc = u(keys[8], (HIDDEN_DIM, OUTPUT_DIM))
    bfc = u(keys[9], (1, OUTPUT_DIM))
    return (wih0, whh0, bih0, bhh0, wih1, whh1, bih1, bhh1, wfc, bfc)


def gru_reference(x_bsd, params):
    """Pure-JAX reference of the PyTorch forward (for correctness check)."""
    wih0, whh0, bih0, bhh0, wih1, whh1, bih1, bhh1, wfc, bfc = params
    B, T, _ = x_bsd.shape
    H = HIDDEN_DIM

    def cell(x_t, h, wih, whh, bih, bhh):
        gi = x_t @ wih + bih
        gh = h @ whh + bhh
        r = jax.nn.sigmoid(gi[:, :H] + gh[:, :H])
        z = jax.nn.sigmoid(gi[:, H:2 * H] + gh[:, H:2 * H])
        n = jnp.tanh(gi[:, 2 * H:] + r * gh[:, 2 * H:])
        return (1.0 - z) * n + z * h

    h0 = jnp.zeros((B, H), jnp.float32)
    h1 = jnp.zeros((B, H), jnp.float32)
    for t in range(T):
        h0 = cell(x_bsd[:, t, :], h0, wih0, whh0, bih0, bhh0)
        h1 = cell(h0, h1, wih1, whh1, bih1, bhh1)
    return h1 @ wfc + bfc


if __name__ == "__main__":
    key = jax.random.PRNGKey(0)
    key_p, key_x = jax.random.split(key)

    params = init_params(key_p)

    batch, seq = 2, 8
    x = jax.random.normal(key_x, (batch, seq, INPUT_DIM), dtype=jnp.float32)

    out = gru_forward(x, params)
    out = jax.block_until_ready(out)

    ref = gru_reference(x, params)
    assert out.shape == (batch, OUTPUT_DIM)
    assert jnp.allclose(out, ref, atol=1e-5, rtol=1e-4), (out, ref)

    print("KERNEL_OK")
</pallas_src>

<mosaic_0001>
module attributes {stable_mosaic.version = 11 : i64} {
  func.func @gru_kernel(%arg0: memref<64x2xf32, #tpu.memory_space<vmem>>, %arg1: memref<2x384xf32, #tpu.memory_space<vmem>>, %arg2: memref<1x384xf32, #tpu.memory_space<vmem>>, %arg3: memref<128x384xf32, #tpu.memory_space<vmem>>, %arg4: memref<1x384xf32, #tpu.memory_space<vmem>>, %arg5: memref<256x512xf32, #tpu.memory_space<vmem>>, %arg6: memref<1x512xf32, #tpu.memory_space<vmem>>, %arg7: memref<128x128xf32, #tpu.memory_space<vmem>>, %arg8: memref<1x128xf32, #tpu.memory_space<vmem>>, %arg9: memref<8x128xf32, #tpu.memory_space<vmem>>) attributes {dimension_semantics = [], scalar_prefetch = 0 : i64, scratch_operands = 0 : i64, tpu.core_type = #tpu.core_type<tc>} {
    %c0 = arith.constant 0 : index
    %c0_0 = arith.constant 0 : index
    %0 = vector.load %arg0[%c0, %c0_0] : memref<64x2xf32, #tpu.memory_space<vmem>>, vector<64x2xf32>
    %c0_1 = arith.constant 0 : index
    %c0_2 = arith.constant 0 : index
    %1 = vector.load %arg1[%c0_1, %c0_2] : memref<2x384xf32, #tpu.memory_space<vmem>>, vector<2x384xf32>
    %cst = arith.constant dense<0.000000e+00> : vector<64x384xf32>
    %2 = tpu.matmul %0, %1, %cst {dimension_numbers = #tpu.dot_dimension_numbers<[1], [0], [0], [1], [0, 0, 1, 1], [], []>} : vector<64x2xf32>, vector<2x384xf32>, vector<64x384xf32> -> vector<64x384xf32>
    %c0_3 = arith.constant 0 : index
    %c0_4 = arith.constant 0 : index
    %3 = vector.load %arg2[%c0_3, %c0_4] : memref<1x384xf32, #tpu.memory_space<vmem>>, vector<1x384xf32>
    %4 = vector.broadcast %3 : vector<1x384xf32> to vector<64x384xf32>
    %5 = arith.addf %2, %4 : vector<64x384xf32>
    %c0_5 = arith.constant 0 : index
    %c0_6 = arith.constant 0 : index
    %6 = vector.load %arg3[%c0_5, %c0_6] : memref<128x384xf32, #tpu.memory_space<vmem>>, vector<128x384xf32>
    %c0_7 = arith.constant 0 : index
    %c0_8 = arith.constant 0 : index
    %7 = vector.load %arg4[%c0_7, %c0_8] : memref<1x384xf32, #tpu.memory_space<vmem>>, vector<1x384xf32>
    %8 = vector.shape_cast %7 : vector<1x384xf32> to vector<1x384xf32>
    %9 = vector.broadcast %8 : vector<1x384xf32> to vector<8x384xf32>
    %c0_9 = arith.constant 0 : index
    %c0_10 = arith.constant 0 : index
    %10 = vector.load %arg5[%c0_9, %c0_10] : memref<256x512xf32, #tpu.memory_space<vmem>>, vector<256x512xf32>
    %c0_11 = arith.constant 0 : index
    %c0_12 = arith.constant 0 : index
    %11 = vector.load %arg6[%c0_11, %c0_12] : memref<1x512xf32, #tpu.memory_space<vmem>>, vector<1x512xf32>
    %12 = vector.shape_cast %11 : vector<1x512xf32> to vector<1x512xf32>
    %13 = vector.broadcast %12 : vector<1x512xf32> to vector<8x512xf32>
    %cst_13 = arith.constant 0.000000e+00 : f32
    %14 = vector.broadcast %cst_13 : f32 to vector<8x128xf32>
    %cst_14 = arith.constant 0.000000e+00 : f32
    %15 = vector.broadcast %cst_14 : f32 to vector<8x128xf32>
    %16 = vector.extract_strided_slice %5 {offsets = [0, 0], sizes = [8, 384], strides = [1, 1]} : vector<64x384xf32> to vector<8x384xf32>
    %cst_15 = arith.constant dense<0.000000e+00> : vector<8x384xf32>
    %17 = tpu.matmul %14, %6, %cst_15 {dimension_numbers = #tpu.dot_dimension_numbers<[1], [0], [0], [1], [0, 0, 1, 1], [], []>} : vector<8x128xf32>, vector<128x384xf32>, vector<8x384xf32> -> vector<8x384xf32>
    %18 = arith.addf %17, %9 : vector<8x384xf32>
    %19 = vector.extract_strided_slice %16 {offsets = [0, 0], sizes = [8, 128], strides = [1, 1]} : vector<8x384xf32> to vector<8x128xf32>
    %20 = vector.extract_strided_slice %18 {offsets = [0, 0], sizes = [8, 128], strides = [1, 1]} : vector<8x384xf32> to vector<8x128xf32>
    %21 = arith.addf %19, %20 : vector<8x128xf32>
    %22 = arith.negf %21 : vector<8x128xf32>
    %23 = math.exp %22 : vector<8x128xf32>
    %cst_16 = arith.constant 1.000000e+00 : f32
    %24 = vector.broadcast %cst_16 : f32 to vector<8x128xf32>
    %25 = arith.addf %24, %23 : vector<8x128xf32>
    %26 = arith.divf %24, %25 : vector<8x128xf32>
    %27 = vector.extract_strided_slice %16 {offsets = [0, 128], sizes = [8, 128], strides = [1, 1]} : vector<8x384xf32> to vector<8x128xf32>
    %28 = vector.extract_strided_slice %18 {offsets = [0, 128], sizes = [8, 128], strides = [1, 1]} : vector<8x384xf32> to vector<8x128xf32>
    %29 = arith.addf %27, %28 : vector<8x128xf32>
    %30 = arith.negf %29 : vector<8x128xf32>
    %31 = math.exp %30 : vector<8x128xf32>
    %cst_17 = arith.constant 1.000000e+00 : f32
    %32 = vector.broadcast %cst_17 : f32 to vector<8x128xf32>
    %33 = arith.addf %32, %31 : vector<8x128xf32>
    %34 = arith.divf %32, %33 : vector<8x128xf32>
    %35 = vector.extract_strided_slice %16 {offsets = [0, 256], sizes = [8, 128], strides = [1, 1]} : vector<8x384xf32> to vector<8x128xf32>
    %36 = vector.extract_strided_slice %18 {offsets = [0, 256], sizes = [8, 128], strides = [1, 1]} : vector<8x384xf32> to vector<8x128xf32>
    %37 = arith.mulf %26, %36 : vector<8x128xf32>
    %38 = arith.addf %35, %37 : vector<8x128xf32>
    %39 = math.tanh %38 : vector<8x128xf32>
    %cst_18 = arith.constant 1.000000e+00 : f32
    %40 = vector.broadcast %cst_18 : f32 to vector<8x128xf32>
    %41 = arith.subf %40, %34 : vector<8x128xf32>
    %42 = arith.mulf %41, %39 : vector<8x128xf32>
    %43 = arith.mulf %34, %14 : vector<8x128xf32>
    %44 = arith.addf %42, %43 : vector<8x128xf32>
    %45 = tpu.concatenate %44, %15 in 1 : vector<8x128xf32>, vector<8x128xf32> -> vector<8x256xf32>
    %cst_19 = arith.constant dense<0.000000e+00> : vector<8x512xf32>
    %46 = tpu.matmul %45, %10, %cst_19 {dimension_numbers = #tpu.dot_dimension_numbers<[1], [0], [0], [1], [0, 0, 1, 1], [], []>} : vector<8x256xf32>, vector<256x512xf32>, vector<8x512xf32> -> vector<8x512xf32>
    %47 = arith.addf %46, %13 : vector<8x512xf32>
    %48 = vector.extract_strided_slice %47 {offsets = [0, 0], sizes = [8, 128], strides = [1, 1]} : vector<8x512xf32> to vector<8x128xf32>
    %49 = arith.negf %48 : vector<8x128xf32>
    %50 = math.exp %49 : vector<8x128xf32>
    %cst_20 = arith.constant 1.000000e+00 : f32
    %51 = vector.broadcast %cst_20 : f32 to vector<8x128xf32>
    %52 = arith.addf %51, %50 : vector<8x128xf32>
    %53 = arith.divf %51, %52 : vector<8x128xf32>
    %54 = vector.extract_strided_slice %47 {offsets = [0, 128], sizes = [8, 128], strides = [1, 1]} : vector<8x512xf32> to vector<8x128xf32>
    %55 = arith.negf %54 : vector<8x128xf32>
    %56 = math.exp %55 : vector<8x128xf32>
    %cst_21 = arith.constant 1.000000e+00 : f32
    %57 = vector.broadcast %cst_21 : f32 to vector<8x128xf32>
    %58 = arith.addf %57, %56 : vector<8x128xf32>
    %59 = arith.divf %57, %58 : vector<8x128xf32>
    %60 = vector.extract_strided_slice %47 {offsets = [0, 256], sizes = [8, 128], strides = [1, 1]} : vector<8x512xf32> to vector<8x128xf32>
    %61 = vector.extract_strided_slice %47 {offsets = [0, 384], sizes = [8, 128], strides = [1, 1]} : vector<8x512xf32> to vector<8x128xf32>
    %62 = arith.mulf %53, %61 : vector<8x128xf32>
    %63 = arith.addf %60, %62 : vector<8x128xf32>
    %64 = math.tanh %63 : vector<8x128xf32>
    %cst_22 = arith.constant 1.000000e+00 : f32
    %65 = vector.broadcast %cst_22 : f32 to vector<8x128xf32>
    %66 = arith.subf %65, %59 : vector<8x128xf32>
    %67 = arith.mulf %66, %64 : vector<8x128xf32>
    %68 = arith.mulf %59, %15 : vector<8x128xf32>
    %69 = arith.addf %67, %68 : vector<8x128xf32>
    %70 = vector.extract_strided_slice %5 {offsets = [8, 0], sizes = [8, 384], strides = [1, 1]} : vector<64x384xf32> to vector<8x384xf32>
    %cst_23 = arith.constant dense<0.000000e+00> : vector<8x384xf32>
    %71 = tpu.matmul %44, %6, %cst_23 {dimension_numbers = #tpu.dot_dimension_numbers<[1], [0], [0], [1], [0, 0, 1, 1], [], []>} : vector<8x128xf32>, vector<128x384xf32>, vector<8x384xf32> -> vector<8x384xf32>
    %72 = arith.addf %71, %9 : vector<8x384xf32>
    %73 = vector.extract_strided_slice %70 {offsets = [0, 0], sizes = [8, 128], strides = [1, 1]} : vector<8x384xf32> to vector<8x128xf32>
    %74 = vector.extract_strided_slice %72 {offsets = [0, 0], sizes = [8, 128], strides = [1, 1]} : vector<8x384xf32> to vector<8x128xf32>
    %75 = arith.addf %73, %74 : vector<8x128xf32>
    %76 = arith.negf %75 : vector<8x128xf32>
    %77 = math.exp %76 : vector<8x128xf32>
    %cst_24 = arith.constant 1.000000e+00 : f32
    %78 = vector.broadcast %cst_24 : f32 to vector<8x128xf32>
    %79 = arith.addf %78, %77 : vector<8x128xf32>
    %80 = arith.divf %78, %79 : vector<8x128xf32>
    %81 = vector.extract_strided_slice %70 {offsets = [0, 128], sizes = [8, 128], strides = [1, 1]} : vector<8x384xf32> to vector<8x128xf32>
    %82 = vector.extract_strided_slice %72 {offsets = [0, 128], sizes = [8, 128], strides = [1, 1]} : vector<8x384xf32> to vector<8x128xf32>
    %83 = arith.addf %81, %82 : vector<8x128xf32>
    %84 = arith.negf %83 : vector<8x128xf32>
    %85 = math.exp %84 : vector<8x128xf32>
    %cst_25 = arith.constant 1.000000e+00 : f32
    %86 = vector.broadcast %cst_25 : f32 to vector<8x128xf32>
    %87 = arith.addf %86, %85 : vector<8x128xf32>
    %88 = arith.divf %86, %87 : vector<8x128xf32>
    %89 = vector.extract_strided_slice %70 {offsets = [0, 256], sizes = [8, 128], strides = [1, 1]} : vector<8x384xf32> to vector<8x128xf32>
    %90 = vector.extract_strided_slice %72 {offsets = [0, 256], sizes = [8, 128], strides = [1, 1]} : vector<8x384xf32> to vector<8x128xf32>
    %91 = arith.mulf %80, %90 : vector<8x128xf32>
    %92 = arith.addf %89, %91 : vector<8x128xf32>
    %93 = math.tanh %92 : vector<8x128xf32>
    %cst_26 = arith.constant 1.000000e+00 : f32
    %94 = vector.broadcast %cst_26 : f32 to vector<8x128xf32>
    %95 = arith.subf %94, %88 : vector<8x128xf32>
    %96 = arith.mulf %95, %93 : vector<8x128xf32>
    %97 = arith.mulf %88, %44 : vector<8x128xf32>
    %98 = arith.addf %96, %97 : vector<8x128xf32>
    %99 = tpu.concatenate %98, %69 in 1 : vector<8x128xf32>, vector<8x128xf32> -> vector<8x256xf32>
    %cst_27 = arith.constant dense<0.000000e+00> : vector<8x512xf32>
    %100 = tpu.matmul %99, %10, %cst_27 {dimension_numbers = #tpu.dot_dimension_numbers<[1], [0], [0], [1], [0, 0, 1, 1], [], []>} : vector<8x256xf32>, vector<256x512xf32>, vector<8x512xf32> -> vector<8x512xf32>
    %101 = arith.addf %100, %13 : vector<8x512xf32>
    %102 = vector.extract_strided_slice %101 {offsets = [0, 0], sizes = [8, 128], strides = [1, 1]} : vector<8x512xf32> to vector<8x128xf32>
    %103 = arith.negf %102 : vector<8x128xf32>
    %104 = math.exp %103 : vector<8x128xf32>
    %cst_28 = arith.constant 1.000000e+00 : f32
    %105 = vector.broadcast %cst_28 : f32 to vector<8x128xf32>
    %106 = arith.addf %105, %104 : vector<8x128xf32>
    %107 = arith.divf %105, %106 : vector<8x128xf32>
    %108 = vector.extract_strided_slice %101 {offsets = [0, 128], sizes = [8, 128], strides = [1, 1]} : vector<8x512xf32> to vector<8x128xf32>
    %109 = arith.negf %108 : vector<8x128xf32>
    %110 = math.exp %109 : vector<8x128xf32>
    %cst_29 = arith.constant 1.000000e+00 : f32
    %111 = vector.broadcast %cst_29 : f32 to vector<8x128xf32>
    %112 = arith.addf %111, %110 : vector<8x128xf32>
    %113 = arith.divf %111, %112 : vector<8x128xf32>
    %114 = vector.extract_strided_slice %101 {offsets = [0, 256], sizes = [8, 128], strides = [1, 1]} : vector<8x512xf32> to vector<8x128xf32>
    %115 = vector.extract_strided_slice %101 {offsets = [0, 384], sizes = [8, 128], strides = [1, 1]} : vector<8x512xf32> to vector<8x128xf32>
    %116 = arith.mulf %107, %115 : vector<8x128xf32>
    %117 = arith.addf %114, %116 : vector<8x128xf32>
    %118 = math.tanh %117 : vector<8x128xf32>
    %cst_30 = arith.constant 1.000000e+00 : f32
    %119 = vector.broadcast %cst_30 : f32 to vector<8x128xf32>
    %120 = arith.subf %119, %113 : vector<8x128xf32>
    %121 = arith.mulf %120, %118 : vector<8x128xf32>
    %122 = arith.mulf %113, %69 : vector<8x128xf32>
    %123 = arith.addf %121, %122 : vector<8x128xf32>
    %124 = vector.extract_strided_slice %5 {offsets = [16, 0], sizes = [8, 384], strides = [1, 1]} : vector<64x384xf32> to vector<8x384xf32>
    %cst_31 = arith.constant dense<0.000000e+00> : vector<8x384xf32>
    %125 = tpu.matmul %98, %6, %cst_31 {dimension_numbers = #tpu.dot_dimension_numbers<[1], [0], [0], [1], [0, 0, 1, 1], [], []>} : vector<8x128xf32>, vector<128x384xf32>, vector<8x384xf32> -> vector<8x384xf32>
    %126 = arith.addf %125, %9 : vector<8x384xf32>
    %127 = vector.extract_strided_slice %124 {offsets = [0, 0], sizes = [8, 128], strides = [1, 1]} : vector<8x384xf32> to vector<8x128xf32>
    %128 = vector.extract_strided_slice %126 {offsets = [0, 0], sizes = [8, 128], strides = [1, 1]} : vector<8x384xf32> to vector<8x128xf32>
    %129 = arith.addf %127, %128 : vector<8x128xf32>
    %130 = arith.negf %129 : vector<8x128xf32>
    %131 = math.exp %130 : vector<8x128xf32>
    %cst_32 = arith.constant 1.000000e+00 : f32
    %132 = vector.broadcast %cst_32 : f32 to vector<8x128xf32>
    %133 = arith.addf %132, %131 : vector<8x128xf32>
    %134 = arith.divf %132, %133 : vector<8x128xf32>
    %135 = vector.extract_strided_slice %124 {offsets = [0, 128], sizes = [8, 128], strides = [1, 1]} : vector<8x384xf32> to vector<8x128xf32>
    %136 = vector.extract_strided_slice %126 {offsets = [0, 128], sizes = [8, 128], strides = [1, 1]} : vector<8x384xf32> to vector<8x128xf32>
    %137 = arith.addf %135, %136 : vector<8x128xf32>
    %138 = arith.negf %137 : vector<8x128xf32>
    %139 = math.exp %138 : vector<8x128xf32>
    %cst_33 = arith.constant 1.000000e+00 : f32
    %140 = vector.broadcast %cst_33 : f32 to vector<8x128xf32>
    %141 = arith.addf %140, %139 : vector<8x128xf32>
    %142 = arith.divf %140, %141 : vector<8x128xf32>
    %143 = vector.extract_strided_slice %124 {offsets = [0, 256], sizes = [8, 128], strides = [1, 1]} : vector<8x384xf32> to vector<8x128xf32>
    %144 = vector.extract_strided_slice %126 {offsets = [0, 256], sizes = [8, 128], strides = [1, 1]} : vector<8x384xf32> to vector<8x128xf32>
    %145 = arith.mulf %134, %144 : vector<8x128xf32>
    %146 = arith.addf %143, %145 : vector<8x128xf32>
    %147 = math.tanh %146 : vector<8x128xf32>
    %cst_34 = arith.constant 1.000000e+00 : f32
    %148 = vector.broadcast %cst_34 : f32 to vector<8x128xf32>
    %149 = arith.subf %148, %142 : vector<8x128xf32>
    %150 = arith.mulf %149, %147 : vector<8x128xf32>
    %151 = arith.mulf %142, %98 : vector<8x128xf32>
    %152 = arith.addf %150, %151 : vector<8x128xf32>
    %153 = tpu.concatenate %152, %123 in 1 : vector<8x128xf32>, vector<8x128xf32> -> vector<8x256xf32>
    %cst_35 = arith.constant dense<0.000000e+00> : vector<8x512xf32>
    %154 = tpu.matmul %153, %10, %cst_35 {dimension_numbers = #tpu.dot_dimension_numbers<[1], [0], [0], [1], [0, 0, 1, 1], [], []>} : vector<8x256xf32>, vector<256x512xf32>, vector<8x512xf32> -> vector<8x512xf32>
    %155 = arith.addf %154, %13 : vector<8x512xf32>
    %156 = vector.extract_strided_slice %155 {offsets = [0, 0], sizes = [8, 128], strides = [1, 1]} : vector<8x512xf32> to vector<8x128xf32>
    %157 = arith.negf %156 : vector<8x128xf32>
    %158 = math.exp %157 : vector<8x128xf32>
    %cst_36 = arith.constant 1.000000e+00 : f32
    %159 = vector.broadcast %cst_36 : f32 to vector<8x128xf32>
    %160 = arith.addf %159, %158 : vector<8x128xf32>
    %161 = arith.divf %159, %160 : vector<8x128xf32>
    %162 = vector.extract_strided_slice %155 {offsets = [0, 128], sizes = [8, 128], strides = [1, 1]} : vector<8x512xf32> to vector<8x128xf32>
    %163 = arith.negf %162 : vector<8x128xf32>
    %164 = math.exp %163 : vector<8x128xf32>
    %cst_37 = arith.constant 1.000000e+00 : f32
    %165 = vector.broadcast %cst_37 : f32 to vector<8x128xf32>
    %166 = arith.addf %165, %164 : vector<8x128xf32>
    %167 = arith.divf %165, %166 : vector<8x128xf32>
    %168 = vector.extract_strided_slice %155 {offsets = [0, 256], sizes = [8, 128], strides = [1, 1]} : vector<8x512xf32> to vector<8x128xf32>
    %169 = vector.extract_strided_slice %155 {offsets = [0, 384], sizes = [8, 128], strides = [1, 1]} : vector<8x512xf32> to vector<8x128xf32>
    %170 = arith.mulf %161, %169 : vector<8x128xf32>
    %171 = arith.addf %168, %170 : vector<8x128xf32>
    %172 = math.tanh %171 : vector<8x128xf32>
    %cst_38 = arith.constant 1.000000e+00 : f32
    %173 = vector.broadcast %cst_38 : f32 to vector<8x128xf32>
    %174 = arith.subf %173, %167 : vector<8x128xf32>
    %175 = arith.mulf %174, %172 : vector<8x128xf32>
    %176 = arith.mulf %167, %123 : vector<8x128xf32>
    %177 = arith.addf %175, %176 : vector<8x128xf32>
    %178 = vector.extract_strided_slice %5 {offsets = [24, 0], sizes = [8, 384], strides = [1, 1]} : vector<64x384xf32> to vector<8x384xf32>
    %cst_39 = arith.constant dense<0.000000e+00> : vector<8x384xf32>
    %179 = tpu.matmul %152, %6, %cst_39 {dimension_numbers = #tpu.dot_dimension_numbers<[1], [0], [0], [1], [0, 0, 1, 1], [], []>} : vector<8x128xf32>, vector<128x384xf32>, vector<8x384xf32> -> vector<8x384xf32>
    %180 = arith.addf %179, %9 : vector<8x384xf32>
    %181 = vector.extract_strided_slice %178 {offsets = [0, 0], sizes = [8, 128], strides = [1, 1]} : vector<8x384xf32> to vector<8x128xf32>
    %182 = vector.extract_strided_slice %180 {offsets = [0, 0], sizes = [8, 128], strides = [1, 1]} : vector<8x384xf32> to vector<8x128xf32>
    %183 = arith.addf %181, %182 : vector<8x128xf32>
    %184 = arith.negf %183 : vector<8x128xf32>
    %185 = math.exp %184 : vector<8x128xf32>
    %cst_40 = arith.constant 1.000000e+00 : f32
    %186 = vector.broadcast %cst_40 : f32 to vector<8x128xf32>
    %187 = arith.addf %186, %185 : vector<8x128xf32>
    %188 = arith.divf %186, %187 : vector<8x128xf32>
    %189 = vector.extract_strided_slice %178 {offsets = [0, 128], sizes = [8, 128], strides = [1, 1]} : vector<8x384xf32> to vector<8x128xf32>
    %190 = vector.extract_strided_slice %180 {offsets = [0, 128], sizes = [8, 128], strides = [1, 1]} : vector<8x384xf32> to vector<8x128xf32>
    %191 = arith.addf %189, %190 : vector<8x128xf32>
    %192 = arith.negf %191 : vector<8x128xf32>
    %193 = math.exp %192 : vector<8x128xf32>
    %cst_41 = arith.constant 1.000000e+00 : f32
    %194 = vector.broadcast %cst_41 : f32 to vector<8x128xf32>
    %195 = arith.addf %194, %193 : vector<8x128xf32>
    %196 = arith.divf %194, %195 : vector<8x128xf32>
    %197 = vector.extract_strided_slice %178 {offsets = [0, 256], sizes = [8, 128], strides = [1, 1]} : vector<8x384xf32> to vector<8x128xf32>
    %198 = vector.extract_strided_slice %180 {offsets = [0, 256], sizes = [8, 128], strides = [1, 1]} : vector<8x384xf32> to vector<8x128xf32>
    %199 = arith.mulf %188, %198 : vector<8x128xf32>
    %200 = arith.addf %197, %199 : vector<8x128xf32>
    %201 = math.tanh %200 : vector<8x128xf32>
    %cst_42 = arith.constant 1.000000e+00 : f32
    %202 = vector.broadcast %cst_42 : f32 to vector<8x128xf32>
    %203 = arith.subf %202, %196 : vector<8x128xf32>
    %204 = arith.mulf %203, %201 : vector<8x128xf32>
    %205 = arith.mulf %196, %152 : vector<8x128xf32>
    %206 = arith.addf %204, %205 : vector<8x128xf32>
    %207 = tpu.concatenate %206, %177 in 1 : vector<8x128xf32>, vector<8x128xf32> -> vector<8x256xf32>
    %cst_43 = arith.constant dense<0.000000e+00> : vector<8x512xf32>
    %208 = tpu.matmul %207, %10, %cst_43 {dimension_numbers = #tpu.dot_dimension_numbers<[1], [0], [0], [1], [0, 0, 1, 1], [], []>} : vector<8x256xf32>, vector<256x512xf32>, vector<8x512xf32> -> vector<8x512xf32>
    %209 = arith.addf %208, %13 : vector<8x512xf32>
    %210 = vector.extract_strided_slice %209 {offsets = [0, 0], sizes = [8, 128], strides = [1, 1]} : vector<8x512xf32> to vector<8x128xf32>
    %211 = arith.negf %210 : vector<8x128xf32>
    %212 = math.exp %211 : vector<8x128xf32>
    %cst_44 = arith.constant 1.000000e+00 : f32
    %213 = vector.broadcast %cst_44 : f32 to vector<8x128xf32>
    %214 = arith.addf %213, %212 : vector<8x128xf32>
    %215 = arith.divf %213, %214 : vector<8x128xf32>
    %216 = vector.extract_strided_slice %209 {offsets = [0, 128], sizes = [8, 128], strides = [1, 1]} : vector<8x512xf32> to vector<8x128xf32>
    %217 = arith.negf %216 : vector<8x128xf32>
    %218 = math.exp %217 : vector<8x128xf32>
    %cst_45 = arith.constant 1.000000e+00 : f32
    %219 = vector.broadcast %cst_45 : f32 to vector<8x128xf32>
    %220 = arith.addf %219, %218 : vector<8x128xf32>
    %221 = arith.divf %219, %220 : vector<8x128xf32>
    %222 = vector.extract_strided_slice %209 {offsets = [0, 256], sizes = [8, 128], strides = [1, 1]} : vector<8x512xf32> to vector<8x128xf32>
    %223 = vector.extract_strided_slice %209 {offsets = [0, 384], sizes = [8, 128], strides = [1, 1]} : vector<8x512xf32> to vector<8x128xf32>
    %224 = arith.mulf %215, %223 : vector<8x128xf32>
    %225 = arith.addf %222, %224 : vector<8x128xf32>
    %226 = math.tanh %225 : vector<8x128xf32>
    %cst_46 = arith.constant 1.000000e+00 : f32
    %227 = vector.broadcast %cst_46 : f32 to vector<8x128xf32>
    %228 = arith.subf %227, %221 : vector<8x128xf32>
    %229 = arith.mulf %228, %226 : vector<8x128xf32>
    %230 = arith.mulf %221, %177 : vector<8x128xf32>
    %231 = arith.addf %229, %230 : vector<8x128xf32>
    %232 = vector.extract_strided_slice %5 {offsets = [32, 0], sizes = [8, 384], strides = [1, 1]} : vector<64x384xf32> to vector<8x384xf32>
    %cst_47 = arith.constant dense<0.000000e+00> : vector<8x384xf32>
    %233 = tpu.matmul %206, %6, %cst_47 {dimension_numbers = #tpu.dot_dimension_numbers<[1], [0], [0], [1], [0, 0, 1, 1], [], []>} : vector<8x128xf32>, vector<128x384xf32>, vector<8x384xf32> -> vector<8x384xf32>
    %234 = arith.addf %233, %9 : vector<8x384xf32>
    %235 = vector.extract_strided_slice %232 {offsets = [0, 0], sizes = [8, 128], strides = [1, 1]} : vector<8x384xf32> to vector<8x128xf32>
    %236 = vector.extract_strided_slice %234 {offsets = [0, 0], sizes = [8, 128], strides = [1, 1]} : vector<8x384xf32> to vector<8x128xf32>
    %237 = arith.addf %235, %236 : vector<8x128xf32>
    %238 = arith.negf %237 : vector<8x128xf32>
    %239 = math.exp %238 : vector<8x128xf32>
    %cst_48 = arith.constant 1.000000e+00 : f32
    %240 = vector.broadcast %cst_48 : f32 to vector<8x128xf32>
    %241 = arith.addf %240, %239 : vector<8x128xf32>
    %242 = arith.divf %240, %241 : vector<8x128xf32>
    %243 = vector.extract_strided_slice %232 {offsets = [0, 128], sizes = [8, 128], strides = [1, 1]} : vector<8x384xf32> to vector<8x128xf32>
    %244 = vector.extract_strided_slice %234 {offsets = [0, 128], sizes = [8, 128], strides = [1, 1]} : vector<8x384xf32> to vector<8x128xf32>
    %245 = arith.addf %243, %244 : vector<8x128xf32>
    %246 = arith.negf %245 : vector<8x128xf32>
    %247 = math.exp %246 : vector<8x128xf32>
    %cst_49 = arith.constant 1.000000e+00 : f32
    %248 = vector.broadcast %cst_49 : f32 to vector<8x128xf32>
    %249 = arith.addf %248, %247 : vector<8x128xf32>
    %250 = arith.divf %248, %249 : vector<8x128xf32>
    %251 = vector.extract_strided_slice %232 {offsets = [0, 256], sizes = [8, 128], strides = [1, 1]} : vector<8x384xf32> to vector<8x128xf32>
    %252 = vector.extract_strided_slice %234 {offsets = [0, 256], sizes = [8, 128], strides = [1, 1]} : vector<8x384xf32> to vector<8x128xf32>
    %253 = arith.mulf %242, %252 : vector<8x128xf32>
    %254 = arith.addf %251, %253 : vector<8x128xf32>
    %255 = math.tanh %254 : vector<8x128xf32>
    %cst_50 = arith.constant 1.000000e+00 : f32
    %256 = vector.broadcast %cst_50 : f32 to vector<8x128xf32>
    %257 = arith.subf %256, %250 : vector<8x128xf32>
    %258 = arith.mulf %257, %255 : vector<8x128xf32>
    %259 = arith.mulf %250, %206 : vector<8x128xf32>
    %260 = arith.addf %258, %259 : vector<8x128xf32>
    %261 = tpu.concatenate %260, %231 in 1 : vector<8x128xf32>, vector<8x128xf32> -> vector<8x256xf32>
    %cst_51 = arith.constant dense<0.000000e+00> : vector<8x512xf32>
    %262 = tpu.matmul %261, %10, %cst_51 {dimension_numbers = #tpu.dot_dimension_numbers<[1], [0], [0], [1], [0, 0, 1, 1], [], []>} : vector<8x256xf32>, vector<256x512xf32>, vector<8x512xf32> -> vector<8x512xf32>
    %263 = arith.addf %262, %13 : vector<8x512xf32>
    %264 = vector.extract_strided_slice %263 {offsets = [0, 0], sizes = [8, 128], strides = [1, 1]} : vector<8x512xf32> to vector<8x128xf32>
    %265 = arith.negf %264 : vector<8x128xf32>
    %266 = math.exp %265 : vector<8x128xf32>
    %cst_52 = arith.constant 1.000000e+00 : f32
    %267 = vector.broadcast %cst_52 : f32 to vector<8x128xf32>
    %268 = arith.addf %267, %266 : vector<8x128xf32>
    %269 = arith.divf %267, %268 : vector<8x128xf32>
    %270 = vector.extract_strided_slice %263 {offsets = [0, 128], sizes = [8, 128], strides = [1, 1]} : vector<8x512xf32> to vector<8x128xf32>
    %271 = arith.negf %270 : vector<8x128xf32>
    %272 = math.exp %271 : vector<8x128xf32>
    %cst_53 = arith.constant 1.000000e+00 : f32
    %273 = vector.broadcast %cst_53 : f32 to vector<8x128xf32>
    %274 = arith.addf %273, %272 : vector<8x128xf32>
    %275 = arith.divf %273, %274 : vector<8x128xf32>
    %276 = vector.extract_strided_slice %263 {offsets = [0, 256], sizes = [8, 128], strides = [1, 1]} : vector<8x512xf32> to vector<8x128xf32>
    %277 = vector.extract_strided_slice %263 {offsets = [0, 384], sizes = [8, 128], strides = [1, 1]} : vector<8x512xf32> to vector<8x128xf32>
    %278 = arith.mulf %269, %277 : vector<8x128xf32>
    %279 = arith.addf %276, %278 : vector<8x128xf32>
    %280 = math.tanh %279 : vector<8x128xf32>
    %cst_54 = arith.constant 1.000000e+00 : f32
    %281 = vector.broadcast %cst_54 : f32 to vector<8x128xf32>
    %282 = arith.subf %281, %275 : vector<8x128xf32>
    %283 = arith.mulf %282, %280 : vector<8x128xf32>
    %284 = arith.mulf %275, %231 : vector<8x128xf32>
    %285 = arith.addf %283, %284 : vector<8x128xf32>
    %286 = vector.extract_strided_slice %5 {offsets = [40, 0], sizes = [8, 384], strides = [1, 1]} : vector<64x384xf32> to vector<8x384xf32>
    %cst_55 = arith.constant dense<0.000000e+00> : vector<8x384xf32>
    %287 = tpu.matmul %260, %6, %cst_55 {dimension_numbers = #tpu.dot_dimension_numbers<[1], [0], [0], [1], [0, 0, 1, 1], [], []>} : vector<8x128xf32>, vector<128x384xf32>, vector<8x384xf32> -> vector<8x384xf32>
    %288 = arith.addf %287, %9 : vector<8x384xf32>
    %289 = vector.extract_strided_slice %286 {offsets = [0, 0], sizes = [8, 128], strides = [1, 1]} : vector<8x384xf32> to vector<8x128xf32>
    %290 = vector.extract_strided_slice %288 {offsets = [0, 0], sizes = [8, 128], strides = [1, 1]} : vector<8x384xf32> to vector<8x128xf32>
    %291 = arith.addf %289, %290 : vector<8x128xf32>
    %292 = arith.negf %291 : vector<8x128xf32>
    %293 = math.exp %292 : vector<8x128xf32>
    %cst_56 = arith.constant 1.000000e+00 : f32
    %294 = vector.broadcast %cst_56 : f32 to vector<8x128xf32>
    %295 = arith.addf %294, %293 : vector<8x128xf32>
    %296 = arith.divf %294, %295 : vector<8x128xf32>
    %297 = vector.extract_strided_slice %286 {offsets = [0, 128], sizes = [8, 128], strides = [1, 1]} : vector<8x384xf32> to vector<8x128xf32>
    %298 = vector.extract_strided_slice %288 {offsets = [0, 128], sizes = [8, 128], strides = [1, 1]} : vector<8x384xf32> to vector<8x128xf32>
    %299 = arith.addf %297, %298 : vector<8x128xf32>
    %300 = arith.negf %299 : vector<8x128xf32>
    %301 = math.exp %300 : vector<8x128xf32>
    %cst_57 = arith.constant 1.000000e+00 : f32
    %302 = vector.broadcast %cst_57 : f32 to vector<8x128xf32>
    %303 = arith.addf %302, %301 : vector<8x128xf32>
    %304 = arith.divf %302, %303 : vector<8x128xf32>
    %305 = vector.extract_strided_slice %286 {offsets = [0, 256], sizes = [8, 128], strides = [1, 1]} : vector<8x384xf32> to vector<8x128xf32>
    %306 = vector.extract_strided_slice %288 {offsets = [0, 256], sizes = [8, 128], strides = [1, 1]} : vector<8x384xf32> to vector<8x128xf32>
    %307 = arith.mulf %296, %306 : vector<8x128xf32>
    %308 = arith.addf %305, %307 : vector<8x128xf32>
    %309 = math.tanh %308 : vector<8x128xf32>
    %cst_58 = arith.constant 1.000000e+00 : f32
    %310 = vector.broadcast %cst_58 : f32 to vector<8x128xf32>
    %311 = arith.subf %310, %304 : vector<8x128xf32>
    %312 = arith.mulf %311, %309 : vector<8x128xf32>
    %313 = arith.mulf %304, %260 : vector<8x128xf32>
    %314 = arith.addf %312, %313 : vector<8x128xf32>
    %315 = tpu.concatenate %314, %285 in 1 : vector<8x128xf32>, vector<8x128xf32> -> vector<8x256xf32>
    %cst_59 = arith.constant dense<0.000000e+00> : vector<8x512xf32>
    %316 = tpu.matmul %315, %10, %cst_59 {dimension_numbers = #tpu.dot_dimension_numbers<[1], [0], [0], [1], [0, 0, 1, 1], [], []>} : vector<8x256xf32>, vector<256x512xf32>, vector<8x512xf32> -> vector<8x512xf32>
    %317 = arith.addf %316, %13 : vector<8x512xf32>
    %318 = vector.extract_strided_slice %317 {offsets = [0, 0], sizes = [8, 128], strides = [1, 1]} : vector<8x512xf32> to vector<8x128xf32>
    %319 = arith.negf %318 : vector<8x128xf32>
    %320 = math.exp %319 : vector<8x128xf32>
    %cst_60 = arith.constant 1.000000e+00 : f32
    %321 = vector.broadcast %cst_60 : f32 to vector<8x128xf32>
    %322 = arith.addf %321, %320 : vector<8x128xf32>
    %323 = arith.divf %321, %322 : vector<8x128xf32>
    %324 = vector.extract_strided_slice %317 {offsets = [0, 128], sizes = [8, 128], strides = [1, 1]} : vector<8x512xf32> to vector<8x128xf32>
    %325 = arith.negf %324 : vector<8x128xf32>
    %326 = math.exp %325 : vector<8x128xf32>
    %cst_61 = arith.constant 1.000000e+00 : f32
    %327 = vector.broadcast %cst_61 : f32 to vector<8x128xf32>
    %328 = arith.addf %327, %326 : vector<8x128xf32>
    %329 = arith.divf %327, %328 : vector<8x128xf32>
    %330 = vector.extract_strided_slice %317 {offsets = [0, 256], sizes = [8, 128], strides = [1, 1]} : vector<8x512xf32> to vector<8x128xf32>
    %331 = vector.extract_strided_slice %317 {offsets = [0, 384], sizes = [8, 128], strides = [1, 1]} : vector<8x512xf32> to vector<8x128xf32>
    %332 = arith.mulf %323, %331 : vector<8x128xf32>
    %333 = arith.addf %330, %332 : vector<8x128xf32>
    %334 = math.tanh %333 : vector<8x128xf32>
    %cst_62 = arith.constant 1.000000e+00 : f32
    %335 = vector.broadcast %cst_62 : f32 to vector<8x128xf32>
    %336 = arith.subf %335, %329 : vector<8x128xf32>
    %337 = arith.mulf %336, %334 : vector<8x128xf32>
    %338 = arith.mulf %329, %285 : vector<8x128xf32>
    %339 = arith.addf %337, %338 : vector<8x128xf32>
    %340 = vector.extract_strided_slice %5 {offsets = [48, 0], sizes = [8, 384], strides = [1, 1]} : vector<64x384xf32> to vector<8x384xf32>
    %cst_63 = arith.constant dense<0.000000e+00> : vector<8x384xf32>
    %341 = tpu.matmul %314, %6, %cst_63 {dimension_numbers = #tpu.dot_dimension_numbers<[1], [0], [0], [1], [0, 0, 1, 1], [], []>} : vector<8x128xf32>, vector<128x384xf32>, vector<8x384xf32> -> vector<8x384xf32>
    %342 = arith.addf %341, %9 : vector<8x384xf32>
    %343 = vector.extract_strided_slice %340 {offsets = [0, 0], sizes = [8, 128], strides = [1, 1]} : vector<8x384xf32> to vector<8x128xf32>
    %344 = vector.extract_strided_slice %342 {offsets = [0, 0], sizes = [8, 128], strides = [1, 1]} : vector<8x384xf32> to vector<8x128xf32>
    %345 = arith.addf %343, %344 : vector<8x128xf32>
    %346 = arith.negf %345 : vector<8x128xf32>
    %347 = math.exp %346 : vector<8x128xf32>
    %cst_64 = arith.constant 1.000000e+00 : f32
    %348 = vector.broadcast %cst_64 : f32 to vector<8x128xf32>
    %349 = arith.addf %348, %347 : vector<8x128xf32>
    %350 = arith.divf %348, %349 : vector<8x128xf32>
    %351 = vector.extract_strided_slice %340 {offsets = [0, 128], sizes = [8, 128], strides = [1, 1]} : vector<8x384xf32> to vector<8x128xf32>
    %352 = vector.extract_strided_slice %342 {offsets = [0, 128], sizes = [8, 128], strides = [1, 1]} : vector<8x384xf32> to vector<8x128xf32>
    %353 = arith.addf %351, %352 : vector<8x128xf32>
    %354 = arith.negf %353 : vector<8x128xf32>
    %355 = math.exp %354 : vector<8x128xf32>
    %cst_65 = arith.constant 1.000000e+00 : f32
    %356 = vector.broadcast %cst_65 : f32 to vector<8x128xf32>
    %357 = arith.addf %356, %355 : vector<8x128xf32>
    %358 = arith.divf %356, %357 : vector<8x128xf32>
    %359 = vector.extract_strided_slice %340 {offsets = [0, 256], sizes = [8, 128], strides = [1, 1]} : vector<8x384xf32> to vector<8x128xf32>
    %360 = vector.extract_strided_slice %342 {offsets = [0, 256], sizes = [8, 128], strides = [1, 1]} : vector<8x384xf32> to vector<8x128xf32>
    %361 = arith.mulf %350, %360 : vector<8x128xf32>
    %362 = arith.addf %359, %361 : vector<8x128xf32>
    %363 = math.tanh %362 : vector<8x128xf32>
    %cst_66 = arith.constant 1.000000e+00 : f32
    %364 = vector.broadcast %cst_66 : f32 to vector<8x128xf32>
    %365 = arith.subf %364, %358 : vector<8x128xf32>
    %366 = arith.mulf %365, %363 : vector<8x128xf32>
    %367 = arith.mulf %358, %314 : vector<8x128xf32>
    %368 = arith.addf %366, %367 : vector<8x128xf32>
    %369 = tpu.concatenate %368, %339 in 1 : vector<8x128xf32>, vector<8x128xf32> -> vector<8x256xf32>
    %cst_67 = arith.constant dense<0.000000e+00> : vector<8x512xf32>
    %370 = tpu.matmul %369, %10, %cst_67 {dimension_numbers = #tpu.dot_dimension_numbers<[1], [0], [0], [1], [0, 0, 1, 1], [], []>} : vector<8x256xf32>, vector<256x512xf32>, vector<8x512xf32> -> vector<8x512xf32>
    %371 = arith.addf %370, %13 : vector<8x512xf32>
    %372 = vector.extract_strided_slice %371 {offsets = [0, 0], sizes = [8, 128], strides = [1, 1]} : vector<8x512xf32> to vector<8x128xf32>
    %373 = arith.negf %372 : vector<8x128xf32>
    %374 = math.exp %373 : vector<8x128xf32>
    %cst_68 = arith.constant 1.000000e+00 : f32
    %375 = vector.broadcast %cst_68 : f32 to vector<8x128xf32>
    %376 = arith.addf %375, %374 : vector<8x128xf32>
    %377 = arith.divf %375, %376 : vector<8x128xf32>
    %378 = vector.extract_strided_slice %371 {offsets = [0, 128], sizes = [8, 128], strides = [1, 1]} : vector<8x512xf32> to vector<8x128xf32>
    %379 = arith.negf %378 : vector<8x128xf32>
    %380 = math.exp %379 : vector<8x128xf32>
    %cst_69 = arith.constant 1.000000e+00 : f32
    %381 = vector.broadcast %cst_69 : f32 to vector<8x128xf32>
    %382 = arith.addf %381, %380 : vector<8x128xf32>
    %383 = arith.divf %381, %382 : vector<8x128xf32>
    %384 = vector.extract_strided_slice %371 {offsets = [0, 256], sizes = [8, 128], strides = [1, 1]} : vector<8x512xf32> to vector<8x128xf32>
    %385 = vector.extract_strided_slice %371 {offsets = [0, 384], sizes = [8, 128], strides = [1, 1]} : vector<8x512xf32> to vector<8x128xf32>
    %386 = arith.mulf %377, %385 : vector<8x128xf32>
    %387 = arith.addf %384, %386 : vector<8x128xf32>
    %388 = math.tanh %387 : vector<8x128xf32>
    %cst_70 = arith.constant 1.000000e+00 : f32
    %389 = vector.broadcast %cst_70 : f32 to vector<8x128xf32>
    %390 = arith.subf %389, %383 : vector<8x128xf32>
    %391 = arith.mulf %390, %388 : vector<8x128xf32>
    %392 = arith.mulf %383, %339 : vector<8x128xf32>
    %393 = arith.addf %391, %392 : vector<8x128xf32>
    %394 = vector.extract_strided_slice %5 {offsets = [56, 0], sizes = [8, 384], strides = [1, 1]} : vector<64x384xf32> to vector<8x384xf32>
    %cst_71 = arith.constant dense<0.000000e+00> : vector<8x384xf32>
    %395 = tpu.matmul %368, %6, %cst_71 {dimension_numbers = #tpu.dot_dimension_numbers<[1], [0], [0], [1], [0, 0, 1, 1], [], []>} : vector<8x128xf32>, vector<128x384xf32>, vector<8x384xf32> -> vector<8x384xf32>
    %396 = arith.addf %395, %9 : vector<8x384xf32>
    %397 = vector.extract_strided_slice %394 {offsets = [0, 0], sizes = [8, 128], strides = [1, 1]} : vector<8x384xf32> to vector<8x128xf32>
    %398 = vector.extract_strided_slice %396 {offsets = [0, 0], sizes = [8, 128], strides = [1, 1]} : vector<8x384xf32> to vector<8x128xf32>
    %399 = arith.addf %397, %398 : vector<8x128xf32>
    %400 = arith.negf %399 : vector<8x128xf32>
    %401 = math.exp %400 : vector<8x128xf32>
    %cst_72 = arith.constant 1.000000e+00 : f32
    %402 = vector.broadcast %cst_72 : f32 to vector<8x128xf32>
    %403 = arith.addf %402, %401 : vector<8x128xf32>
    %404 = arith.divf %402, %403 : vector<8x128xf32>
    %405 = vector.extract_strided_slice %394 {offsets = [0, 128], sizes = [8, 128], strides = [1, 1]} : vector<8x384xf32> to vector<8x128xf32>
    %406 = vector.extract_strided_slice %396 {offsets = [0, 128], sizes = [8, 128], strides = [1, 1]} : vector<8x384xf32> to vector<8x128xf32>
    %407 = arith.addf %405, %406 : vector<8x128xf32>
    %408 = arith.negf %407 : vector<8x128xf32>
    %409 = math.exp %408 : vector<8x128xf32>
    %cst_73 = arith.constant 1.000000e+00 : f32
    %410 = vector.broadcast %cst_73 : f32 to vector<8x128xf32>
    %411 = arith.addf %410, %409 : vector<8x128xf32>
    %412 = arith.divf %410, %411 : vector<8x128xf32>
    %413 = vector.extract_strided_slice %394 {offsets = [0, 256], sizes = [8, 128], strides = [1, 1]} : vector<8x384xf32> to vector<8x128xf32>
    %414 = vector.extract_strided_slice %396 {offsets = [0, 256], sizes = [8, 128], strides = [1, 1]} : vector<8x384xf32> to vector<8x128xf32>
    %415 = arith.mulf %404, %414 : vector<8x128xf32>
    %416 = arith.addf %413, %415 : vector<8x128xf32>
    %417 = math.tanh %416 : vector<8x128xf32>
    %cst_74 = arith.constant 1.000000e+00 : f32
    %418 = vector.broadcast %cst_74 : f32 to vector<8x128xf32>
    %419 = arith.subf %418, %412 : vector<8x128xf32>
    %420 = arith.mulf %419, %417 : vector<8x128xf32>
    %421 = arith.mulf %412, %368 : vector<8x128xf32>
    %422 = arith.addf %420, %421 : vector<8x128xf32>
    %423 = tpu.concatenate %422, %393 in 1 : vector<8x128xf32>, vector<8x128xf32> -> vector<8x256xf32>
    %cst_75 = arith.constant dense<0.000000e+00> : vector<8x512xf32>
    %424 = tpu.matmul %423, %10, %cst_75 {dimension_numbers = #tpu.dot_dimension_numbers<[1], [0], [0], [1], [0, 0, 1, 1], [], []>} : vector<8x256xf32>, vector<256x512xf32>, vector<8x512xf32> -> vector<8x512xf32>
    %425 = arith.addf %424, %13 : vector<8x512xf32>
    %426 = vector.extract_strided_slice %425 {offsets = [0, 0], sizes = [8, 128], strides = [1, 1]} : vector<8x512xf32> to vector<8x128xf32>
    %427 = arith.negf %426 : vector<8x128xf32>
    %428 = math.exp %427 : vector<8x128xf32>
    %cst_76 = arith.constant 1.000000e+00 : f32
    %429 = vector.broadcast %cst_76 : f32 to vector<8x128xf32>
    %430 = arith.addf %429, %428 : vector<8x128xf32>
    %431 = arith.divf %429, %430 : vector<8x128xf32>
    %432 = vector.extract_strided_slice %425 {offsets = [0, 128], sizes = [8, 128], strides = [1, 1]} : vector<8x512xf32> to vector<8x128xf32>
    %433 = arith.negf %432 : vector<8x128xf32>
    %434 = math.exp %433 : vector<8x128xf32>
    %cst_77 = arith.constant 1.000000e+00 : f32
    %435 = vector.broadcast %cst_77 : f32 to vector<8x128xf32>
    %436 = arith.addf %435, %434 : vector<8x128xf32>
    %437 = arith.divf %435, %436 : vector<8x128xf32>
    %438 = vector.extract_strided_slice %425 {offsets = [0, 256], sizes = [8, 128], strides = [1, 1]} : vector<8x512xf32> to vector<8x128xf32>
    %439 = vector.extract_strided_slice %425 {offsets = [0, 384], sizes = [8, 128], strides = [1, 1]} : vector<8x512xf32> to vector<8x128xf32>
    %440 = arith.mulf %431, %439 : vector<8x128xf32>
    %441 = arith.addf %438, %440 : vector<8x128xf32>
    %442 = math.tanh %441 : vector<8x128xf32>
    %cst_78 = arith.constant 1.000000e+00 : f32
    %443 = vector.broadcast %cst_78 : f32 to vector<8x128xf32>
    %444 = arith.subf %443, %437 : vector<8x128xf32>
    %445 = arith.mulf %444, %442 : vector<8x128xf32>
    %446 = arith.mulf %437, %393 : vector<8x128xf32>
    %447 = arith.addf %445, %446 : vector<8x128xf32>
    %c0_79 = arith.constant 0 : index
    %c0_80 = arith.constant 0 : index
    %448 = vector.load %arg7[%c0_79, %c0_80] : memref<128x128xf32, #tpu.memory_space<vmem>>, vector<128x128xf32>
    %cst_81 = arith.constant dense<0.000000e+00> : vector<8x128xf32>
    %449 = tpu.matmul %447, %448, %cst_81 {dimension_numbers = #tpu.dot_dimension_numbers<[1], [0], [0], [1], [0, 0, 1, 1], [], []>} : vector<8x128xf32>, vector<128x128xf32>, vector<8x128xf32> -> vector<8x128xf32>
    %c0_82 = arith.constant 0 : index
    %c0_83 = arith.constant 0 : index
    %450 = vector.load %arg8[%c0_82, %c0_83] : memref<1x128xf32, #tpu.memory_space<vmem>>, vector<1x128xf32>
    %451 = vector.broadcast %450 : vector<1x128xf32> to vector<8x128xf32>
    %452 = arith.addf %449, %451 : vector<8x128xf32>
    %c0_84 = arith.constant 0 : index
    %c0_85 = arith.constant 0 : index
    %453 = vector.load %arg9[%c0_84, %c0_85] : memref<8x128xf32, #tpu.memory_space<vmem>>, vector<8x128xf32>
    tpu.vector_store %arg9[%c0_84, %c0_85], %452 {strides = array<i32>} : memref<8x128xf32, #tpu.memory_space<vmem>>, vector<8x128xf32>,
    return
  }
}

</mosaic_0001>

<bundles_post_ra>
// kernel: tpu_custom_call.1
= control target key start
LH: loop header
LB: loop body
LE: loop exit
PB: predicated region body
PF: predicated region fallthrough
CT: control target
= control target key end

     0   :  { %14 = vsyncpa [#allocation3], 0  ;;  %s6986_s0 = inlined_call_operand.vmem [shape: f32[64,2], index: 0, kind: input, shape index: {}]   ;;  %s6987_s1 = inlined_call_operand.vmem [shape: f32[2,384], index: 1, kind: input, shape index: {}]   ;;  %s6988_s2 = inlined_call_operand.vmem [shape: f32[1,384], index: 2, kind: input, shape index: {}]   ;;  %s6989_s3 = inlined_call_operand.hbm [shape: f32[128,384], index: 3, kind: input, shape index: {}]   ;;  %s6990_s4 = inlined_call_operand.vmem [shape: f32[1,384], index: 4, kind: input, shape index: {}]   ;;  %s6991_s5 = inlined_call_operand.hbm [shape: f32[256,512], index: 5, kind: input, shape index: {}]   ;;  %s6992_s6 = inlined_call_operand.vmem [shape: f32[1,512], index: 6, kind: input, shape index: {}]   ;;  %s6993_s7 = inlined_call_operand.hbm [shape: f32[128,128], index: 7, kind: input, shape index: {}]   ;;  %s6994_s8 = inlined_call_operand.vmem [shape: f32[1,128], index: 8, kind: input, shape index: {}]   ;;  %s6995_s9 = inlined_call_operand.hbm [shape: f32[8,128], index: 9, kind: output, shape index: {}]  }
   0x1   :  { %15 = vsyncpa [#allocation6], 0 }
   0x2   :  { %16 = vsyncpa [#allocation4], 0  ;;  %s5632_s30 = smov [#allocation5]   ;;  %s5538_s13 = scalar_lea.hbm %s6991_s5, 16384 }
   0x3   :  { %s42_s10 = sshll.u32 %s5632_s30, 4  ;;  %p5539_p0 = scmp.ne.s32.totalorder %s6991_s5, %s5538_s13  ;;  %s43_s10 = int_to_ptr.vmem [resolvable:$true] %s42_s10 }
   0x4   :  { %p5542_p1 = scmp.lt.u32.totalorder %s5538_s13, %s6991_s5 }
   0x6   :  { %p5544_p2 = pnand %p5542_p1, %p5539_p0 }
   0x8   :  { %5547 = shalt.err (!%p5544_p2)
}
   0x9   :  { %s5548_s18 = scalar_lea.vmem %s43_s10, 16384  ;;  %p5553_p4 = scmp.lt.s32.totalorder %s43_s10, %s43_s10 }
   0xa   :  { %p5549_p3 = scmp.ne.s32.totalorder %s43_s10, %s5548_s18  ;;  %p5554_p5 = scmp.lt.s32.totalorder %s5548_s18, %s5548_s18 }
   0xc   :  { %p5555_p6 = por %p5554_p5, %p5553_p4 }
   0xe   :  { %p5556_p7 = pnand %p5555_p6, %p5549_p3 }
  0x10   :  { %5559 = shalt.err (!%p5556_p7)
}
  0x11   :  { %s5633_s19 = smov 512   ;;  %s5634_s20 = smov 32  }
  0x12   :  { %48 = dma.hbm_to_vmem [thread:$0]  %s6991_s5, 16384, %s43_s10, [#allocation6], %s5633_s19, %s5633_s19, %s5634_s20  }
  0x13   :  { %s5635_s23 = smov [#allocation2]   ;;  %s5560_s27 = scalar_lea.hbm %s6989_s3, 6144 }
  0x14   :  { %s28_s24 = sshll.u32 %s5635_s23, 4  ;;  %p5561_p8 = scmp.ne.s32.totalorder %s6989_s3, %s5560_s27  ;;  %s29_s24 = int_to_ptr.vmem [resolvable:$true] %s28_s24 }
  0x15   :  { %p5564_p9 = scmp.lt.u32.totalorder %s5560_s27, %s6989_s3 }
  0x17   :  { %p5566_p10 = pnand %p5564_p9, %p5561_p8 }
  0x19   :  { %5569 = shalt.err (!%p5566_p10)
}
  0x1a   :  { %s5570_s12 = scalar_lea.vmem %s29_s24, 6144  ;;  %p5575_p12 = scmp.lt.s32.totalorder %s29_s24, %s29_s24 }
  0x1b   :  { %p5571_p11 = scmp.ne.s32.totalorder %s29_s24, %s5570_s12  ;;  %p5576_p13 = scmp.lt.s32.totalorder %s5570_s12, %s5570_s12 }
  0x1d   :  { %p5577_p0 = por %p5576_p13, %p5575_p12 }
  0x1f   :  { %p5578_p1 = pnand %p5577_p0, %p5571_p11 }
  0x21   :  { %5581 = shalt.err (!%p5578_p1)
}
  0x22   :  { %s5636_s5 = smov 384   ;;  %s5637_s10 = smov 24  }
  0x23   :  { %34 = dma.hbm_to_vmem [thread:$0]  %s6989_s3, 6144, %s29_s24, [#allocation3], %s5636_s5, %s5636_s5, %s5637_s10  }
  0x24   :  { %s5638_s15 = smov [#allocation7]   ;;  %s5582_s19 = scalar_lea.hbm %s6993_s7, 2048 }
  0x25   :  { %s56_s16 = sshll.u32 %s5638_s15, 4  ;;  %p5583_p2 = scmp.ne.s32.totalorder %s6993_s7, %s5582_s19  ;;  %s57_s16 = int_to_ptr.vmem [resolvable:$true] %s56_s16 }
  0x26   :  { %p5586_p3 = scmp.lt.u32.totalorder %s5582_s19, %s6993_s7 }
  0x28   :  { %p5588_p4 = pnand %p5586_p3, %p5583_p2 }
  0x2a   :  { %5591 = shalt.err (!%p5588_p4)
}
  0x2b   :  { %s5592_s25 = scalar_lea.vmem %s57_s16, 2048  ;;  %p5597_p6 = scmp.lt.s32.totalorder %s57_s16, %s57_s16 }
  0x2c   :  { %p5593_p5 = scmp.ne.s32.totalorder %s57_s16, %s5592_s25  ;;  %p5598_p7 = scmp.lt.s32.totalorder %s5592_s25, %s5592_s25 }
  0x2e   :  { %p5599_p8 = por %p5598_p7, %p5597_p6 }
  0x30   :  { %p5600_p9 = pnand %p5599_p8, %p5593_p5 }
  0x32   :  { %5603 = shalt.err (!%p5600_p9)
}
  0x33   :  { %s5639_s3 = smov 128   ;;  %s5640_s24 = smov 8  }
  0x34   :  { %62 = dma.hbm_to_vmem [thread:$0]  %s6993_s7, 2048, %s57_s16, [#allocation6], %s5639_s3, %s5639_s3, %s5640_s24  }
  0x35   :  { %5626 = dma.done.wait [#allocation3], 6144  }
  0x36   :  { %5627 = vsyncadd [#allocation3], 4294961152 }
  0x37   :  { %5628 = dma.done.wait [#allocation6], 18432  }
  0x38   :  { %5629 = vsyncadd [#allocation6], 4294948864  ;;  %v85_v0 = vlaneseq  ;;  %v5641_v1 = vmov 1983009808   ;;  %v6996_v3 = vmov 0.0   ;;  %v74_v8 = vld [vmem:[%s6986_s0] sm:$0xff] }
  0x39   :  { %v103_v2 = vunpack.c.l.s4 %v5641_v1  ;;  %213 = vmatprep.mubr.f32.mxu0 %v6996_v3  ;;  %v82_v7 = vld [vmem:[%s6987_s1] sm:$0x3f]  ;;  %vm117_vm0 = vcmask 15360   ;;  %v368_v9 = vld [vmem:[#allocation2 + $0x8] sm:$0xff]  ;;  %v370_v13 = vld [vmem:[#allocation2 + $0x18] sm:$0xff]  ;;  %vm142_vm1 = vcmask 1041408  }
  0x3a   :  { %v5733_v4 = vshrl.u32 %v85_v0, 7  ;;  %v371_v11 = vld [vmem:[#allocation2 + $0x20] sm:$0xff]  ;;  %v101_v14 = vcombine.high %v82_v7, %v82_v7  ;;  %3492 = vmatprep.mubr.msk.f32.mxu1 %vm117_vm0, %v74_v8  ;;  %v374_v15 = vld [vmem:[#allocation2 + $0x38] sm:$0xff]  ;;  %v377_v16 = vld [vmem:[#allocation2 + $0x50] sm:$0xff]  ;;  %v6998_v31 = vmov 0.0|0.0   ;;  %vm5644_vm2 = vmmov 0  }
  0x3b   :  { %v104_v5 = vunpack.c.0.s8 %v103_v2  ;;  %v367_v12 = vld [vmem:[#allocation2] sm:$0xff]  ;;  %v5743_v18 = vpack.c.bf16 %v371_v11, %v368_v9  ;;  %v5747_v21 = vpack.c.bf16 %v377_v16, %v374_v15  ;;  %v373_v22 = vld [vmem:[#allocation2 + $0x30] sm:$0xff]  ;;  %v376_v23 = vld [vmem:[#allocation2 + $0x48] sm:$0xff]  ;;  %s5645_s24 = smov [#allocation8]  }
  0x3c   :  { %7114 = vst [vmem:[#allocation12_spill] sm:$0xff] %v5733_v4  ;;  %v5745_v20 = vpack.c.bf16 %v370_v13, %v367_v12  ;;  %v380_v24 = vld [vmem:[#allocation2 + $0x68] sm:$0xff]  ;;  %v383_v25 = vld [vmem:[#allocation2 + $0x80] sm:$0xff]  ;;  %v5756_v27 = vpack.c.bf16 %v376_v23, %v373_v22  ;;  %v382_v30 = vld [vmem:[#allocation2 + $0x78] sm:$0xff]  ;;  %s3266_s26 = sshll.u32 %s5645_s24, 4  ;;  %s3267_s26 = int_to_ptr.vmem [resolvable:$true] %s3266_s26 }
  0x3d   :  { %v107_v6 = vsub.s32 %v104_v5, %v5733_v4  ;;  %7115 = vst [vmem:[#allocation13_spill] sm:$0xff] %v5743_v18  ;;  %v75_v26 = vld [vmem:[%s6986_s0 + $0x8] sm:$0xff]  ;;  %v5759_v28 = vpack.c.bf16 %v383_v25, %v380_v24  ;;  %v379_v29 = vld [vmem:[#allocation2 + $0x60] sm:$0xff]  ;;  %v76_v32 = vld [vmem:[%s6986_s0 + $0x10] sm:$0xff]  ;;  %s5604_s27 = scalar_lea.vmem %s3267_s26, 128  ;;  %p5609_p11 = scmp.lt.s32.totalorder %s3267_s26, %s3267_s26 }
  0x3e   :  { %v386_v33 = vld [vmem:[#allocation2 + $0x98] sm:$0xff]  ;;  %v389_v34 = vld [vmem:[#allocation2 + $0xb0] sm:$0xff]  ;;  %v5770_v35 = vpack.c.bf16 %v382_v30, %v379_v29  ;;  %v372_v38 = vld [vmem:[#allocation2 + $0x28] sm:$0xff]  ;;  %p5605_p10 = scmp.ne.s32.totalorder %s3267_s26, %s5604_s27  ;;  %p5610_p12 = scmp.lt.s32.totalorder %s5604_s27, %s5604_s27 }
  0x3f   :  { %v108_v10 = vrot.slane %v82_v7, %v107_v6  ;;  %v115_v19 = vrot.slane %v101_v14, %v107_v6  ;;  %v77_v36 = vld [vmem:[%s6986_s0 + $0x18] sm:$0xff]  ;;  %v369_v37 = vld [vmem:[#allocation2 + $0x10] sm:$0xff]  ;;  %v5776_v39 = vpack.c.bf16 %v389_v34, %v386_v33  ;;  %v388_v41 = vld [vmem:[#allocation2 + $0xa8] sm:$0xff] }
  0x40   :  { %v385_v40 = vld [vmem:[#allocation2 + $0x90] sm:$0xff]  ;;  %v392_v42 = vld [vmem:[#allocation2 + $0xc8] sm:$0xff]  ;;  %v5778_v43 = vpack.c.bf16 %v372_v38, %v369_v37  ;;  %v395_v44 = vld [vmem:[#allocation2 + $0xe0] sm:$0xff]  ;;  %p5611_p13 = por %p5610_p12, %p5609_p11 }
  0x41   :  { %v116_v17 = vcombine.high %v108_v10, %v108_v10  ;;  %3490 = vmatprep.subr.msk.mxu1 %vm142_vm1, %v115_v19  ;;  %v375_v45 = vld [vmem:[#allocation2 + $0x40] sm:$0xff]  ;;  %v378_v46 = vld [vmem:[#allocation2 + $0x58] sm:$0xff]  ;;  %v5787_v48 = vpack.c.bf16 %v388_v41, %v385_v40  ;;  %v381_v49 = vld [vmem:[#allocation2 + $0x70] sm:$0xff]  ;;  %v5793_v52 = vpack.c.bf16 %v395_v44, %v392_v42 }
  0x42   :  { %3491 = vmatpush3.msk.msra.mxu1 %vm142_vm1, %v115_v19  ;;  %v5783_v47 = vpack.c.bf16 %v378_v46, %v375_v45  ;;  %v384_v50 = vld [vmem:[#allocation2 + $0x88] sm:$0xff]  ;;  %v78_v51 = vld [vmem:[%s6986_s0 + $0x20] sm:$0xff]  ;;  %v394_v54 = vld [vmem:[#allocation2 + $0xd8] sm:$0xff]  ;;  %p5612_p0 = pnand %p5611_p13, %p5605_p10 }
  0x43   :  { %3276 = vmatprep.subr.msk.mxu0 %vm142_vm1, %v116_v17  ;;  %3851 = vmatprep.subr.bf16.mxu1 %v6998_v31  ;;  %v391_v53 = vld [vmem:[#allocation2 + $0xc0] sm:$0xff]  ;;  %v398_v55 = vld [vmem:[#allocation2 + $0xf8] sm:$0xff]  ;;  %v401_v56 = vld [vmem:[#allocation2 + $0x110] sm:$0xff]  ;;  %v5799_v57 = vpack.c.bf16 %v384_v50, %v381_v49 }
  0x44   :  { %3277 = vmatpush1.msk.msra.mxu0 %vm142_vm1, %v108_v10  ;;  %3493 = vmatmul.mubr.msk.f32.vlgmr.msra.gmra.mrb[0].mxu1 %vm117_vm0, %v75_v26  ;;  %v5803_v58 = vpack.c.bf16 %v394_v54, %v391_v53  ;;  %v387_v59 = vld [vmem:[#allocation2 + $0xa0] sm:$0xff]  ;;  %v390_v60 = vld [vmem:[#allocation2 + $0xb8] sm:$0xff]  ;;  %v79_v61 = vld [vmem:[%s6986_s0 + $0x28] sm:$0xff]  ;;  %v5809_v62 = vpack.c.bf16 %v401_v56, %v398_v55 }
  0x45   :  { %3278 = vmatmul.mubr.msk.f32.vlgmr.msra.gmra.mrb[0].mxu0 %vm117_vm0, %v74_v8  ;;  %3820 = vmatprep.subr.bf16.mxu0 %v5743_v18  ;;  %v397_v63 = vld [vmem:[#allocation2 + $0xf0] sm:$0xff]  ;;  %v400_v0 = vld [vmem:[#allocation2 + $0x108] sm:$0xff]  ;;  %v407_v2 = vld [vmem:[#allocation2 + $0x140] sm:$0xff]  ;;  %v5815_v5 = vpack.c.bf16 %v390_v60, %v387_v59 }
  0x46   :  { %3822 = vmatpush1.bf16.msra.mxu0 %v5745_v20  ;;  %219 = vmatprep.mubr.f32.mxu0 %v6996_v3  ;;  %v404_v1 = vld [vmem:[#allocation2 + $0x128] sm:$0xff]  ;;  %v5819_v6 = vpack.c.bf16 %v400_v0, %v397_v63  ;;  %v393_v7 = vld [vmem:[#allocation2 + $0xd0] sm:$0xff]  ;;  %v403_v11 = vld [vmem:[#allocation2 + $0x120] sm:$0xff] }
  0x47   :  { %3824 = vmatprep.subr.bf16.mxu0 %v5747_v21  ;;  %3495 = vmatprep.mubr.msk.f32.mxu1 %vm117_vm0, %v76_v32  ;;  %v396_v8 = vld [vmem:[#allocation2 + $0xe8] sm:$0xff]  ;;  %v80_v9 = vld [vmem:[%s6986_s0 + $0x30] sm:$0xff]  ;;  %v5825_v10 = vpack.c.bf16 %v407_v2, %v404_v1  ;;  %v406_v12 = vld [vmem:[#allocation2 + $0x138] sm:$0xff] }
  0x48   :  { %3496 = vmatmul.mubr.msk.f32.gmra.mrb[2].mxu1 %vm117_vm0, %v77_v36  ;;  %v410_v13 = vld [vmem:[#allocation2 + $0x158] sm:$0xff]  ;;  %v413_v14 = vld [vmem:[#allocation2 + $0x170] sm:$0xff]  ;;  %v5831_v15 = vpack.c.bf16 %v396_v8, %v393_v7  ;;  %v5835_v16 = vpack.c.bf16 %v406_v12, %v403_v11  ;;  %v399_v17 = vld [vmem:[#allocation2 + $0x100] sm:$0xff] }
  0x49   :  { %3279 = vmatmul.mubr.msk.f32.gmra.mrb[2].mxu0 %vm117_vm0, %v75_v26  ;;  %3853 = vmatpush3.bf16.msra.mxu1 %v5778_v43  ;;  %v402_v19 = vld [vmem:[#allocation2 + $0x118] sm:$0xff]  ;;  %v5841_v23 = vpack.c.bf16 %v413_v14, %v410_v13  ;;  %v409_v24 = vld [vmem:[#allocation2 + $0x150] sm:$0xff]  ;;  %v412_v25 = vld [vmem:[#allocation2 + $0x168] sm:$0xff] }
  0x4a   :  { %3826 = vmatpush1.bf16.msra.mxu0 %v5756_v27  ;;  %225 = vmatprep.mubr.f32.mxu0 %v6996_v3  ;;  %v81_v22 = vld [vmem:[%s6986_s0 + $0x38] sm:$0xff]  ;;  %v433_v26 = vld [vmem:[#allocation5 + $0x8] sm:$0xff]  ;;  %v5847_v30 = vpack.c.bf16 %v402_v19, %v399_v17  ;;  %v405_v33 = vld [vmem:[#allocation2 + $0x130] sm:$0xff] }
  0x4b   :  { %3828 = vmatprep.subr.bf16.mxu0 %v5759_v28  ;;  %3854 = vmatprep.subr.bf16.mxu1 %v6998_v31  ;;  %v437_v29 = vld [vmem:[#allocation5 + $0x28] sm:$0xff]  ;;  %v432_v37 = vld [vmem:[#allocation5] sm:$0xff]  ;;  %v414_v45 = vld [vmem:[#allocation2 + $0x178] sm:$0xff] }
  0x4c   :  { %3498 = vmatprep.mubr.msk.f32.mxu1 %vm117_vm0, %v78_v51  ;;  %v408_v34 = vld [vmem:[#allocation2 + $0x148] sm:$0xff]  ;;  %v436_v38 = vld [vmem:[#allocation5 + $0x20] sm:$0xff]  ;;  %v435_v46 = vld [vmem:[#allocation5 + $0x18] sm:$0xff] }
  0x4d   :  { %3280 = vmatmul.mubr.msk.f32.gmra.mrb[4].mxu0 %vm117_vm0, %v76_v32  ;;  %3856 = vmatpush3.bf16.msra.mxu1 %v5783_v47  ;;  %v5851_v32 = vpack.c.bf16 %v412_v25, %v409_v24  ;;  %v441_v40 = vld [vmem:[#allocation5 + $0x48] sm:$0xff]  ;;  %v5861_v42 = vpack.c.bf16 %v408_v34, %v405_v33  ;;  %v411_v44 = vld [vmem:[#allocation2 + $0x160] sm:$0xff]  ;;  %v5865_v49 = vpack.c.bf16 %v436_v38, %v432_v37  ;;  %v439_v50 = vld [vmem:[#allocation5 + $0x38] sm:$0xff] }
  0x4e   :  { %3830 = vmatpush1.bf16.msra.mxu0 %v5770_v35  ;;  %231 = vmatprep.mubr.f32.mxu0 %v6996_v3  ;;  %v445_v41 = vld [vmem:[#allocation5 + $0x68] sm:$0xff]  ;;  %v440_v53 = vld [vmem:[#allocation5 + $0x40] sm:$0xff]  ;;  %v5873_v59 = vpack.c.bf16 %v414_v45, %v411_v44  ;;  %v5876_v60 = vpack.c.bf16 %v439_v50, %v435_v46  ;;  %v438_v63 = vld [vmem:[#allocation5 + $0x30] sm:$0xff] }
  0x4f   :  { %3832 = vmatprep.subr.bf16.mxu0 %v5776_v39  ;;  %3857 = vmatprep.subr.bf16.mxu1 %v6998_v31  ;;  %v444_v54 = vld [vmem:[#allocation5 + $0x60] sm:$0xff]  ;;  %v449_v55 = vld [vmem:[#allocation5 + $0x88] sm:$0xff]  ;;  %v443_v0 = vld [vmem:[#allocation5 + $0x58] sm:$0xff] }
  0x50   :  { %3499 = vmatmul.mubr.msk.f32.gmra.mrb[4].mxu1 %vm117_vm0, %v79_v61  ;;  %v453_v56 = vld [vmem:[#allocation5 + $0xa8] sm:$0xff]  ;;  %v5879_v1 = vpack.c.bf16 %v444_v54, %v440_v53  ;;  %v447_v2 = vld [vmem:[#allocation5 + $0x78] sm:$0xff]  ;;  %v448_v8 = vld [vmem:[#allocation5 + $0x80] sm:$0xff] }
  0x51   :  { %3281 = vmatmul.mubr.msk.f32.gmra.mrb[6].mxu0 %vm117_vm0, %v77_v36  ;;  %3859 = vmatpush3.bf16.msra.mxu1 %v5799_v57  ;;  %v5855_v36 = vpack.c.bf16 %v437_v29, %v433_v26  ;;  %v5882_v7 = vpack.c.bf16 %v453_v56, %v449_v55  ;;  %v5889_v12 = vpack.c.bf16 %v447_v2, %v443_v0  ;;  %v442_v13 = vld [vmem:[#allocation5 + $0x50] sm:$0xff]  ;;  %v451_v19 = vld [vmem:[#allocation5 + $0x98] sm:$0xff]  ;;  %v457_v34 = vld [vmem:[#allocation5 + $0xc8] sm:$0xff] }
  0x52   :  { %3834 = vmatpush1.bf16.msra.mxu0 %v5787_v48  ;;  %237 = vmatprep.mubr.f32.mxu0 %v6996_v3  ;;  %v446_v14 = vld [vmem:[#allocation5 + $0x70] sm:$0xff]  ;;  %v461_v37 = vld [vmem:[#allocation5 + $0xe8] sm:$0xff]  ;;  %v459_v38 = vld [vmem:[#allocation5 + $0xd8] sm:$0xff] }
  0x53   :  { %3836 = vmatprep.subr.bf16.mxu0 %v5793_v52  ;;  %3860 = vmatprep.subr.bf16.mxu1 %v6998_v31  ;;  %v5897_v24 = vpack.c.bf16 %v446_v14, %v442_v13  ;;  %v450_v26 = vld [vmem:[#allocation5 + $0x90] sm:$0xff]  ;;  %v456_v44 = vld [vmem:[#allocation5 + $0xc0] sm:$0xff]  ;;  %v465_v55 = vld [vmem:[#allocation5 + $0x108] sm:$0xff] }
  0x54   :  { %3501 = vmatprep.mubr.msk.f32.mxu1 %vm117_vm0, %v80_v9  ;;  %v454_v29 = vld [vmem:[#allocation5 + $0xb0] sm:$0xff]  ;;  %v460_v45 = vld [vmem:[#allocation5 + $0xe0] sm:$0xff]  ;;  %v471_v0 = vld [vmem:[#allocation5 + $0x138] sm:$0xff] }
  0x55   :  { %3282 = vmatmul.mubr.msk.f32.gmra.mrb[8].mxu0 %vm117_vm0, %v78_v51  ;;  %3862 = vmatpush3.bf16.msra.mxu1 %v5815_v5  ;;  %v5869_v51 = vpack.c.bf16 %v445_v41, %v441_v40  ;;  %v5905_v33 = vpack.c.bf16 %v454_v29, %v450_v26  ;;  %v5909_v40 = vpack.c.bf16 %v461_v37, %v457_v34  ;;  %v463_v41 = vld [vmem:[#allocation5 + $0xf8] sm:$0xff]  ;;  %v458_v53 = vld [vmem:[#allocation5 + $0xd0] sm:$0xff]  ;;  %v468_v13 = vld [vmem:[#allocation5 + $0x120] sm:$0xff] }
  0x56   :  { %3838 = vmatpush1.bf16.msra.mxu0 %v5803_v58  ;;  %243 = vmatprep.mubr.f32.mxu0 %v6996_v3  ;;  %v5911_v46 = vpack.c.bf16 %v463_v41, %v459_v38  ;;  %v5913_v50 = vpack.c.bf16 %v460_v45, %v456_v44  ;;  %v462_v54 = vld [vmem:[#allocation5 + $0xf0] sm:$0xff]  ;;  %v473_v29 = vld [vmem:[#allocation5 + $0x148] sm:$0xff]  ;;  %v475_v37 = vld [vmem:[#allocation5 + $0x158] sm:$0xff] }
  0x57   :  { %3840 = vmatprep.subr.bf16.mxu0 %v5809_v62  ;;  %3863 = vmatprep.subr.bf16.mxu1 %v6998_v31  ;;  %v5916_v56 = vpack.c.bf16 %v462_v54, %v458_v53  ;;  %v466_v14 = vld [vmem:[#allocation5 + $0x110] sm:$0xff]  ;;  %v477_v34 = vld [vmem:[#allocation5 + $0x168] sm:$0xff]  ;;  %v479_v41 = vld [vmem:[#allocation5 + $0x178] sm:$0xff] }
  0x58   :  { %3502 = vmatmul.mubr.msk.f32.gmra.mrb[6].mxu1 %vm117_vm0, %v81_v22  ;;  %7116 = vst [vmem:[#allocation14_spill] sm:$0xff] %v5913_v50  ;;  %v5933_v38 = vpack.c.bf16 %v477_v34, %v473_v29  ;;  %v472_v44 = vld [vmem:[#allocation5 + $0x140] sm:$0xff]  ;;  %v5935_v53 = vpack.c.bf16 %v479_v41, %v475_v37 }
  0x59   :  { %3283 = vmatmul.mubr.msk.f32.gmra.mrb[10].mxu0 %vm117_vm0, %v79_v61  ;;  %3865 = vmatpush3.bf16.msra.mxu1 %v5831_v15  ;;  %v434_v61 = vld [vmem:[#allocation5 + $0x10] sm:$0xff]  ;;  %7117 = vst [vmem:[#allocation15_spill] sm:$0xff] %v5916_v56  ;;  %v476_v45 = vld [vmem:[#allocation5 + $0x160] sm:$0xff] }
  0x5a   :  { %3842 = vmatpush1.bf16.msra.mxu0 %v5819_v6  ;;  %249 = vmatprep.mubr.f32.mxu0 %v6996_v3  ;;  %v5886_v11 = vpack.c.bf16 %v438_v63, %v434_v61  ;;  %v469_v61 = vld [vmem:[#allocation5 + $0x128] sm:$0xff]  ;;  %v467_v63 = vld [vmem:[#allocation5 + $0x118] sm:$0xff]  ;;  %7122 = vst [vmem:[#allocation20_spill] sm:$0xff] %v5933_v38  ;;  %7123 = vst [vmem:[#allocation21_spill] sm:$0xff] %v5935_v53  ;;  %v5937_v54 = vpack.c.bf16 %v476_v45, %v472_v44 }
  0x5b   :  { %3844 = vmatprep.subr.bf16.mxu0 %v5825_v10  ;;  %3866 = vmatprep.subr.bf16.mxu1 %v6998_v31  ;;  %v5920_v2 = vpack.c.bf16 %v469_v61, %v465_v55  ;;  %v474_v55 = vld [vmem:[#allocation5 + $0x150] sm:$0xff]  ;;  %v480_v29 = vld [vmem:[#allocation5 + $0x180] sm:$0xff] }
  0x5c   :  { %3536 = vmatprep.mubr.msk.f32.mxu1 %vm5644_vm2, %v6996_v3  ;;  %7124 = vst [vmem:[#allocation22_spill] sm:$0xff] %v5937_v54  ;;  %v478_v61 = vld [vmem:[#allocation5 + $0x170] sm:$0xff]  ;;  %v484_v34 = vld [vmem:[#allocation5 + $0x1a0] sm:$0xff] }
  0x5d   :  { %3284 = vmatmul.mubr.msk.f32.gmra.mrb[12].mxu0 %vm117_vm0, %v80_v9  ;;  %3868 = vmatpush3.bf16.msra.mxu1 %v5847_v30  ;;  %v452_v9 = vld [vmem:[#allocation5 + $0xa0] sm:$0xff]  ;;  %7118 = vst [vmem:[#allocation16_spill] sm:$0xff] %v5920_v2  ;;  %v5949_v41 = vpack.c.bf16 %v484_v34, %v480_v29  ;;  %v482_v44 = vld [vmem:[#allocation5 + $0x190] sm:$0xff] }
  0x5e   :  { %3846 = vmatpush1.bf16.msra.mxu0 %v5835_v16  ;;  %255 = vmatprep.mubr.f32.mxu0 %v6996_v3  ;;  %v5892_v17 = vpack.c.bf16 %v452_v9, %v448_v8  ;;  %v5922_v8 = vpack.c.bf16 %v471_v0, %v467_v63  ;;  %v464_v9 = vld [vmem:[#allocation5 + $0x100] sm:$0xff]  ;;  %v5940_v63 = vpack.c.bf16 %v478_v61, %v474_v55  ;;  %v481_v0 = vld [vmem:[#allocation5 + $0x188] sm:$0xff]  ;;  %v486_v45 = vld [vmem:[#allocation5 + $0x1b0] sm:$0xff] }
  0x5f   :  { %3848 = vmatprep.subr.bf16.mxu0 %v5841_v23  ;;  %3869 = vmatprep.subr.bf16.mxu1 %v6998_v31  ;;  %7128 = vst [vmem:[#allocation26_spill] sm:$0xff] %v5949_v41  ;;  %v5952_v55 = vpack.c.bf16 %v486_v45, %v482_v44  ;;  %v489_v61 = vld [vmem:[#allocation5 + $0x1c8] sm:$0xff]  ;;  %v492_v29 = vld [vmem:[#allocation5 + $0x1e0] sm:$0xff]  ;;  %v490_v44 = vld [vmem:[#allocation5 + $0x1d0] sm:$0xff] }
  0x60   :  { %7119 = vst [vmem:[#allocation17_spill] sm:$0xff] %v5922_v8  ;;  %7125 = vst [vmem:[#allocation23_spill] sm:$0xff] %v5940_v63  ;;  %v494_v45 = vld [vmem:[#allocation5 + $0x1f0] sm:$0xff] }
  0x61   :  { %3285 = vmatmul.mubr.msk.f32.gmra.mrb[14].mxu0 %vm117_vm0, %v81_v22  ;;  %3871 = vmatpush3.bf16.msra.mxu1 %v5861_v42  ;;  %v455_v22 = vld [vmem:[#allocation5 + $0xb8] sm:$0xff]  ;;  %7129 = vst [vmem:[#allocation27_spill] sm:$0xff] %v5952_v55 }
  0x62   :  { %3850 = vmatpush1.bf16.msra.mxu0 %v5851_v32  ;;  %646 = vmatprep.mubr.f32.mxu0 %v6996_v3  ;;  %v5901_v25 = vpack.c.bf16 %v455_v22, %v451_v19  ;;  %v5927_v19 = vpack.c.bf16 %v468_v13, %v464_v9  ;;  %v470_v22 = vld [vmem:[#allocation5 + $0x130] sm:$0xff]  ;;  %v485_v9 = vld [vmem:[#allocation5 + $0x1a8] sm:$0xff]  ;;  %v483_v13 = vld [vmem:[#allocation5 + $0x198] sm:$0xff] }
  0x63   :  { %3876 = vmatprep.subr.bf16.mxu0 %v5855_v36  ;;  %3872 = vmatprep.subr.bf16.mxu1 %v6998_v31  ;;  %v5929_v26 = vpack.c.bf16 %v470_v22, %v466_v14  ;;  %v5945_v14 = vpack.c.bf16 %v485_v9, %v481_v0  ;;  %v487_v22 = vld [vmem:[#allocation5 + $0x1b8] sm:$0xff]  ;;  %v493_v0 = vld [vmem:[#allocation5 + $0x1e8] sm:$0xff] }
  0x64   :  { %7120 = vst [vmem:[#allocation18_spill] sm:$0xff] %v5927_v19  ;;  %v5947_v37 = vpack.c.bf16 %v487_v22, %v483_v13  ;;  %v491_v9 = vld [vmem:[#allocation5 + $0x1d8] sm:$0xff]  ;;  %v488_v22 = vld [vmem:[#allocation5 + $0x1c0] sm:$0xff] }
  0x65   :  { %647 = vmatmul.mubr.f32.vlgmr.msra.gmra.mrb[0].mxu0 %v6996_v3  ;;  %3874 = vmatpush3.bf16.msra.mxu1 %v5873_v59  ;;  %7121 = vst [vmem:[#allocation19_spill] sm:$0xff] %v5929_v26  ;;  %7126 = vst [vmem:[#allocation24_spill] sm:$0xff] %v5945_v14  ;;  %v495_v13 = vld [vmem:[#allocation5 + $0x1f8] sm:$0xff]  ;;  %v5961_v31 = vpack.c.bf16 %v492_v29, %v488_v22  ;;  %v500_v22 = vld [vmem:[#allocation5 + $0x220] sm:$0xff] }
  0x66   :  { %3878 = vmatpush1.bf16.msra.mxu0 %v5865_v49  ;;  %808 = vmatprep.mubr.f32.mxu0 %v6996_v3  ;;  %7127 = vst [vmem:[#allocation25_spill] sm:$0xff] %v5947_v37  ;;  %v5959_v34 = vpack.c.bf16 %v495_v13, %v491_v9  ;;  %v503_v9 = vld [vmem:[#allocation5 + $0x238] sm:$0xff]  ;;  %v496_v13 = vld [vmem:[#allocation5 + $0x200] sm:$0xff] }
  0x67   :  { %3880 = vmatprep.subr.bf16.mxu0 %v5869_v51  ;;  %3940 = vmatprep.subr.bf16.mxu1 %v5876_v60  ;;  %7132 = vst [vmem:[#allocation30_spill] sm:$0xff] %v5961_v31 }
  0x68   :  { %3537 = vmatmul.mubr.f32.vlgmr.msra.gmra.mrb[8].mxu1 %v6996_v3  ;;  %7131 = vst [vmem:[#allocation29_spill] sm:$0xff] %v5959_v34 }
  0x69   :  { %3942 = vmatpush1.bf16.msra.mxu1 %v5886_v11  ;;  %879 = vmatprep.mubr.f32.mxu1 %v6996_v3  ;;  %v5957_v3 = vpack.c.bf16 %v493_v0, %v489_v61  ;;  %v501_v61 = vld [vmem:[#allocation5 + $0x228] sm:$0xff]  ;;  %v499_v0 = vld [vmem:[#allocation5 + $0x218] sm:$0xff] }
  0x6a   :  { %3882 = vmatpush1.bf16.msra.mxu0 %v5879_v1  ;;  %3944 = vmatprep.subr.bf16.mxu1 %v5889_v12  ;;  %v5971_v29 = vpack.c.bf16 %v503_v9, %v499_v0  ;;  %v511_v0 = vld [vmem:[#allocation5 + $0x278] sm:$0xff]  ;;  %v504_v9 = vld [vmem:[#allocation5 + $0x240] sm:$0xff] }
  0x6b   :  { %3884 = vmatprep.subr.bf16.mxu0 %v5882_v7  ;;  %7130 = vst [vmem:[#allocation28_spill] sm:$0xff] %v5957_v3 }
  0x6c   :  { %7135 = vst [vmem:[#allocation33_spill] sm:$0xff] %v5971_v29 }
  0x6d   :  { %3946 = vmatpush1.bf16.msra.mxu1 %v5897_v24 }
  0x6e   :  { %3886 = vmatpush1.bf16.msra.mxu0 %v5892_v17  ;;  %3948 = vmatprep.subr.bf16.mxu1 %v5901_v25 }
  0x6f   :  { %3888 = vmatprep.subr.bf16.mxu0 %v5909_v40 }
  0x71   :  { %3950 = vmatpush1.bf16.msra.mxu1 %v5905_v33 }
  0x72   :  { %3952 = vmatprep.subr.bf16.mxu1 %v5911_v46  ;;  %3890 = vmatpush1.bf16.msra.mxu0 %v5913_v50 }
  0x73   :  { %3892 = vmatprep.subr.bf16.mxu0 %v5920_v2 }
  0x75   :  { %3954 = vmatpush1.bf16.msra.mxu1 %v5916_v56 }
  0x76   :  { %3956 = vmatprep.subr.bf16.mxu1 %v5922_v8  ;;  %3894 = vmatpush1.bf16.msra.mxu0 %v5927_v19 }
  0x77   :  { %3896 = vmatprep.subr.bf16.mxu0 %v5933_v38 }
  0x79   :  { %3958 = vmatpush1.bf16.msra.mxu1 %v5929_v26 }
  0x7a   :  { %3960 = vmatprep.subr.bf16.mxu1 %v5935_v53  ;;  %3898 = vmatpush1.bf16.msra.mxu0 %v5937_v54  ;;  %v551_v54 = vld [vmem:[#allocation5 + $0x3b8] sm:$0xff] }
  0x7b   :  { %3900 = vmatprep.subr.bf16.mxu0 %v5945_v14  ;;  %v5973_v14 = vpack.c.bf16 %v500_v22, %v496_v13  ;;  %v508_v13 = vld [vmem:[#allocation5 + $0x260] sm:$0xff] }
  0x7d   :  { %3962 = vmatpush1.bf16.msra.mxu1 %v5940_v63  ;;  %7136 = vst [vmem:[#allocation34_spill] sm:$0xff] %v5973_v14  ;;  %v547_v63 = vld [vmem:[#allocation5 + $0x398] sm:$0xff] }
  0x7e   :  { %3964 = vmatprep.subr.bf16.mxu1 %v5947_v37  ;;  %3902 = vmatpush1.bf16.msra.mxu0 %v5949_v41  ;;  %v5964_v37 = vpack.c.bf16 %v494_v45, %v490_v44  ;;  %v498_v44 = vld [vmem:[#allocation5 + $0x210] sm:$0xff] }
  0x7f   :  { %3904 = vmatprep.subr.bf16.mxu0 %v5957_v3  ;;  %v502_v45 = vld [vmem:[#allocation5 + $0x230] sm:$0xff]  ;;  %v5985_v3 = vpack.c.bf16 %v508_v13, %v504_v9  ;;  %v516_v9 = vld [vmem:[#allocation5 + $0x2a0] sm:$0xff] }
  0x80   :  { %7133 = vst [vmem:[#allocation31_spill] sm:$0xff] %v5964_v37 }
  0x81   :  { %3966 = vmatpush1.bf16.msra.mxu1 %v5952_v55  ;;  %v497_v55 = vld [vmem:[#allocation5 + $0x208] sm:$0xff]  ;;  %7140 = vst [vmem:[#allocation38_spill] sm:$0xff] %v5985_v3 }
  0x82   :  { %3968 = vmatprep.subr.bf16.mxu1 %v5959_v34  ;;  %3906 = vmatpush1.bf16.msra.mxu0 %v5961_v31  ;;  %v5969_v41 = vpack.c.bf16 %v501_v61, %v497_v55  ;;  %v5976_v34 = vpack.c.bf16 %v502_v45, %v498_v44  ;;  %v509_v55 = vld [vmem:[#allocation5 + $0x268] sm:$0xff]  ;;  %v507_v61 = vld [vmem:[#allocation5 + $0x258] sm:$0xff]  ;;  %v506_v44 = vld [vmem:[#allocation5 + $0x250] sm:$0xff] }
  0x83   :  { %v5983_v22 = vpack.c.bf16 %v511_v0, %v507_v61  ;;  %v510_v45 = vld [vmem:[#allocation5 + $0x270] sm:$0xff]  ;;  %v519_v61 = vld [vmem:[#allocation5 + $0x2b8] sm:$0xff]  ;;  %v512_v0 = vld [vmem:[#allocation5 + $0x280] sm:$0xff] }
  0x84   :  { %7134 = vst [vmem:[#allocation32_spill] sm:$0xff] %v5969_v41  ;;  %3908 = vmatprep.subr.bf16.mxu0 %v5969_v41  ;;  %7137 = vst [vmem:[#allocation35_spill] sm:$0xff] %v5976_v34  ;;  %v5997_v41 = vpack.c.bf16 %v516_v9, %v512_v0  ;;  %v524_v0 = vld [vmem:[#allocation5 + $0x2e0] sm:$0xff] }
  0x85   :  { %3970 = vmatpush1.bf16.msra.mxu1 %v5964_v37  ;;  %v505_v37 = vld [vmem:[#allocation5 + $0x248] sm:$0xff]  ;;  %7139 = vst [vmem:[#allocation37_spill] sm:$0xff] %v5983_v22 }
  0x86   :  { %3972 = vmatprep.subr.bf16.mxu1 %v5971_v29  ;;  %3910 = vmatpush1.bf16.msra.mxu0 %v5973_v14  ;;  %v5981_v31 = vpack.c.bf16 %v509_v55, %v505_v37  ;;  %v5988_v29 = vpack.c.bf16 %v510_v45, %v506_v44  ;;  %v517_v37 = vld [vmem:[#allocation5 + $0x2a8] sm:$0xff]  ;;  %v515_v55 = vld [vmem:[#allocation5 + $0x298] sm:$0xff]  ;;  %7144 = vst [vmem:[#allocation42_spill] sm:$0xff] %v5997_v41  ;;  %v514_v44 = vld [vmem:[#allocation5 + $0x290] sm:$0xff] }
  0x87   :  { %v5995_v13 = vpack.c.bf16 %v519_v61, %v515_v55  ;;  %v518_v45 = vld [vmem:[#allocation5 + $0x2b0] sm:$0xff]  ;;  %v527_v55 = vld [vmem:[#allocation5 + $0x2f8] sm:$0xff]  ;;  %v520_v61 = vld [vmem:[#allocation5 + $0x2c0] sm:$0xff] }
  0x88   :  { %7138 = vst [vmem:[#allocation36_spill] sm:$0xff] %v5981_v31  ;;  %3912 = vmatprep.subr.bf16.mxu0 %v5981_v31  ;;  %7141 = vst [vmem:[#allocation39_spill] sm:$0xff] %v5988_v29  ;;  %v6009_v31 = vpack.c.bf16 %v524_v0, %v520_v61  ;;  %v532_v61 = vld [vmem:[#allocation5 + $0x320] sm:$0xff] }
  0x89   :  { %3974 = vmatpush1.bf16.msra.mxu1 %v5976_v34  ;;  %v513_v34 = vld [vmem:[#allocation5 + $0x288] sm:$0xff]  ;;  %7143 = vst [vmem:[#allocation41_spill] sm:$0xff] %v5995_v13 }
  0x8a   :  { %3976 = vmatprep.subr.bf16.mxu1 %v5983_v22  ;;  %3914 = vmatpush1.bf16.msra.mxu0 %v5985_v3  ;;  %v5993_v14 = vpack.c.bf16 %v517_v37, %v513_v34  ;;  %v6000_v22 = vpack.c.bf16 %v518_v45, %v514_v44  ;;  %v525_v34 = vld [vmem:[#allocation5 + $0x2e8] sm:$0xff]  ;;  %v523_v37 = vld [vmem:[#allocation5 + $0x2d8] sm:$0xff]  ;;  %7148 = vst [vmem:[#allocation46_spill] sm:$0xff] %v6009_v31  ;;  %v522_v44 = vld [vmem:[#allocation5 + $0x2d0] sm:$0xff] }
  0x8b   :  { %v6007_v9 = vpack.c.bf16 %v527_v55, %v523_v37  ;;  %v526_v45 = vld [vmem:[#allocation5 + $0x2f0] sm:$0xff]  ;;  %v535_v37 = vld [vmem:[#allocation5 + $0x338] sm:$0xff]  ;;  %v528_v55 = vld [vmem:[#allocation5 + $0x300] sm:$0xff] }
  0x8c   :  { %7142 = vst [vmem:[#allocation40_spill] sm:$0xff] %v5993_v14  ;;  %3916 = vmatprep.subr.bf16.mxu0 %v5993_v14  ;;  %7145 = vst [vmem:[#allocation43_spill] sm:$0xff] %v6000_v22  ;;  %v6021_v14 = vpack.c.bf16 %v532_v61, %v528_v55  ;;  %v540_v55 = vld [vmem:[#allocation5 + $0x360] sm:$0xff] }
  0x8d   :  { %3978 = vmatpush1.bf16.msra.mxu1 %v5988_v29  ;;  %v521_v29 = vld [vmem:[#allocation5 + $0x2c8] sm:$0xff]  ;;  %7147 = vst [vmem:[#allocation45_spill] sm:$0xff] %v6007_v9 }
  0x8e   :  { %3980 = vmatprep.subr.bf16.mxu1 %v5995_v13  ;;  %3918 = vmatpush1.bf16.msra.mxu0 %v5997_v41  ;;  %v6005_v3 = vpack.c.bf16 %v525_v34, %v521_v29  ;;  %v6012_v13 = vpack.c.bf16 %v526_v45, %v522_v44  ;;  %v533_v29 = vld [vmem:[#allocation5 + $0x328] sm:$0xff]  ;;  %v531_v34 = vld [vmem:[#allocation5 + $0x318] sm:$0xff]  ;;  %7152 = vst [vmem:[#allocation50_spill] sm:$0xff] %v6021_v14  ;;  %v530_v44 = vld [vmem:[#allocation5 + $0x310] sm:$0xff] }
  0x8f   :  { %v6019_v0 = vpack.c.bf16 %v535_v37, %v531_v34  ;;  %v534_v45 = vld [vmem:[#allocation5 + $0x330] sm:$0xff]  ;;  %v543_v34 = vld [vmem:[#allocation5 + $0x378] sm:$0xff]  ;;  %v536_v37 = vld [vmem:[#allocation5 + $0x340] sm:$0xff] }
  0x90   :  { %7146 = vst [vmem:[#allocation44_spill] sm:$0xff] %v6005_v3  ;;  %3920 = vmatprep.subr.bf16.mxu0 %v6005_v3  ;;  %7149 = vst [vmem:[#allocation47_spill] sm:$0xff] %v6012_v13  ;;  %v6033_v3 = vpack.c.bf16 %v540_v55, %v536_v37  ;;  %v546_v37 = vld [vmem:[#allocation5 + $0x390] sm:$0xff] }
  0x91   :  { %3982 = vmatpush1.bf16.msra.mxu1 %v6000_v22  ;;  %v529_v22 = vld [vmem:[#allocation5 + $0x308] sm:$0xff]  ;;  %7151 = vst [vmem:[#allocation49_spill] sm:$0xff] %v6019_v0 }
  0x92   :  { %3984 = vmatprep.subr.bf16.mxu1 %v6007_v9  ;;  %3922 = vmatpush1.bf16.msra.mxu0 %v6009_v31  ;;  %v6017_v41 = vpack.c.bf16 %v533_v29, %v529_v22  ;;  %v6024_v9 = vpack.c.bf16 %v534_v45, %v530_v44  ;;  %v541_v22 = vld [vmem:[#allocation5 + $0x368] sm:$0xff]  ;;  %v539_v29 = vld [vmem:[#allocation5 + $0x358] sm:$0xff]  ;;  %7156 = vst [vmem:[#allocation54_spill] sm:$0xff] %v6033_v3  ;;  %v538_v44 = vld [vmem:[#allocation5 + $0x350] sm:$0xff] }
  0x93   :  { %v6031_v61 = vpack.c.bf16 %v543_v34, %v539_v29  ;;  %v542_v45 = vld [vmem:[#allocation5 + $0x370] sm:$0xff]  ;;  %v544_v29 = vld [vmem:[#allocation5 + $0x380] sm:$0xff] }
  0x94   :  { %7150 = vst [vmem:[#allocation48_spill] sm:$0xff] %v6017_v41  ;;  %3924 = vmatprep.subr.bf16.mxu0 %v6017_v41  ;;  %7153 = vst [vmem:[#allocation51_spill] sm:$0xff] %v6024_v9  ;;  %v545_v41 = vld [vmem:[#allocation5 + $0x388] sm:$0xff]  ;;  %v548_v34 = vld [vmem:[#allocation5 + $0x3a0] sm:$0xff] }
  0x95   :  { %3986 = vmatpush1.bf16.msra.mxu1 %v6012_v13  ;;  %v537_v13 = vld [vmem:[#allocation5 + $0x348] sm:$0xff]  ;;  %7155 = vst [vmem:[#allocation53_spill] sm:$0xff] %v6031_v61  ;;  %v6045_v55 = vpack.c.bf16 %v548_v34, %v544_v29  ;;  %v558_v29 = vld [vmem:[#allocation5 + $0x3f0] sm:$0xff] }
  0x96   :  { %3988 = vmatprep.subr.bf16.mxu1 %v6019_v0  ;;  %3926 = vmatpush1.bf16.msra.mxu0 %v6021_v14  ;;  %v6029_v31 = vpack.c.bf16 %v541_v22, %v537_v13  ;;  %v6036_v14 = vpack.c.bf16 %v542_v45, %v538_v44  ;;  %v549_v0 = vld [vmem:[#allocation5 + $0x3a8] sm:$0xff]  ;;  %v6042_v22 = vpack.c.bf16 %v551_v54, %v547_v63  ;;  %v550_v44 = vld [vmem:[#allocation5 + $0x3b0] sm:$0xff]  ;;  %v555_v54 = vld [vmem:[#allocation5 + $0x3d8] sm:$0xff] }
  0x97   :  { %v6040_v13 = vpack.c.bf16 %v549_v0, %v545_v41  ;;  %7160 = vst [vmem:[#allocation58_spill] sm:$0xff] %v6045_v55  ;;  %v553_v45 = vld [vmem:[#allocation5 + $0x3c8] sm:$0xff]  ;;  %v559_v63 = vld [vmem:[#allocation5 + $0x3f8] sm:$0xff]  ;;  %v552_v0 = vld [vmem:[#allocation5 + $0x3c0] sm:$0xff] }
  0x98   :  { %7154 = vst [vmem:[#allocation52_spill] sm:$0xff] %v6029_v31  ;;  %3928 = vmatprep.subr.bf16.mxu0 %v6029_v31  ;;  %7157 = vst [vmem:[#allocation55_spill] sm:$0xff] %v6036_v14  ;;  %v557_v31 = vld [vmem:[#allocation5 + $0x3e8] sm:$0xff] }
  0x99   :  { %3990 = vmatpush1.bf16.msra.mxu1 %v6024_v9  ;;  %7158 = vst [vmem:[#allocation56_spill] sm:$0xff] %v6040_v13  ;;  %7159 = vst [vmem:[#allocation57_spill] sm:$0xff] %v6042_v22  ;;  %v6051_v41 = vpack.c.bf16 %v557_v31, %v553_v45  ;;  %v556_v9 = vld [vmem:[#allocation5 + $0x3e0] sm:$0xff]  ;;  %v7166_v31 = vmov 0.0|0.0  }
  0x9a   :  { %3992 = vmatprep.subr.bf16.mxu1 %v6031_v61  ;;  %3930 = vmatpush1.bf16.msra.mxu0 %v6033_v3  ;;  %v6049_v61 = vpack.c.bf16 %v550_v44, %v546_v37  ;;  %v6053_v3 = vpack.c.bf16 %v559_v63, %v555_v54  ;;  %v6056_v34 = vpack.c.bf16 %v556_v9, %v552_v0  ;;  %v6068_v44 = vsub.s32 2, %v5733_v4  ;;  %v83_v9 = vld [vmem:[%s6988_s2] sm:$0x7] }
  0x9b   :  { %3932 = vmatprep.subr.bf16.mxu0 %v6040_v13  ;;  %7162 = vst [vmem:[#allocation60_spill] sm:$0xff] %v6051_v41 }
  0x9c   :  { %7161 = vst [vmem:[#allocation59_spill] sm:$0xff] %v6049_v61  ;;  %7163 = vst [vmem:[#allocation61_spill] sm:$0xff] %v6053_v3 }
  0x9d   :  { %3994 = vmatpush1.bf16.msra.mxu1 %v6036_v14  ;;  %v554_v14 = vld [vmem:[#allocation5 + $0x3d0] sm:$0xff]  ;;  %7164 = vst [vmem:[#allocation62_spill] sm:$0xff] %v6056_v34 }
  0x9e   :  { %3996 = vmatprep.subr.bf16.mxu1 %v6042_v22  ;;  %3934 = vmatpush1.bf16.msra.mxu0 %v6045_v55  ;;  %v6060_v37 = vpack.c.bf16 %v558_v29, %v554_v14  ;;  %v96_v14 = vrot.slane %v83_v9, %v6068_v44  ;;  %v6085_v55 = vsub.s32 0, %v5733_v4 }
  0x9f   :  { %3936 = vmatprep.subr.bf16.mxu0 %v6051_v41 }
  0xa0   :  { %7165 = vst [vmem:[#allocation63_spill] sm:$0xff] %v6060_v37  ;;  %7172 = vst [vmem:[#allocation69_spill] sm:$0xff] %v6085_v55 }
  0xa1   :  { %3998 = vmatpush1.bf16.msra.mxu1 %v6049_v61 }
  0xa2   :  { %4000 = vmatprep.subr.bf16.mxu1 %v6053_v3  ;;  %3938 = vmatpush1.bf16.msra.mxu0 %v6056_v34 }
  0xa3   :  { %4004 = vmatprep.subr.bf16.mxu0 %v5743_v18 }
  0xa5   :  { %4002 = vmatpush1.bf16.msra.mxu1 %v6060_v37 }
  0xa6   :  { %4035 = vmatprep.subr.bf16.mxu1 %v7166_v31 }
 0x117   :  { %v3494_v45 = vpop.f32.mrb[0].mxu1 }
 0x118   :  { %v6074_v54 = vadd.f32 %v3494_v45, %v96_v14  ;;  %v328_v63 = vpop.f32.mrb[1].mxu1  ;;  %v415_v45 = vld [vmem:[%s6990_s4] sm:$0x7] }
 0x11a   :  { %7167 = vst [vmem:[#allocation64_spill] sm:$0xff] %v6074_v54 }
 0x11b   :  { %v3497_v0 = vpop.f32.mrb[2].mxu1 }
 0x11c   :  { %v6076_v29 = vadd.f32 %v3497_v0, %v96_v14  ;;  %v338_v37 = vpop.f32.mrb[3].mxu1  ;;  %v6091_v0 = vsub.s32 1, %v5733_v4 }
 0x11d   :  { %v6078_v18 = vadd.f32 %v338_v37, %v96_v14 }
 0x11e   :  { %7168 = vst [vmem:[#allocation65_spill] sm:$0xff] %v6076_v29 }
 0x11f   :  { %7169 = vst [vmem:[#allocation66_spill] sm:$0xff] %v6078_v18  ;;  %v424_v18 = vrot.slane %v415_v45, %v6091_v0 }
 0x123   :  { %v3500_v34 = vpop.f32.mrb[4].mxu1 }
 0x124   :  { %v6080_v3 = vadd.f32 %v3500_v34, %v96_v14  ;;  %v348_v41 = vpop.f32.mrb[5].mxu1  ;;  %v88_v34 = vrot.slane %v83_v9, %v6085_v55 }
 0x125   :  { %v6082_v61 = vadd.f32 %v348_v41, %v96_v14 }
 0x126   :  { %7170 = vst [vmem:[#allocation67_spill] sm:$0xff] %v6080_v3  ;;  %v420_v3 = vrot.slane %v415_v45, %v6085_v55 }
 0x127   :  { %7171 = vst [vmem:[#allocation68_spill] sm:$0xff] %v6082_v61  ;;  %v92_v61 = vrot.slane %v83_v9, %v6091_v0 }
 0x128   :  { %v6101_v22 = vadd.f32 %v420_v3, %v88_v34  ;;  %v6108_v3 = vrot.slane %v415_v45, %v6068_v44  ;;  %v7182_v45 = vld [vmem:[#allocation23_spill] sm:$0xff] }
 0x129   :  { %v6103_v53 = vadd.f32 %v424_v18, %v92_v61 }
 0x12a   :  { %7175 = vst [vmem:[#allocation72_spill] sm:$0xff] %v6101_v22 }
 0x12b   :  { %v3503_v54 = vpop.f32.mrb[6].mxu1  ;;  %7176 = vst [vmem:[#allocation73_spill] sm:$0xff] %v6103_v53 }
 0x12c   :  { %v6093_v29 = vadd.f32 %v3503_v54, %v96_v14  ;;  %v358_v37 = vpop.f32.mrb[7].mxu1 }
 0x12d   :  { %v6097_v41 = vadd.f32 %v358_v37, %v96_v14 }
 0x12e   :  { %7173 = vst [vmem:[#allocation70_spill] sm:$0xff] %v6093_v29 }
 0x12f   :  { %7174 = vst [vmem:[#allocation71_spill] sm:$0xff] %v6097_v41 }
 0x138   :  { %v648_v13 = vpop.f32.mrb[0].mxu0 }
 0x139   :  { %v5316_v4 = vadd.f32 %v6101_v22, %v648_v13  ;;  %v650_v54 = vpop.f32.mrb[1].mxu0  ;;  %v329_v22 = vadd.f32 %v328_v63, %v96_v14  ;;  %v7180_v14 = vld [vmem:[#allocation21_spill] sm:$0xff]  ;;  %v7181_v63 = vld [vmem:[#allocation22_spill] sm:$0xff] }
 0x13a   :  { %v5318_v38 = vadd.f32 %v6103_v53, %v650_v54 }
 0x13b   :  { %v3295_v29 = vmul.f32 -1.442695, %v5316_v4  ;;  %v719_v26 = vpop.f32.mrb[8].mxu1 }
 0x13c   :  { %v3296_v55 = vmul.f32 -1.442695, %v5318_v38  ;;  %v3538_v37 = vpop.f32.mrb[9].mxu1  ;;  %v720_v61 = vadd.f32 %v719_v26, %v6108_v3  ;;  %v7177_v26 = vmov 0.0  }
 0x13d   :  { %5378 = vpow2.f32 %v3295_v29 }
 0x13e   :  { %5380 = vpow2.f32 %v3296_v55 }
 0x147   :  { %v5379_v41 = vpop.eup %5378 }
 0x148   :  { %v727_v9 = vadd.f32 1.0, %v5379_v41  ;;  %v5381_v34 = vpop.eup %5380 }
 0x149   :  { %v734_v18 = vadd.f32 1.0, %v5381_v34  ;;  %v7184_v34 = vld [vmem:[#allocation25_spill] sm:$0xff] }
 0x14a   :  { %5382 = vrcp.f32 %v727_v9  ;;  %v7183_v9 = vld [vmem:[#allocation24_spill] sm:$0xff] }
 0x14b   :  { %5384 = vrcp.f32 %v734_v18  ;;  %v7185_v18 = vld [vmem:[#allocation26_spill] sm:$0xff] }
 0x154   :  { %v5383_v13 = vpop.eup %5382 }
 0x155   :  { %v737_v4 = vmul.f32 %v5383_v13, %v720_v61  ;;  %v5385_v29 = vpop.eup %5384  ;;  %v7186_v61 = vld [vmem:[#allocation27_spill] sm:$0xff]  ;;  %v7187_v13 = vld [vmem:[#allocation28_spill] sm:$0xff] }
 0x156   :  { %v740_v38 = vsub.f32 1.0, %v5385_v29  ;;  %v742_v53 = vmul.f32 0.0, %v5385_v29  ;;  %v7190_v29 = vld [vmem:[#allocation31_spill] sm:$0xff] }
 0x157   :  { %v738_v54 = vadd.f32 %v737_v4, %v329_v22  ;;  %v7179_v22 = vld [vmem:[#allocation20_spill] sm:$0xff]  ;;  %v7188_v4 = vld [vmem:[#allocation29_spill] sm:$0xff] }
 0x159   :  { %5386 = vtanh.f32 %v738_v54  ;;  %v7189_v54 = vld [vmem:[#allocation30_spill] sm:$0xff] }
 0x163   :  { %v5387_v37 = vpop.eup %5386 }
 0x164   :  { %v741_v55 = vmul.f32 %v5387_v37, %v740_v38  ;;  %v7191_v38 = vld [vmem:[#allocation32_spill] sm:$0xff]  ;;  %v7192_v37 = vld [vmem:[#allocation33_spill] sm:$0xff] }
 0x166   :  { %v6111_v41 = vadd.f32 %v742_v53, %v741_v55  ;;  %v7178_v53 = vld [vmem:[#allocation19_spill] sm:$0xff]  ;;  %v7193_v55 = vld [vmem:[#allocation34_spill] sm:$0xff] }
 0x168   :  { %809 = vmatmul.mubr.f32.vlgmr.msra.gmra.mrb[16].mxu0 %v6111_v41  ;;  %880 = vmatmul.mubr.f32.vlgmr.msra.gmra.mrb[10].mxu1 %v6111_v41 }
 0x169   :  { %4006 = vmatpush1.bf16.msra.mxu0 %v5745_v20  ;;  %4037 = vmatpush3.bf16.msra.mxu1 %v5778_v43 }
 0x16a   :  { %4008 = vmatprep.subr.bf16.mxu0 %v5747_v21  ;;  %4038 = vmatprep.subr.bf16.mxu1 %v7166_v31 }
 0x16b   :  { %969 = vmatprep.mubr.f32.mxu0 %v7177_v26  ;;  %3571 = vmatprep.mubr.msk.f32.mxu1 %vm5644_vm2, %v7177_v26 }
 0x16d   :  { %4010 = vmatpush1.bf16.msra.mxu0 %v5756_v27  ;;  %4040 = vmatpush3.bf16.msra.mxu1 %v5783_v47 }
 0x16e   :  { %4012 = vmatprep.subr.bf16.mxu0 %v5759_v28  ;;  %4041 = vmatprep.subr.bf16.mxu1 %v7166_v31 }
 0x171   :  { %4014 = vmatpush1.bf16.msra.mxu0 %v5770_v35  ;;  %4043 = vmatpush3.bf16.msra.mxu1 %v5799_v57 }
 0x172   :  { %4016 = vmatprep.subr.bf16.mxu0 %v5776_v39  ;;  %4044 = vmatprep.subr.bf16.mxu1 %v7166_v31 }
 0x175   :  { %4018 = vmatpush1.bf16.msra.mxu0 %v5787_v48  ;;  %4046 = vmatpush3.bf16.msra.mxu1 %v5815_v5 }
 0x176   :  { %4020 = vmatprep.subr.bf16.mxu0 %v5793_v52  ;;  %4047 = vmatprep.subr.bf16.mxu1 %v7166_v31 }
 0x179   :  { %4022 = vmatpush1.bf16.msra.mxu0 %v5803_v58  ;;  %4049 = vmatpush3.bf16.msra.mxu1 %v5831_v15 }
 0x17a   :  { %4024 = vmatprep.subr.bf16.mxu0 %v5809_v62  ;;  %4050 = vmatprep.subr.bf16.mxu1 %v7166_v31 }
 0x17d   :  { %4026 = vmatpush1.bf16.msra.mxu0 %v5819_v6  ;;  %4052 = vmatpush3.bf16.msra.mxu1 %v5847_v30 }
 0x17e   :  { %4028 = vmatprep.subr.bf16.mxu0 %v5825_v10  ;;  %4053 = vmatprep.subr.bf16.mxu1 %v7166_v31 }
 0x181   :  { %4030 = vmatpush1.bf16.msra.mxu0 %v5835_v16  ;;  %4055 = vmatpush3.bf16.msra.mxu1 %v5861_v42 }
 0x182   :  { %4032 = vmatprep.subr.bf16.mxu0 %v5841_v23  ;;  %4056 = vmatprep.subr.bf16.mxu1 %v7166_v31 }
 0x185   :  { %4034 = vmatpush1.bf16.msra.mxu0 %v5851_v32  ;;  %4058 = vmatpush3.bf16.msra.mxu1 %v5873_v59 }
 0x186   :  { %4060 = vmatprep.subr.bf16.mxu0 %v5855_v36  ;;  %4124 = vmatprep.subr.bf16.mxu1 %v5876_v60 }
 0x188   :  { %970 = vmatmul.mubr.f32.vlgmr.msra.gmra.mrb[2].mxu0 %v6111_v41  ;;  %3572 = vmatmul.mubr.f32.vlgmr.msra.gmra.mrb[12].mxu1 %v6111_v41 }
 0x189   :  { %4062 = vmatpush1.bf16.msra.mxu0 %v5865_v49  ;;  %4126 = vmatpush1.bf16.msra.mxu1 %v5886_v11 }
 0x18a   :  { %4064 = vmatprep.subr.bf16.mxu0 %v5869_v51  ;;  %4128 = vmatprep.subr.bf16.mxu1 %v5889_v12 }
 0x18d   :  { %4066 = vmatpush1.bf16.msra.mxu0 %v5879_v1  ;;  %4130 = vmatpush1.bf16.msra.mxu1 %v5897_v24 }
 0x18e   :  { %4068 = vmatprep.subr.bf16.mxu0 %v5882_v7  ;;  %4132 = vmatprep.subr.bf16.mxu1 %v5901_v25 }
 0x191   :  { %4070 = vmatpush1.bf16.msra.mxu0 %v5892_v17  ;;  %4134 = vmatpush1.bf16.msra.mxu1 %v5905_v33 }
 0x192   :  { %4072 = vmatprep.subr.bf16.mxu0 %v5909_v40  ;;  %4136 = vmatprep.subr.bf16.mxu1 %v5911_v46 }
 0x195   :  { %4074 = vmatpush1.bf16.msra.mxu0 %v5913_v50  ;;  %4138 = vmatpush1.bf16.msra.mxu1 %v5916_v56 }
 0x196   :  { %4076 = vmatprep.subr.bf16.mxu0 %v5920_v2  ;;  %4140 = vmatprep.subr.bf16.mxu1 %v5922_v8  ;;  %v7230_v2 = vld [vmem:[#allocation73_spill] sm:$0xff] }
 0x199   :  { %4078 = vmatpush1.bf16.msra.mxu0 %v5927_v19  ;;  %4142 = vmatpush1.bf16.msra.mxu1 %v7178_v53 }
 0x19a   :  { %4080 = vmatprep.subr.bf16.mxu0 %v7179_v22  ;;  %4144 = vmatprep.subr.bf16.mxu1 %v7180_v14 }
 0x19d   :  { %4082 = vmatpush1.bf16.msra.mxu0 %v7181_v63  ;;  %4146 = vmatpush1.bf16.msra.mxu1 %v7182_v45 }
 0x19e   :  { %4084 = vmatprep.subr.bf16.mxu0 %v7183_v9  ;;  %4148 = vmatprep.subr.bf16.mxu1 %v7184_v34  ;;  %v7194_v9 = vld [vmem:[#allocation35_spill] sm:$0xff]  ;;  %v7195_v34 = vld [vmem:[#allocation36_spill] sm:$0xff] }
 0x1a1   :  { %4086 = vmatpush1.bf16.msra.mxu0 %v7185_v18  ;;  %4150 = vmatpush1.bf16.msra.mxu1 %v7186_v61  ;;  %v7196_v18 = vld [vmem:[#allocation37_spill] sm:$0xff]  ;;  %v7197_v61 = vld [vmem:[#allocation38_spill] sm:$0xff] }
 0x1a2   :  { %4088 = vmatprep.subr.bf16.mxu0 %v7187_v13  ;;  %4152 = vmatprep.subr.bf16.mxu1 %v7188_v4  ;;  %v7198_v13 = vld [vmem:[#allocation39_spill] sm:$0xff]  ;;  %v7199_v4 = vld [vmem:[#allocation40_spill] sm:$0xff] }
 0x1a5   :  { %4090 = vmatpush1.bf16.msra.mxu0 %v7189_v54  ;;  %4154 = vmatpush1.bf16.msra.mxu1 %v7190_v29  ;;  %v7200_v54 = vld [vmem:[#allocation41_spill] sm:$0xff]  ;;  %v7201_v29 = vld [vmem:[#allocation42_spill] sm:$0xff] }
 0x1a6   :  { %4092 = vmatprep.subr.bf16.mxu0 %v7191_v38  ;;  %4156 = vmatprep.subr.bf16.mxu1 %v7192_v37  ;;  %v7202_v38 = vld [vmem:[#allocation43_spill] sm:$0xff]  ;;  %v7203_v37 = vld [vmem:[#allocation44_spill] sm:$0xff] }
 0x1a9   :  { %4094 = vmatpush1.bf16.msra.mxu0 %v7193_v55  ;;  %4158 = vmatpush1.bf16.msra.mxu1 %v7194_v9  ;;  %v7204_v55 = vld [vmem:[#allocation45_spill] sm:$0xff]  ;;  %v7205_v9 = vld [vmem:[#allocation46_spill] sm:$0xff] }
 0x1aa   :  { %4096 = vmatprep.subr.bf16.mxu0 %v7195_v34  ;;  %4160 = vmatprep.subr.bf16.mxu1 %v7196_v18  ;;  %v7206_v34 = vld [vmem:[#allocation47_spill] sm:$0xff]  ;;  %v7207_v18 = vld [vmem:[#allocation48_spill] sm:$0xff] }
 0x1ad   :  { %4098 = vmatpush1.bf16.msra.mxu0 %v7197_v61  ;;  %4162 = vmatpush1.bf16.msra.mxu1 %v7198_v13  ;;  %v7208_v61 = vld [vmem:[#allocation49_spill] sm:$0xff]  ;;  %v7209_v13 = vld [vmem:[#allocation50_spill] sm:$0xff] }
 0x1ae   :  { %4100 = vmatprep.subr.bf16.mxu0 %v7199_v4  ;;  %4164 = vmatprep.subr.bf16.mxu1 %v7200_v54  ;;  %v7210_v4 = vld [vmem:[#allocation51_spill] sm:$0xff]  ;;  %v7211_v54 = vld [vmem:[#allocation52_spill] sm:$0xff] }
 0x1b1   :  { %4102 = vmatpush1.bf16.msra.mxu0 %v7201_v29  ;;  %4166 = vmatpush1.bf16.msra.mxu1 %v7202_v38  ;;  %v7212_v29 = vld [vmem:[#allocation53_spill] sm:$0xff]  ;;  %v7213_v38 = vld [vmem:[#allocation54_spill] sm:$0xff] }
 0x1b2   :  { %4104 = vmatprep.subr.bf16.mxu0 %v7203_v37  ;;  %4168 = vmatprep.subr.bf16.mxu1 %v7204_v55  ;;  %v7214_v37 = vld [vmem:[#allocation55_spill] sm:$0xff]  ;;  %v7215_v55 = vld [vmem:[#allocation56_spill] sm:$0xff] }
 0x1b5   :  { %4106 = vmatpush1.bf16.msra.mxu0 %v7205_v9  ;;  %4170 = vmatpush1.bf16.msra.mxu1 %v7206_v34  ;;  %v7216_v9 = vld [vmem:[#allocation57_spill] sm:$0xff]  ;;  %v7217_v34 = vld [vmem:[#allocation58_spill] sm:$0xff] }
 0x1b6   :  { %4108 = vmatprep.subr.bf16.mxu0 %v7207_v18  ;;  %4172 = vmatprep.subr.bf16.mxu1 %v7208_v61  ;;  %v7218_v18 = vld [vmem:[#allocation59_spill] sm:$0xff]  ;;  %v7219_v61 = vld [vmem:[#allocation60_spill] sm:$0xff] }
 0x1b9   :  { %4110 = vmatpush1.bf16.msra.mxu0 %v7209_v13  ;;  %4174 = vmatpush1.bf16.msra.mxu1 %v7210_v4  ;;  %v7220_v13 = vld [vmem:[#allocation61_spill] sm:$0xff]  ;;  %v7221_v4 = vld [vmem:[#allocation62_spill] sm:$0xff] }
 0x1ba   :  { %4112 = vmatprep.subr.bf16.mxu0 %v7211_v54  ;;  %4176 = vmatprep.subr.bf16.mxu1 %v7212_v29  ;;  %v7222_v54 = vld [vmem:[#allocation63_spill] sm:$0xff]  ;;  %v7223_v29 = vld [vmem:[#allocation13_spill] sm:$0xff] }
 0x1bd   :  { %4114 = vmatpush1.bf16.msra.mxu0 %v7213_v38  ;;  %4178 = vmatpush1.bf16.msra.mxu1 %v7214_v37 }
 0x1be   :  { %4116 = vmatprep.subr.bf16.mxu0 %v7215_v55  ;;  %4180 = vmatprep.subr.bf16.mxu1 %v7216_v9  ;;  %v560_v9 = vld [vmem:[%s6992_s6] sm:$0xf]  ;;  %v7224_v55 = vld [vmem:[#allocation69_spill] sm:$0xff] }
 0x1c1   :  { %4118 = vmatpush1.bf16.msra.mxu0 %v7217_v34  ;;  %4182 = vmatpush1.bf16.msra.mxu1 %v7218_v18  ;;  %v6220_v34 = vrot.slane %v560_v9, %v7224_v55  ;;  %v7227_v55 = vld [vmem:[#allocation12_spill] sm:$0xff] }
 0x1c2   :  { %4120 = vmatprep.subr.bf16.mxu0 %v7219_v61  ;;  %4184 = vmatprep.subr.bf16.mxu1 %v7220_v13  ;;  %v6223_v61 = vrot.slane %v560_v9, %v6091_v0  ;;  %v576_v22 = vsub.s32 3, %v7227_v55  ;;  %v6231_v0 = vrot.slane %v560_v9, %v6068_v44 }
 0x1c3   :  { %7225 = vst [vmem:[#allocation69_spill] sm:$0xff] %v6220_v34 }
 0x1c4   :  { %7226 = vst [vmem:[#allocation74_spill] sm:$0xff] %v6223_v61  ;;  %v6228_v19 = vrot.slane %v560_v9, %v576_v22 }
 0x1c5   :  { %4122 = vmatpush1.bf16.msra.mxu0 %v7221_v4  ;;  %4186 = vmatpush1.bf16.msra.mxu1 %v7222_v54 }
 0x1c6   :  { %4188 = vmatprep.subr.bf16.mxu0 %v7223_v29  ;;  %4219 = vmatprep.subr.bf16.mxu1 %v7166_v31  ;;  %7228 = vst [vmem:[#allocation12_spill] sm:$0xff] %v6228_v19 }
 0x23b   :  { %v810_v18 = vpop.f32.mrb[16].mxu0  ;;  %v881_v37 = vpop.f32.mrb[10].mxu1 }
 0x23c   :  { %v811_v4 = vadd.f32 %v810_v18, %v6220_v34  ;;  %v812_v13 = vpop.f32.mrb[17].mxu0  ;;  %v883_v54 = vpop.f32.mrb[11].mxu1 }
 0x23d   :  { %v813_v29 = vadd.f32 %v812_v13, %v6223_v61  ;;  %v884_v34 = vadd.f32 %v883_v54, %v6228_v19  ;;  %v882_v13 = vadd.f32 %v881_v37, %v6231_v0 }
 0x23e   :  { %v3297_v38 = vmul.f32 -1.442695, %v811_v4 }
 0x23f   :  { %v3298_v45 = vmul.f32 -1.442695, %v813_v29 }
 0x240   :  { %5388 = vpow2.f32 %v3297_v38 }
 0x241   :  { %5390 = vpow2.f32 %v3298_v45 }
 0x24a   :  { %v5389_v63 = vpop.eup %5388 }
 0x24b   :  { %v889_v14 = vadd.f32 1.0, %v5389_v63  ;;  %v5391_v53 = vpop.eup %5390 }
 0x24c   :  { %v895_v18 = vadd.f32 1.0, %v5391_v53 }
 0x24d   :  { %5392 = vrcp.f32 %v889_v14  ;;  %v7229_v14 = vld [vmem:[#allocation72_spill] sm:$0xff] }
 0x24e   :  { %5394 = vrcp.f32 %v895_v18 }
 0x257   :  { %v5393_v4 = vpop.eup %5392 }
 0x258   :  { %v898_v29 = vmul.f32 %v5393_v4, %v884_v34  ;;  %v5395_v53 = vpop.eup %5394 }
 0x259   :  { %v901_v54 = vsub.f32 1.0, %v5395_v53  ;;  %v903_v18 = vmul.f32 0.0, %v5395_v53 }
 0x25a   :  { %v899_v45 = vadd.f32 %v898_v29, %v882_v13 }
 0x25b   :  { %v971_v38 = vpop.f32.mrb[2].mxu0  ;;  %v1042_v63 = vpop.f32.mrb[12].mxu1 }
 0x25c   :  { %5396 = vtanh.f32 %v899_v45  ;;  %v5320_v55 = vadd.f32 %v7229_v14, %v971_v38  ;;  %v973_v61 = vpop.f32.mrb[3].mxu0  ;;  %v3573_v22 = vpop.f32.mrb[13].mxu1 }
 0x25d   :  { %v5322_v44 = vadd.f32 %v7230_v2, %v973_v61 }
 0x25e   :  { %v3299_v8 = vmul.f32 -1.442695, %v5320_v55  ;;  %v7231_v55 = vld [vmem:[#allocation64_spill] sm:$0xff] }
 0x25f   :  { %v3300_v9 = vmul.f32 -1.442695, %v5322_v44 }
 0x260   :  { %5398 = vpow2.f32 %v3299_v8  ;;  %v1043_v8 = vadd.f32 %v1042_v63, %v6108_v3  ;;  %v7233_v63 = vld [vmem:[#allocation17_spill] sm:$0xff] }
 0x261   :  { %5400 = vpow2.f32 %v3300_v9 }
 0x266   :  { %v5397_v19 = vpop.eup %5396 }
 0x267   :  { %v902_v37 = vmul.f32 %v5397_v19, %v901_v54 }
 0x269   :  { %v6237_v34 = vadd.f32 %v903_v18, %v902_v37  ;;  %v7234_v18 = vld [vmem:[#allocation18_spill] sm:$0xff] }
 0x26a   :  { %v5399_v4 = vpop.eup %5398 }
 0x26b   :  { %v1050_v13 = vadd.f32 1.0, %v5399_v4  ;;  %1131 = vmatprep.mubr.f32.mxu0 %v6237_v34  ;;  %1202 = vmatprep.mubr.f32.mxu1 %v6237_v34  ;;  %v5401_v29 = vpop.eup %5400  ;;  %v7235_v4 = vld [vmem:[#allocation19_spill] sm:$0xff] }
 0x26c   :  { %v1057_v45 = vadd.f32 1.0, %v5401_v29  ;;  %v7237_v29 = vld [vmem:[#allocation21_spill] sm:$0xff] }
 0x26d   :  { %5402 = vrcp.f32 %v1050_v13  ;;  %v7236_v13 = vld [vmem:[#allocation20_spill] sm:$0xff] }
 0x26e   :  { %5404 = vrcp.f32 %v1057_v45  ;;  %v7238_v45 = vld [vmem:[#allocation22_spill] sm:$0xff] }
 0x277   :  { %v5403_v61 = vpop.eup %5402 }
 0x278   :  { %v1060_v38 = vmul.f32 %v5403_v61, %v1043_v8  ;;  %v5405_v19 = vpop.eup %5404  ;;  %v7239_v8 = vld [vmem:[#allocation23_spill] sm:$0xff]  ;;  %v7240_v61 = vld [vmem:[#allocation24_spill] sm:$0xff] }
 0x279   :  { %v1063_v44 = vsub.f32 1.0, %v5405_v19  ;;  %v1065_v54 = vmul.f32 %v5405_v19, %v6111_v41  ;;  %v7232_v41 = vld [vmem:[#allocation16_spill] sm:$0xff] }
 0x27a   :  { %v1061_v22 = vadd.f32 %v1060_v38, %v7231_v55  ;;  %v7241_v38 = vld [vmem:[#allocation25_spill] sm:$0xff]  ;;  %v7242_v55 = vld [vmem:[#allocation26_spill] sm:$0xff]  ;;  %v7244_v19 = vld [vmem:[#allocation28_spill] sm:$0xff] }
 0x27c   :  { %5406 = vtanh.f32 %v1061_v22  ;;  %v7243_v22 = vld [vmem:[#allocation27_spill] sm:$0xff] }
 0x286   :  { %v5407_v53 = vpop.eup %5406 }
 0x287   :  { %v1064_v9 = vmul.f32 %v5407_v53, %v1063_v44  ;;  %v7245_v44 = vld [vmem:[#allocation29_spill] sm:$0xff]  ;;  %v7246_v53 = vld [vmem:[#allocation30_spill] sm:$0xff] }
 0x289   :  { %v6244_v37 = vadd.f32 %v1065_v54, %v1064_v9  ;;  %v7247_v9 = vld [vmem:[#allocation31_spill] sm:$0xff]  ;;  %v7248_v54 = vld [vmem:[#allocation32_spill] sm:$0xff] }
 0x28b   :  { %1132 = vmatmul.mubr.f32.vlgmr.msra.gmra.mrb[18].mxu0 %v6244_v37  ;;  %1203 = vmatmul.mubr.f32.vlgmr.msra.gmra.mrb[14].mxu1 %v6244_v37 }
 0x28c   :  { %4190 = vmatpush1.bf16.msra.mxu0 %v5745_v20  ;;  %4221 = vmatpush3.bf16.msra.mxu1 %v5778_v43 }
 0x28d   :  { %4192 = vmatprep.subr.bf16.mxu0 %v5747_v21  ;;  %4222 = vmatprep.subr.bf16.mxu1 %v7166_v31 }
 0x28e   :  { %1292 = vmatprep.mubr.f32.mxu0 %v7177_v26  ;;  %3606 = vmatprep.mubr.msk.f32.mxu1 %vm5644_vm2, %v7177_v26 }
 0x290   :  { %4194 = vmatpush1.bf16.msra.mxu0 %v5756_v27  ;;  %4224 = vmatpush3.bf16.msra.mxu1 %v5783_v47 }
 0x291   :  { %4196 = vmatprep.subr.bf16.mxu0 %v5759_v28  ;;  %4225 = vmatprep.subr.bf16.mxu1 %v7166_v31 }
 0x294   :  { %4198 = vmatpush1.bf16.msra.mxu0 %v5770_v35  ;;  %4227 = vmatpush3.bf16.msra.mxu1 %v5799_v57 }
 0x295   :  { %4200 = vmatprep.subr.bf16.mxu0 %v5776_v39  ;;  %4228 = vmatprep.subr.bf16.mxu1 %v7166_v31 }
 0x298   :  { %4202 = vmatpush1.bf16.msra.mxu0 %v5787_v48  ;;  %4230 = vmatpush3.bf16.msra.mxu1 %v5815_v5 }
 0x299   :  { %4204 = vmatprep.subr.bf16.mxu0 %v5793_v52  ;;  %4231 = vmatprep.subr.bf16.mxu1 %v7166_v31 }
 0x29c   :  { %4206 = vmatpush1.bf16.msra.mxu0 %v5803_v58  ;;  %4233 = vmatpush3.bf16.msra.mxu1 %v5831_v15 }
 0x29d   :  { %4208 = vmatprep.subr.bf16.mxu0 %v5809_v62  ;;  %4234 = vmatprep.subr.bf16.mxu1 %v7166_v31 }
 0x2a0   :  { %4210 = vmatpush1.bf16.msra.mxu0 %v5819_v6  ;;  %4236 = vmatpush3.bf16.msra.mxu1 %v5847_v30 }
 0x2a1   :  { %4212 = vmatprep.subr.bf16.mxu0 %v5825_v10  ;;  %4237 = vmatprep.subr.bf16.mxu1 %v7166_v31 }
 0x2a4   :  { %4214 = vmatpush1.bf16.msra.mxu0 %v5835_v16  ;;  %4239 = vmatpush3.bf16.msra.mxu1 %v5861_v42 }
 0x2a5   :  { %4216 = vmatprep.subr.bf16.mxu0 %v5841_v23  ;;  %4240 = vmatprep.subr.bf16.mxu1 %v7166_v31 }
 0x2a8   :  { %4218 = vmatpush1.bf16.msra.mxu0 %v5851_v32  ;;  %4242 = vmatpush3.bf16.msra.mxu1 %v5873_v59 }
 0x2a9   :  { %4244 = vmatprep.subr.bf16.mxu0 %v5855_v36  ;;  %4308 = vmatprep.subr.bf16.mxu1 %v5876_v60 }
 0x2ab   :  { %1293 = vmatmul.mubr.f32.vlgmr.msra.gmra.mrb[4].mxu0 %v6244_v37  ;;  %3607 = vmatmul.mubr.f32.vlgmr.msra.gmra.mrb[16].mxu1 %v6244_v37 }
 0x2ac   :  { %4246 = vmatpush1.bf16.msra.mxu0 %v5865_v49  ;;  %4310 = vmatpush1.bf16.msra.mxu1 %v5886_v11 }
 0x2ad   :  { %4248 = vmatprep.subr.bf16.mxu0 %v5869_v51  ;;  %4312 = vmatprep.subr.bf16.mxu1 %v5889_v12 }
 0x2b0   :  { %4250 = vmatpush1.bf16.msra.mxu0 %v5879_v1  ;;  %4314 = vmatpush1.bf16.msra.mxu1 %v5897_v24 }
 0x2b1   :  { %4252 = vmatprep.subr.bf16.mxu0 %v5882_v7  ;;  %4316 = vmatprep.subr.bf16.mxu1 %v5901_v25 }
 0x2b4   :  { %4254 = vmatpush1.bf16.msra.mxu0 %v5892_v17  ;;  %4318 = vmatpush1.bf16.msra.mxu1 %v5905_v33 }
 0x2b5   :  { %4256 = vmatprep.subr.bf16.mxu0 %v5909_v40  ;;  %4320 = vmatprep.subr.bf16.mxu1 %v5911_v46 }
 0x2b8   :  { %4258 = vmatpush1.bf16.msra.mxu0 %v5913_v50  ;;  %4322 = vmatpush1.bf16.msra.mxu1 %v5916_v56 }
 0x2b9   :  { %4260 = vmatprep.subr.bf16.mxu0 %v7232_v41  ;;  %4324 = vmatprep.subr.bf16.mxu1 %v7233_v63 }
 0x2bc   :  { %4262 = vmatpush1.bf16.msra.mxu0 %v7234_v18  ;;  %4326 = vmatpush1.bf16.msra.mxu1 %v7235_v4 }
 0x2bd   :  { %4264 = vmatprep.subr.bf16.mxu0 %v7236_v13  ;;  %4328 = vmatprep.subr.bf16.mxu1 %v7237_v29 }
 0x2c0   :  { %4266 = vmatpush1.bf16.msra.mxu0 %v7238_v45  ;;  %4330 = vmatpush1.bf16.msra.mxu1 %v7239_v8  ;;  %v7249_v45 = vld [vmem:[#allocation33_spill] sm:$0xff]  ;;  %v7250_v8 = vld [vmem:[#allocation34_spill] sm:$0xff] }
 0x2c1   :  { %4268 = vmatprep.subr.bf16.mxu0 %v7240_v61  ;;  %4332 = vmatprep.subr.bf16.mxu1 %v7241_v38  ;;  %v7251_v61 = vld [vmem:[#allocation35_spill] sm:$0xff]  ;;  %v7252_v38 = vld [vmem:[#allocation36_spill] sm:$0xff] }
 0x2c4   :  { %4270 = vmatpush1.bf16.msra.mxu0 %v7242_v55  ;;  %4334 = vmatpush1.bf16.msra.mxu1 %v7243_v22  ;;  %v7253_v55 = vld [vmem:[#allocation37_spill] sm:$0xff]  ;;  %v7254_v22 = vld [vmem:[#allocation38_spill] sm:$0xff] }
 0x2c5   :  { %4272 = vmatprep.subr.bf16.mxu0 %v7244_v19  ;;  %4336 = vmatprep.subr.bf16.mxu1 %v7245_v44  ;;  %v7255_v19 = vld [vmem:[#allocation39_spill] sm:$0xff]  ;;  %v7256_v44 = vld [vmem:[#allocation40_spill] sm:$0xff] }
 0x2c8   :  { %4274 = vmatpush1.bf16.msra.mxu0 %v7246_v53  ;;  %4338 = vmatpush1.bf16.msra.mxu1 %v7247_v9  ;;  %v7257_v53 = vld [vmem:[#allocation41_spill] sm:$0xff]  ;;  %v7258_v9 = vld [vmem:[#allocation42_spill] sm:$0xff] }
 0x2c9   :  { %4276 = vmatprep.subr.bf16.mxu0 %v7248_v54  ;;  %4340 = vmatprep.subr.bf16.mxu1 %v7249_v45  ;;  %v7259_v54 = vld [vmem:[#allocation43_spill] sm:$0xff]  ;;  %v7260_v45 = vld [vmem:[#allocation44_spill] sm:$0xff] }
 0x2cc   :  { %4278 = vmatpush1.bf16.msra.mxu0 %v7250_v8  ;;  %4342 = vmatpush1.bf16.msra.mxu1 %v7251_v61  ;;  %v7261_v8 = vld [vmem:[#allocation45_spill] sm:$0xff]  ;;  %v7262_v61 = vld [vmem:[#allocation46_spill] sm:$0xff] }
 0x2cd   :  { %4280 = vmatprep.subr.bf16.mxu0 %v7252_v38  ;;  %4344 = vmatprep.subr.bf16.mxu1 %v7253_v55  ;;  %v7263_v38 = vld [vmem:[#allocation47_spill] sm:$0xff]  ;;  %v7264_v55 = vld [vmem:[#allocation48_spill] sm:$0xff] }
 0x2d0   :  { %4282 = vmatpush1.bf16.msra.mxu0 %v7254_v22  ;;  %4346 = vmatpush1.bf16.msra.mxu1 %v7255_v19  ;;  %v7265_v22 = vld [vmem:[#allocation49_spill] sm:$0xff]  ;;  %v7266_v19 = vld [vmem:[#allocation50_spill] sm:$0xff] }
 0x2d1   :  { %4284 = vmatprep.subr.bf16.mxu0 %v7256_v44  ;;  %4348 = vmatprep.subr.bf16.mxu1 %v7257_v53  ;;  %v7267_v44 = vld [vmem:[#allocation51_spill] sm:$0xff]  ;;  %v7268_v53 = vld [vmem:[#allocation52_spill] sm:$0xff] }
 0x2d4   :  { %4286 = vmatpush1.bf16.msra.mxu0 %v7258_v9  ;;  %4350 = vmatpush1.bf16.msra.mxu1 %v7259_v54  ;;  %v7269_v9 = vld [vmem:[#allocation53_spill] sm:$0xff]  ;;  %v7270_v54 = vld [vmem:[#allocation54_spill] sm:$0xff] }
 0x2d5   :  { %4288 = vmatprep.subr.bf16.mxu0 %v7260_v45  ;;  %4352 = vmatprep.subr.bf16.mxu1 %v7261_v8  ;;  %v7271_v45 = vld [vmem:[#allocation55_spill] sm:$0xff]  ;;  %v7272_v8 = vld [vmem:[#allocation56_spill] sm:$0xff] }
 0x2d8   :  { %4290 = vmatpush1.bf16.msra.mxu0 %v7262_v61  ;;  %4354 = vmatpush1.bf16.msra.mxu1 %v7263_v38  ;;  %v7273_v61 = vld [vmem:[#allocation57_spill] sm:$0xff]  ;;  %v7274_v38 = vld [vmem:[#allocation58_spill] sm:$0xff] }
 0x2d9   :  { %4292 = vmatprep.subr.bf16.mxu0 %v7264_v55  ;;  %4356 = vmatprep.subr.bf16.mxu1 %v7265_v22  ;;  %v7275_v55 = vld [vmem:[#allocation59_spill] sm:$0xff]  ;;  %v7276_v22 = vld [vmem:[#allocation60_spill] sm:$0xff] }
 0x2dc   :  { %4294 = vmatpush1.bf16.msra.mxu0 %v7266_v19  ;;  %4358 = vmatpush1.bf16.msra.mxu1 %v7267_v44  ;;  %v7277_v19 = vld [vmem:[#allocation61_spill] sm:$0xff]  ;;  %v7278_v44 = vld [vmem:[#allocation62_spill] sm:$0xff] }
 0x2dd   :  { %4296 = vmatprep.subr.bf16.mxu0 %v7268_v53  ;;  %4360 = vmatprep.subr.bf16.mxu1 %v7269_v9  ;;  %v7279_v53 = vld [vmem:[#allocation63_spill] sm:$0xff]  ;;  %v7280_v9 = vld [vmem:[#allocation13_spill] sm:$0xff] }
 0x2e0   :  { %4298 = vmatpush1.bf16.msra.mxu0 %v7270_v54  ;;  %4362 = vmatpush1.bf16.msra.mxu1 %v7271_v45  ;;  %v7281_v54 = vld [vmem:[#allocation69_spill] sm:$0xff] }
 0x2e1   :  { %4300 = vmatprep.subr.bf16.mxu0 %v7272_v8  ;;  %4364 = vmatprep.subr.bf16.mxu1 %v7273_v61 }
 0x2e4   :  { %4302 = vmatpush1.bf16.msra.mxu0 %v7274_v38  ;;  %4366 = vmatpush1.bf16.msra.mxu1 %v7275_v55  ;;  %v7282_v55 = vld [vmem:[#allocation74_spill] sm:$0xff] }
 0x2e5   :  { %4304 = vmatprep.subr.bf16.mxu0 %v7276_v22  ;;  %4368 = vmatprep.subr.bf16.mxu1 %v7277_v19 }
 0x2e8   :  { %4306 = vmatpush1.bf16.msra.mxu0 %v7278_v44  ;;  %4370 = vmatpush1.bf16.msra.mxu1 %v7279_v53 }
 0x2e9   :  { %4372 = vmatprep.subr.bf16.mxu0 %v7280_v9  ;;  %4403 = vmatprep.subr.bf16.mxu1 %v7166_v31  ;;  %v7283_v9 = vld [vmem:[#allocation12_spill] sm:$0xff] }
 0x35e   :  { %v1133_v45 = vpop.f32.mrb[18].mxu0  ;;  %v1204_v8 = vpop.f32.mrb[14].mxu1 }
 0x35f   :  { %v1134_v61 = vadd.f32 %v1133_v45, %v7281_v54  ;;  %v1135_v29 = vpop.f32.mrb[19].mxu0  ;;  %v1206_v38 = vpop.f32.mrb[15].mxu1  ;;  %v1205_v56 = vadd.f32 %v1204_v8, %v6231_v0 }
 0x360   :  { %v1136_v4 = vadd.f32 %v1135_v29, %v7282_v55  ;;  %v1207_v63 = vadd.f32 %v1206_v38, %v7283_v9 }
 0x361   :  { %v3301_v13 = vmul.f32 -1.442695, %v1134_v61 }
 0x362   :  { %v3302_v22 = vmul.f32 -1.442695, %v1136_v4 }
 0x363   :  { %5408 = vpow2.f32 %v3301_v13 }
 0x364   :  { %5410 = vpow2.f32 %v3302_v22 }
 0x36d   :  { %v5409_v19 = vpop.eup %5408 }
 0x36e   :  { %v1212_v44 = vadd.f32 1.0, %v5409_v19  ;;  %v5411_v53 = vpop.eup %5410 }
 0x36f   :  { %v1218_v18 = vadd.f32 1.0, %v5411_v53 }
 0x370   :  { %5412 = vrcp.f32 %v1212_v44 }
 0x371   :  { %5414 = vrcp.f32 %v1218_v18 }
 0x37a   :  { %v5413_v41 = vpop.eup %5412 }
 0x37b   :  { %v1221_v45 = vmul.f32 %v5413_v41, %v1207_v63  ;;  %v5415_v44 = vpop.eup %5414 }
 0x37c   :  { %v1224_v38 = vsub.f32 1.0, %v5415_v44  ;;  %v1226_v41 = vmul.f32 %v5415_v44, %v6237_v34 }
 0x37d   :  { %v1222_v54 = vadd.f32 %v1221_v45, %v1205_v56 }
 0x37e   :  { %v1294_v50 = vpop.f32.mrb[4].mxu0  ;;  %v1365_v61 = vpop.f32.mrb[16].mxu1 }
 0x37f   :  { %5416 = vtanh.f32 %v1222_v54  ;;  %v5324_v13 = vadd.f32 %v7229_v14, %v1294_v50  ;;  %v1296_v4 = vpop.f32.mrb[5].mxu0  ;;  %v3608_v29 = vpop.f32.mrb[17].mxu1  ;;  %v1366_v45 = vadd.f32 %v1365_v61, %v6108_v3  ;;  %v7286_v61 = vld [vmem:[#allocation15_spill] sm:$0xff] }
 0x380   :  { %v5326_v19 = vadd.f32 %v7230_v2, %v1296_v4  ;;  %v7284_v29 = vld [vmem:[#allocation66_spill] sm:$0xff] }
 0x381   :  { %v3303_v22 = vmul.f32 -1.442695, %v5324_v13 }
 0x382   :  { %v3304_v53 = vmul.f32 -1.442695, %v5326_v19 }
 0x383   :  { %5418 = vpow2.f32 %v3303_v22 }
 0x384   :  { %5420 = vpow2.f32 %v3304_v53 }
 0x389   :  { %v5417_v9 = vpop.eup %5416 }
 0x38a   :  { %v1225_v8 = vmul.f32 %v5417_v9, %v1224_v38 }
 0x38c   :  { %v6356_v56 = vadd.f32 %v1226_v41, %v1225_v8  ;;  %v7287_v8 = vld [vmem:[#allocation16_spill] sm:$0xff]  ;;  %v7288_v41 = vld [vmem:[#allocation17_spill] sm:$0xff] }
 0x38d   :  { %v5419_v63 = vpop.eup %5418 }
 0x38e   :  { %v1373_v18 = vadd.f32 1.0, %v5419_v63  ;;  %1454 = vmatprep.mubr.f32.mxu0 %v6356_v56  ;;  %1525 = vmatprep.mubr.f32.mxu1 %v6356_v56  ;;  %v5421_v50 = vpop.eup %5420  ;;  %v7289_v63 = vld [vmem:[#allocation18_spill] sm:$0xff] }
 0x38f   :  { %v1380_v54 = vadd.f32 1.0, %v5421_v50  ;;  %v7291_v50 = vld [vmem:[#allocation20_spill] sm:$0xff] }
 0x390   :  { %5422 = vrcp.f32 %v1373_v18  ;;  %v7290_v18 = vld [vmem:[#allocation19_spill] sm:$0xff] }
 0x391   :  { %5424 = vrcp.f32 %v1380_v54  ;;  %v7292_v54 = vld [vmem:[#allocation21_spill] sm:$0xff] }
 0x39a   :  { %v5423_v13 = vpop.eup %5422 }
 0x39b   :  { %v1383_v4 = vmul.f32 %v5423_v13, %v1366_v45  ;;  %v5425_v34 = vpop.eup %5424  ;;  %v7293_v45 = vld [vmem:[#allocation22_spill] sm:$0xff]  ;;  %v7294_v13 = vld [vmem:[#allocation23_spill] sm:$0xff] }
 0x39c   :  { %v1386_v22 = vsub.f32 1.0, %v5425_v34  ;;  %v1388_v53 = vmul.f32 %v5425_v34, %v6244_v37  ;;  %v7285_v37 = vld [vmem:[#allocation14_spill] sm:$0xff]  ;;  %v7298_v34 = vld [vmem:[#allocation27_spill] sm:$0xff] }
 0x39d   :  { %v1384_v9 = vadd.f32 %v1383_v4, %v7284_v29  ;;  %v7295_v4 = vld [vmem:[#allocation24_spill] sm:$0xff]  ;;  %v7296_v29 = vld [vmem:[#allocation25_spill] sm:$0xff] }
 0x39f   :  { %5426 = vtanh.f32 %v1384_v9  ;;  %v7297_v9 = vld [vmem:[#allocation26_spill] sm:$0xff] }
 0x3a9   :  { %v5427_v19 = vpop.eup %5426 }
 0x3aa   :  { %v1387_v44 = vmul.f32 %v5427_v19, %v1386_v22  ;;  %v7299_v22 = vld [vmem:[#allocation28_spill] sm:$0xff]  ;;  %v7300_v19 = vld [vmem:[#allocation29_spill] sm:$0xff] }
 0x3ac   :  { %v6363_v38 = vadd.f32 %v1388_v53, %v1387_v44  ;;  %v7301_v44 = vld [vmem:[#allocation30_spill] sm:$0xff]  ;;  %v7302_v53 = vld [vmem:[#allocation31_spill] sm:$0xff] }
 0x3ae   :  { %1455 = vmatmul.mubr.f32.vlgmr.msra.gmra.mrb[20].mxu0 %v6363_v38  ;;  %1526 = vmatmul.mubr.f32.vlgmr.msra.gmra.mrb[18].mxu1 %v6363_v38 }
 0x3af   :  { %4374 = vmatpush1.bf16.msra.mxu0 %v5745_v20  ;;  %4405 = vmatpush3.bf16.msra.mxu1 %v5778_v43 }
 0x3b0   :  { %4376 = vmatprep.subr.bf16.mxu0 %v5747_v21  ;;  %4406 = vmatprep.subr.bf16.mxu1 %v7166_v31 }
 0x3b1   :  { %1615 = vmatprep.mubr.f32.mxu0 %v7177_v26  ;;  %3641 = vmatprep.mubr.msk.f32.mxu1 %vm5644_vm2, %v7177_v26 }
 0x3b3   :  { %4378 = vmatpush1.bf16.msra.mxu0 %v5756_v27  ;;  %4408 = vmatpush3.bf16.msra.mxu1 %v5783_v47 }
 0x3b4   :  { %4380 = vmatprep.subr.bf16.mxu0 %v5759_v28  ;;  %4409 = vmatprep.subr.bf16.mxu1 %v7166_v31 }
 0x3b7   :  { %4382 = vmatpush1.bf16.msra.mxu0 %v5770_v35  ;;  %4411 = vmatpush3.bf16.msra.mxu1 %v5799_v57 }
 0x3b8   :  { %4384 = vmatprep.subr.bf16.mxu0 %v5776_v39  ;;  %4412 = vmatprep.subr.bf16.mxu1 %v7166_v31 }
 0x3bb   :  { %4386 = vmatpush1.bf16.msra.mxu0 %v5787_v48  ;;  %4414 = vmatpush3.bf16.msra.mxu1 %v5815_v5 }
 0x3bc   :  { %4388 = vmatprep.subr.bf16.mxu0 %v5793_v52  ;;  %4415 = vmatprep.subr.bf16.mxu1 %v7166_v31 }
 0x3bf   :  { %4390 = vmatpush1.bf16.msra.mxu0 %v5803_v58  ;;  %4417 = vmatpush3.bf16.msra.mxu1 %v5831_v15 }
 0x3c0   :  { %4392 = vmatprep.subr.bf16.mxu0 %v5809_v62  ;;  %4418 = vmatprep.subr.bf16.mxu1 %v7166_v31 }
 0x3c3   :  { %4394 = vmatpush1.bf16.msra.mxu0 %v5819_v6  ;;  %4420 = vmatpush3.bf16.msra.mxu1 %v5847_v30 }
 0x3c4   :  { %4396 = vmatprep.subr.bf16.mxu0 %v5825_v10  ;;  %4421 = vmatprep.subr.bf16.mxu1 %v7166_v31 }
 0x3c7   :  { %4398 = vmatpush1.bf16.msra.mxu0 %v5835_v16  ;;  %4423 = vmatpush3.bf16.msra.mxu1 %v5861_v42 }
 0x3c8   :  { %4400 = vmatprep.subr.bf16.mxu0 %v5841_v23  ;;  %4424 = vmatprep.subr.bf16.mxu1 %v7166_v31 }
 0x3cb   :  { %4402 = vmatpush1.bf16.msra.mxu0 %v5851_v32  ;;  %4426 = vmatpush3.bf16.msra.mxu1 %v5873_v59 }
 0x3cc   :  { %4428 = vmatprep.subr.bf16.mxu0 %v5855_v36  ;;  %4492 = vmatprep.subr.bf16.mxu1 %v5876_v60 }
 0x3ce   :  { %1616 = vmatmul.mubr.f32.vlgmr.msra.gmra.mrb[6].mxu0 %v6363_v38  ;;  %3642 = vmatmul.mubr.f32.vlgmr.msra.gmra.mrb[20].mxu1 %v6363_v38 }
 0x3cf   :  { %4430 = vmatpush1.bf16.msra.mxu0 %v5865_v49  ;;  %4494 = vmatpush1.bf16.msra.mxu1 %v5886_v11 }
 0x3d0   :  { %4432 = vmatprep.subr.bf16.mxu0 %v5869_v51  ;;  %4496 = vmatprep.subr.bf16.mxu1 %v5889_v12 }
 0x3d3   :  { %4434 = vmatpush1.bf16.msra.mxu0 %v5879_v1  ;;  %4498 = vmatpush1.bf16.msra.mxu1 %v5897_v24 }
 0x3d4   :  { %4436 = vmatprep.subr.bf16.mxu0 %v5882_v7  ;;  %4500 = vmatprep.subr.bf16.mxu1 %v5901_v25 }
 0x3d7   :  { %4438 = vmatpush1.bf16.msra.mxu0 %v5892_v17  ;;  %4502 = vmatpush1.bf16.msra.mxu1 %v5905_v33 }
 0x3d8   :  { %4440 = vmatprep.subr.bf16.mxu0 %v5909_v40  ;;  %4504 = vmatprep.subr.bf16.mxu1 %v5911_v46 }
 0x3db   :  { %4442 = vmatpush1.bf16.msra.mxu0 %v7285_v37  ;;  %4506 = vmatpush1.bf16.msra.mxu1 %v7286_v61 }
 0x3dc   :  { %4444 = vmatprep.subr.bf16.mxu0 %v7287_v8  ;;  %4508 = vmatprep.subr.bf16.mxu1 %v7288_v41 }
 0x3df   :  { %4446 = vmatpush1.bf16.msra.mxu0 %v7289_v63  ;;  %4510 = vmatpush1.bf16.msra.mxu1 %v7290_v18 }
 0x3e0   :  { %4448 = vmatprep.subr.bf16.mxu0 %v7291_v50  ;;  %4512 = vmatprep.subr.bf16.mxu1 %v7292_v54  ;;  %v7303_v54 = vld [vmem:[#allocation32_spill] sm:$0xff] }
 0x3e3   :  { %4450 = vmatpush1.bf16.msra.mxu0 %v7293_v45  ;;  %4514 = vmatpush1.bf16.msra.mxu1 %v7294_v13  ;;  %v7304_v45 = vld [vmem:[#allocation33_spill] sm:$0xff]  ;;  %v7305_v13 = vld [vmem:[#allocation34_spill] sm:$0xff] }
 0x3e4   :  { %4452 = vmatprep.subr.bf16.mxu0 %v7295_v4  ;;  %4516 = vmatprep.subr.bf16.mxu1 %v7296_v29  ;;  %v7306_v4 = vld [vmem:[#allocation35_spill] sm:$0xff]  ;;  %v7307_v29 = vld [vmem:[#allocation36_spill] sm:$0xff] }
 0x3e7   :  { %4454 = vmatpush1.bf16.msra.mxu0 %v7297_v9  ;;  %4518 = vmatpush1.bf16.msra.mxu1 %v7298_v34  ;;  %v7308_v9 = vld [vmem:[#allocation37_spill] sm:$0xff]  ;;  %v7309_v34 = vld [vmem:[#allocation38_spill] sm:$0xff] }
 0x3e8   :  { %4456 = vmatprep.subr.bf16.mxu0 %v7299_v22  ;;  %4520 = vmatprep.subr.bf16.mxu1 %v7300_v19  ;;  %v7310_v22 = vld [vmem:[#allocation39_spill] sm:$0xff]  ;;  %v7311_v19 = vld [vmem:[#allocation40_spill] sm:$0xff] }
 0x3eb   :  { %4458 = vmatpush1.bf16.msra.mxu0 %v7301_v44  ;;  %4522 = vmatpush1.bf16.msra.mxu1 %v7302_v53  ;;  %v7312_v44 = vld [vmem:[#allocation41_spill] sm:$0xff]  ;;  %v7313_v53 = vld [vmem:[#allocation42_spill] sm:$0xff] }
 0x3ec   :  { %4460 = vmatprep.subr.bf16.mxu0 %v7303_v54  ;;  %4524 = vmatprep.subr.bf16.mxu1 %v7304_v45  ;;  %v7314_v54 = vld [vmem:[#allocation43_spill] sm:$0xff]  ;;  %v7315_v45 = vld [vmem:[#allocation44_spill] sm:$0xff] }
 0x3ef   :  { %4462 = vmatpush1.bf16.msra.mxu0 %v7305_v13  ;;  %4526 = vmatpush1.bf16.msra.mxu1 %v7306_v4  ;;  %v7316_v13 = vld [vmem:[#allocation45_spill] sm:$0xff]  ;;  %v7317_v4 = vld [vmem:[#allocation46_spill] sm:$0xff] }
 0x3f0   :  { %4464 = vmatprep.subr.bf16.mxu0 %v7307_v29  ;;  %4528 = vmatprep.subr.bf16.mxu1 %v7308_v9  ;;  %v7318_v29 = vld [vmem:[#allocation47_spill] sm:$0xff]  ;;  %v7319_v9 = vld [vmem:[#allocation48_spill] sm:$0xff] }
 0x3f3   :  { %4466 = vmatpush1.bf16.msra.mxu0 %v7309_v34  ;;  %4530 = vmatpush1.bf16.msra.mxu1 %v7310_v22  ;;  %v7320_v34 = vld [vmem:[#allocation49_spill] sm:$0xff]  ;;  %v7321_v22 = vld [vmem:[#allocation50_spill] sm:$0xff] }
 0x3f4   :  { %4468 = vmatprep.subr.bf16.mxu0 %v7311_v19  ;;  %4532 = vmatprep.subr.bf16.mxu1 %v7312_v44  ;;  %v7322_v19 = vld [vmem:[#allocation51_spill] sm:$0xff]  ;;  %v7323_v44 = vld [vmem:[#allocation52_spill] sm:$0xff] }
 0x3f7   :  { %4470 = vmatpush1.bf16.msra.mxu0 %v7313_v53  ;;  %4534 = vmatpush1.bf16.msra.mxu1 %v7314_v54  ;;  %v7324_v53 = vld [vmem:[#allocation53_spill] sm:$0xff]  ;;  %v7325_v54 = vld [vmem:[#allocation54_spill] sm:$0xff] }
 0x3f8   :  { %4472 = vmatprep.subr.bf16.mxu0 %v7315_v45  ;;  %4536 = vmatprep.subr.bf16.mxu1 %v7316_v13  ;;  %v7326_v45 = vld [vmem:[#allocation55_spill] sm:$0xff]  ;;  %v7327_v13 = vld [vmem:[#allocation56_spill] sm:$0xff] }
 0x3fb   :  { %4474 = vmatpush1.bf16.msra.mxu0 %v7317_v4  ;;  %4538 = vmatpush1.bf16.msra.mxu1 %v7318_v29  ;;  %v7328_v4 = vld [vmem:[#allocation57_spill] sm:$0xff]  ;;  %v7329_v29 = vld [vmem:[#allocation58_spill] sm:$0xff] }
 0x3fc   :  { %4476 = vmatprep.subr.bf16.mxu0 %v7319_v9  ;;  %4540 = vmatprep.subr.bf16.mxu1 %v7320_v34  ;;  %v7330_v9 = vld [vmem:[#allocation59_spill] sm:$0xff]  ;;  %v7331_v34 = vld [vmem:[#allocation60_spill] sm:$0xff] }
 0x3ff   :  { %4478 = vmatpush1.bf16.msra.mxu0 %v7321_v22  ;;  %4542 = vmatpush1.bf16.msra.mxu1 %v7322_v19  ;;  %v7332_v22 = vld [vmem:[#allocation61_spill] sm:$0xff]  ;;  %v7333_v19 = vld [vmem:[#allocation62_spill] sm:$0xff] }
 0x400   :  { %4480 = vmatprep.subr.bf16.mxu0 %v7323_v44  ;;  %4544 = vmatprep.subr.bf16.mxu1 %v7324_v53  ;;  %v7334_v44 = vld [vmem:[#allocation63_spill] sm:$0xff]  ;;  %v7335_v53 = vld [vmem:[#allocation13_spill] sm:$0xff] }
 0x403   :  { %4482 = vmatpush1.bf16.msra.mxu0 %v7325_v54  ;;  %4546 = vmatpush1.bf16.msra.mxu1 %v7326_v45  ;;  %v7336_v54 = vld [vmem:[#allocation69_spill] sm:$0xff] }
 0x404   :  { %4484 = vmatprep.subr.bf16.mxu0 %v7327_v13  ;;  %4548 = vmatprep.subr.bf16.mxu1 %v7328_v4 }
 0x407   :  { %4486 = vmatpush1.bf16.msra.mxu0 %v7329_v29  ;;  %4550 = vmatpush1.bf16.msra.mxu1 %v7330_v9 }
 0x408   :  { %4488 = vmatprep.subr.bf16.mxu0 %v7331_v34  ;;  %4552 = vmatprep.subr.bf16.mxu1 %v7332_v22 }
 0x40b   :  { %4490 = vmatpush1.bf16.msra.mxu0 %v7333_v19  ;;  %4554 = vmatpush1.bf16.msra.mxu1 %v7334_v44 }
 0x40c   :  { %4556 = vmatprep.subr.bf16.mxu0 %v7335_v53  ;;  %4587 = vmatprep.subr.bf16.mxu1 %v7166_v31  ;;  %v7337_v53 = vld [vmem:[#allocation12_spill] sm:$0xff] }
 0x481   :  { %v1456_v45 = vpop.f32.mrb[20].mxu0  ;;  %v1527_v13 = vpop.f32.mrb[18].mxu1 }
 0x482   :  { %v1457_v4 = vadd.f32 %v1456_v45, %v7336_v54  ;;  %v1458_v50 = vpop.f32.mrb[21].mxu0  ;;  %v1529_v29 = vpop.f32.mrb[19].mxu1  ;;  %v1528_v61 = vadd.f32 %v1527_v13, %v6231_v0 }
 0x483   :  { %v1459_v9 = vadd.f32 %v1458_v50, %v7282_v55  ;;  %v1530_v41 = vadd.f32 %v1529_v29, %v7337_v53 }
 0x484   :  { %v3305_v18 = vmul.f32 -1.442695, %v1457_v4 }
 0x485   :  { %v3306_v34 = vmul.f32 -1.442695, %v1459_v9 }
 0x486   :  { %5428 = vpow2.f32 %v3305_v18 }
 0x487   :  { %5430 = vpow2.f32 %v3306_v34 }
 0x490   :  { %v5429_v22 = vpop.eup %5428 }
 0x491   :  { %v1535_v19 = vadd.f32 1.0, %v5429_v22  ;;  %v5431_v44 = vpop.eup %5430 }
 0x492   :  { %v1541_v63 = vadd.f32 1.0, %v5431_v44 }
 0x493   :  { %5432 = vrcp.f32 %v1535_v19 }
 0x494   :  { %5434 = vrcp.f32 %v1541_v63 }
 0x49d   :  { %v5433_v8 = vpop.eup %5432 }
 0x49e   :  { %v1544_v45 = vmul.f32 %v5433_v8, %v1530_v41  ;;  %v5435_v19 = vpop.eup %5434 }
 0x49f   :  { %v1547_v29 = vsub.f32 1.0, %v5435_v19  ;;  %v1549_v8 = vmul.f32 %v5435_v19, %v6356_v56 }
 0x4a0   :  { %v1545_v54 = vadd.f32 %v1544_v45, %v1528_v61 }
 0x4a1   :  { %v1617_v37 = vpop.f32.mrb[6].mxu0  ;;  %v1688_v4 = vpop.f32.mrb[20].mxu1 }
 0x4a2   :  { %5436 = vtanh.f32 %v1545_v54  ;;  %v5328_v18 = vadd.f32 %v7229_v14, %v1617_v37  ;;  %v1619_v50 = vpop.f32.mrb[7].mxu0  ;;  %v3643_v9 = vpop.f32.mrb[21].mxu1  ;;  %v1689_v45 = vadd.f32 %v1688_v4, %v6108_v3  ;;  %v7340_v4 = vld [vmem:[#allocation15_spill] sm:$0xff] }
 0x4a3   :  { %v5330_v22 = vadd.f32 %v7230_v2, %v1619_v50  ;;  %v7338_v9 = vld [vmem:[#allocation65_spill] sm:$0xff] }
 0x4a4   :  { %v3307_v34 = vmul.f32 -1.442695, %v5328_v18 }
 0x4a5   :  { %v3308_v44 = vmul.f32 -1.442695, %v5330_v22 }
 0x4a6   :  { %5438 = vpow2.f32 %v3307_v34 }
 0x4a7   :  { %5440 = vpow2.f32 %v3308_v44 }
 0x4ac   :  { %v5437_v53 = vpop.eup %5436 }
 0x4ad   :  { %v1548_v13 = vmul.f32 %v5437_v53, %v1547_v29 }
 0x4af   :  { %v6475_v61 = vadd.f32 %v1549_v8, %v1548_v13  ;;  %v7341_v13 = vld [vmem:[#allocation16_spill] sm:$0xff]  ;;  %v7342_v8 = vld [vmem:[#allocation17_spill] sm:$0xff] }
 0x4b0   :  { %v5439_v41 = vpop.eup %5438 }
 0x4b1   :  { %v1696_v63 = vadd.f32 1.0, %v5439_v41  ;;  %1777 = vmatprep.mubr.f32.mxu0 %v6475_v61  ;;  %1848 = vmatprep.mubr.f32.mxu1 %v6475_v61  ;;  %v5441_v37 = vpop.eup %5440  ;;  %v7343_v41 = vld [vmem:[#allocation18_spill] sm:$0xff] }
 0x4b2   :  { %v1703_v54 = vadd.f32 1.0, %v5441_v37  ;;  %v7345_v37 = vld [vmem:[#allocation20_spill] sm:$0xff] }
 0x4b3   :  { %5442 = vrcp.f32 %v1696_v63  ;;  %v7344_v63 = vld [vmem:[#allocation19_spill] sm:$0xff] }
 0x4b4   :  { %5444 = vrcp.f32 %v1703_v54  ;;  %v7346_v54 = vld [vmem:[#allocation21_spill] sm:$0xff] }
 0x4bd   :  { %v5443_v18 = vpop.eup %5442 }
 0x4be   :  { %v1706_v50 = vmul.f32 %v5443_v18, %v1689_v45  ;;  %v5445_v56 = vpop.eup %5444  ;;  %v7347_v45 = vld [vmem:[#allocation22_spill] sm:$0xff]  ;;  %v7348_v18 = vld [vmem:[#allocation23_spill] sm:$0xff] }
 0x4bf   :  { %v1709_v34 = vsub.f32 1.0, %v5445_v56  ;;  %v1711_v44 = vmul.f32 %v5445_v56, %v6363_v38  ;;  %v7339_v38 = vld [vmem:[#allocation14_spill] sm:$0xff]  ;;  %v7352_v56 = vld [vmem:[#allocation27_spill] sm:$0xff] }
 0x4c0   :  { %v1707_v53 = vadd.f32 %v1706_v50, %v7338_v9  ;;  %v7349_v50 = vld [vmem:[#allocation24_spill] sm:$0xff]  ;;  %v7350_v9 = vld [vmem:[#allocation25_spill] sm:$0xff] }
 0x4c2   :  { %5446 = vtanh.f32 %v1707_v53  ;;  %v7351_v53 = vld [vmem:[#allocation26_spill] sm:$0xff] }
 0x4cc   :  { %v5447_v22 = vpop.eup %5446 }
 0x4cd   :  { %v1710_v19 = vmul.f32 %v5447_v22, %v1709_v34  ;;  %v7353_v34 = vld [vmem:[#allocation28_spill] sm:$0xff]  ;;  %v7354_v22 = vld [vmem:[#allocation29_spill] sm:$0xff] }
 0x4cf   :  { %v6482_v29 = vadd.f32 %v1711_v44, %v1710_v19  ;;  %v7355_v19 = vld [vmem:[#allocation30_spill] sm:$0xff]  ;;  %v7356_v44 = vld [vmem:[#allocation31_spill] sm:$0xff] }
 0x4d1   :  { %1778 = vmatmul.mubr.f32.vlgmr.msra.gmra.mrb[22].mxu0 %v6482_v29  ;;  %1849 = vmatmul.mubr.f32.vlgmr.msra.gmra.mrb[22].mxu1 %v6482_v29 }
 0x4d2   :  { %4558 = vmatpush1.bf16.msra.mxu0 %v5745_v20  ;;  %4589 = vmatpush3.bf16.msra.mxu1 %v5778_v43 }
 0x4d3   :  { %4560 = vmatprep.subr.bf16.mxu0 %v5747_v21  ;;  %4590 = vmatprep.subr.bf16.mxu1 %v7166_v31 }
 0x4d4   :  { %1938 = vmatprep.mubr.f32.mxu0 %v7177_v26  ;;  %3676 = vmatprep.mubr.msk.f32.mxu1 %vm5644_vm2, %v7177_v26 }
 0x4d6   :  { %4562 = vmatpush1.bf16.msra.mxu0 %v5756_v27  ;;  %4592 = vmatpush3.bf16.msra.mxu1 %v5783_v47 }
 0x4d7   :  { %4564 = vmatprep.subr.bf16.mxu0 %v5759_v28  ;;  %4593 = vmatprep.subr.bf16.mxu1 %v7166_v31 }
 0x4da   :  { %4566 = vmatpush1.bf16.msra.mxu0 %v5770_v35  ;;  %4595 = vmatpush3.bf16.msra.mxu1 %v5799_v57 }
 0x4db   :  { %4568 = vmatprep.subr.bf16.mxu0 %v5776_v39  ;;  %4596 = vmatprep.subr.bf16.mxu1 %v7166_v31 }
 0x4de   :  { %4570 = vmatpush1.bf16.msra.mxu0 %v5787_v48  ;;  %4598 = vmatpush3.bf16.msra.mxu1 %v5815_v5 }
 0x4df   :  { %4572 = vmatprep.subr.bf16.mxu0 %v5793_v52  ;;  %4599 = vmatprep.subr.bf16.mxu1 %v7166_v31 }
 0x4e2   :  { %4574 = vmatpush1.bf16.msra.mxu0 %v5803_v58  ;;  %4601 = vmatpush3.bf16.msra.mxu1 %v5831_v15 }
 0x4e3   :  { %4576 = vmatprep.subr.bf16.mxu0 %v5809_v62  ;;  %4602 = vmatprep.subr.bf16.mxu1 %v7166_v31 }
 0x4e6   :  { %4578 = vmatpush1.bf16.msra.mxu0 %v5819_v6  ;;  %4604 = vmatpush3.bf16.msra.mxu1 %v5847_v30 }
 0x4e7   :  { %4580 = vmatprep.subr.bf16.mxu0 %v5825_v10  ;;  %4605 = vmatprep.subr.bf16.mxu1 %v7166_v31 }
 0x4ea   :  { %4582 = vmatpush1.bf16.msra.mxu0 %v5835_v16  ;;  %4607 = vmatpush3.bf16.msra.mxu1 %v5861_v42 }
 0x4eb   :  { %4584 = vmatprep.subr.bf16.mxu0 %v5841_v23  ;;  %4608 = vmatprep.subr.bf16.mxu1 %v7166_v31 }
 0x4ee   :  { %4586 = vmatpush1.bf16.msra.mxu0 %v5851_v32  ;;  %4610 = vmatpush3.bf16.msra.mxu1 %v5873_v59 }
 0x4ef   :  { %4612 = vmatprep.subr.bf16.mxu0 %v5855_v36  ;;  %4676 = vmatprep.subr.bf16.mxu1 %v5876_v60 }
 0x4f1   :  { %1939 = vmatmul.mubr.f32.vlgmr.msra.gmra.mrb[8].mxu0 %v6482_v29  ;;  %3677 = vmatmul.mubr.f32.vlgmr.msra.gmra.mrb[24].mxu1 %v6482_v29 }
 0x4f2   :  { %4614 = vmatpush1.bf16.msra.mxu0 %v5865_v49  ;;  %4678 = vmatpush1.bf16.msra.mxu1 %v5886_v11 }
 0x4f3   :  { %4616 = vmatprep.subr.bf16.mxu0 %v5869_v51  ;;  %4680 = vmatprep.subr.bf16.mxu1 %v5889_v12 }
 0x4f6   :  { %4618 = vmatpush1.bf16.msra.mxu0 %v5879_v1  ;;  %4682 = vmatpush1.bf16.msra.mxu1 %v5897_v24 }
 0x4f7   :  { %4620 = vmatprep.subr.bf16.mxu0 %v5882_v7  ;;  %4684 = vmatprep.subr.bf16.mxu1 %v5901_v25 }
 0x4fa   :  { %4622 = vmatpush1.bf16.msra.mxu0 %v5892_v17  ;;  %4686 = vmatpush1.bf16.msra.mxu1 %v5905_v33 }
 0x4fb   :  { %4624 = vmatprep.subr.bf16.mxu0 %v5909_v40  ;;  %4688 = vmatprep.subr.bf16.mxu1 %v5911_v46 }
 0x4fe   :  { %4626 = vmatpush1.bf16.msra.mxu0 %v7339_v38  ;;  %4690 = vmatpush1.bf16.msra.mxu1 %v7340_v4 }
 0x4ff   :  { %4628 = vmatprep.subr.bf16.mxu0 %v7341_v13  ;;  %4692 = vmatprep.subr.bf16.mxu1 %v7342_v8 }
 0x502   :  { %4630 = vmatpush1.bf16.msra.mxu0 %v7343_v41  ;;  %4694 = vmatpush1.bf16.msra.mxu1 %v7344_v63 }
 0x503   :  { %4632 = vmatprep.subr.bf16.mxu0 %v7345_v37  ;;  %4696 = vmatprep.subr.bf16.mxu1 %v7346_v54  ;;  %v7357_v54 = vld [vmem:[#allocation32_spill] sm:$0xff] }
 0x506   :  { %4634 = vmatpush1.bf16.msra.mxu0 %v7347_v45  ;;  %4698 = vmatpush1.bf16.msra.mxu1 %v7348_v18  ;;  %v7358_v45 = vld [vmem:[#allocation33_spill] sm:$0xff]  ;;  %v7359_v18 = vld [vmem:[#allocation34_spill] sm:$0xff] }
 0x507   :  { %4636 = vmatprep.subr.bf16.mxu0 %v7349_v50  ;;  %4700 = vmatprep.subr.bf16.mxu1 %v7350_v9  ;;  %v7360_v50 = vld [vmem:[#allocation35_spill] sm:$0xff]  ;;  %v7361_v9 = vld [vmem:[#allocation36_spill] sm:$0xff] }
 0x50a   :  { %4638 = vmatpush1.bf16.msra.mxu0 %v7351_v53  ;;  %4702 = vmatpush1.bf16.msra.mxu1 %v7352_v56  ;;  %v7362_v53 = vld [vmem:[#allocation37_spill] sm:$0xff]  ;;  %v7363_v56 = vld [vmem:[#allocation38_spill] sm:$0xff] }
 0x50b   :  { %4640 = vmatprep.subr.bf16.mxu0 %v7353_v34  ;;  %4704 = vmatprep.subr.bf16.mxu1 %v7354_v22  ;;  %v7364_v34 = vld [vmem:[#allocation39_spill] sm:$0xff]  ;;  %v7365_v22 = vld [vmem:[#allocation40_spill] sm:$0xff] }
 0x50e   :  { %4642 = vmatpush1.bf16.msra.mxu0 %v7355_v19  ;;  %4706 = vmatpush1.bf16.msra.mxu1 %v7356_v44  ;;  %v7366_v19 = vld [vmem:[#allocation41_spill] sm:$0xff]  ;;  %v7367_v44 = vld [vmem:[#allocation42_spill] sm:$0xff] }
 0x50f   :  { %4644 = vmatprep.subr.bf16.mxu0 %v7357_v54  ;;  %4708 = vmatprep.subr.bf16.mxu1 %v7358_v45  ;;  %v7368_v54 = vld [vmem:[#allocation43_spill] sm:$0xff]  ;;  %v7369_v45 = vld [vmem:[#allocation44_spill] sm:$0xff] }
 0x512   :  { %4646 = vmatpush1.bf16.msra.mxu0 %v7359_v18  ;;  %4710 = vmatpush1.bf16.msra.mxu1 %v7360_v50  ;;  %v7370_v18 = vld [vmem:[#allocation45_spill] sm:$0xff]  ;;  %v7371_v50 = vld [vmem:[#allocation46_spill] sm:$0xff] }
 0x513   :  { %4648 = vmatprep.subr.bf16.mxu0 %v7361_v9  ;;  %4712 = vmatprep.subr.bf16.mxu1 %v7362_v53  ;;  %v7372_v9 = vld [vmem:[#allocation47_spill] sm:$0xff]  ;;  %v7373_v53 = vld [vmem:[#allocation48_spill] sm:$0xff] }
 0x516   :  { %4650 = vmatpush1.bf16.msra.mxu0 %v7363_v56  ;;  %4714 = vmatpush1.bf16.msra.mxu1 %v7364_v34  ;;  %v7374_v56 = vld [vmem:[#allocation49_spill] sm:$0xff]  ;;  %v7375_v34 = vld [vmem:[#allocation50_spill] sm:$0xff] }
 0x517   :  { %4652 = vmatprep.subr.bf16.mxu0 %v7365_v22  ;;  %4716 = vmatprep.subr.bf16.mxu1 %v7366_v19  ;;  %v7376_v22 = vld [vmem:[#allocation51_spill] sm:$0xff]  ;;  %v7377_v19 = vld [vmem:[#allocation52_spill] sm:$0xff] }
 0x51a   :  { %4654 = vmatpush1.bf16.msra.mxu0 %v7367_v44  ;;  %4718 = vmatpush1.bf16.msra.mxu1 %v7368_v54  ;;  %v7378_v44 = vld [vmem:[#allocation53_spill] sm:$0xff]  ;;  %v7379_v54 = vld [vmem:[#allocation54_spill] sm:$0xff] }
 0x51b   :  { %4656 = vmatprep.subr.bf16.mxu0 %v7369_v45  ;;  %4720 = vmatprep.subr.bf16.mxu1 %v7370_v18  ;;  %v7380_v45 = vld [vmem:[#allocation55_spill] sm:$0xff]  ;;  %v7381_v18 = vld [vmem:[#allocation56_spill] sm:$0xff] }
 0x51e   :  { %4658 = vmatpush1.bf16.msra.mxu0 %v7371_v50  ;;  %4722 = vmatpush1.bf16.msra.mxu1 %v7372_v9  ;;  %v7382_v50 = vld [vmem:[#allocation57_spill] sm:$0xff]  ;;  %v7383_v9 = vld [vmem:[#allocation58_spill] sm:$0xff] }
 0x51f   :  { %4660 = vmatprep.subr.bf16.mxu0 %v7373_v53  ;;  %4724 = vmatprep.subr.bf16.mxu1 %v7374_v56  ;;  %v7384_v53 = vld [vmem:[#allocation59_spill] sm:$0xff]  ;;  %v7385_v56 = vld [vmem:[#allocation60_spill] sm:$0xff] }
 0x522   :  { %4662 = vmatpush1.bf16.msra.mxu0 %v7375_v34  ;;  %4726 = vmatpush1.bf16.msra.mxu1 %v7376_v22  ;;  %v7386_v34 = vld [vmem:[#allocation61_spill] sm:$0xff]  ;;  %v7387_v22 = vld [vmem:[#allocation62_spill] sm:$0xff] }
 0x523   :  { %4664 = vmatprep.subr.bf16.mxu0 %v7377_v19  ;;  %4728 = vmatprep.subr.bf16.mxu1 %v7378_v44  ;;  %v7388_v19 = vld [vmem:[#allocation63_spill] sm:$0xff]  ;;  %v7389_v44 = vld [vmem:[#allocation13_spill] sm:$0xff] }
 0x526   :  { %4666 = vmatpush1.bf16.msra.mxu0 %v7379_v54  ;;  %4730 = vmatpush1.bf16.msra.mxu1 %v7380_v45  ;;  %v7390_v54 = vld [vmem:[#allocation69_spill] sm:$0xff] }
 0x527   :  { %4668 = vmatprep.subr.bf16.mxu0 %v7381_v18  ;;  %4732 = vmatprep.subr.bf16.mxu1 %v7382_v50 }
 0x52a   :  { %4670 = vmatpush1.bf16.msra.mxu0 %v7383_v9  ;;  %4734 = vmatpush1.bf16.msra.mxu1 %v7384_v53 }
 0x52b   :  { %4672 = vmatprep.subr.bf16.mxu0 %v7385_v56  ;;  %4736 = vmatprep.subr.bf16.mxu1 %v7386_v34 }
 0x52e   :  { %4674 = vmatpush1.bf16.msra.mxu0 %v7387_v22  ;;  %4738 = vmatpush1.bf16.msra.mxu1 %v7388_v19 }
 0x52f   :  { %4740 = vmatprep.subr.bf16.mxu0 %v7389_v44  ;;  %4771 = vmatprep.subr.bf16.mxu1 %v7166_v31  ;;  %v7391_v44 = vld [vmem:[#allocation12_spill] sm:$0xff] }
 0x5a4   :  { %v1779_v45 = vpop.f32.mrb[22].mxu0  ;;  %v1850_v18 = vpop.f32.mrb[22].mxu1 }
 0x5a5   :  { %v1780_v50 = vadd.f32 %v1779_v45, %v7390_v54  ;;  %v1781_v37 = vpop.f32.mrb[23].mxu0  ;;  %v1852_v9 = vpop.f32.mrb[23].mxu1  ;;  %v1851_v4 = vadd.f32 %v1850_v18, %v6231_v0 }
 0x5a6   :  { %v1782_v53 = vadd.f32 %v1781_v37, %v7282_v55  ;;  %v1853_v8 = vadd.f32 %v1852_v9, %v7391_v44 }
 0x5a7   :  { %v3309_v63 = vmul.f32 -1.442695, %v1780_v50 }
 0x5a8   :  { %v3310_v56 = vmul.f32 -1.442695, %v1782_v53 }
 0x5a9   :  { %5448 = vpow2.f32 %v3309_v63 }
 0x5aa   :  { %5450 = vpow2.f32 %v3310_v56 }
 0x5b3   :  { %v5449_v34 = vpop.eup %5448 }
 0x5b4   :  { %v1858_v22 = vadd.f32 1.0, %v5449_v34  ;;  %v5451_v19 = vpop.eup %5450 }
 0x5b5   :  { %v1864_v41 = vadd.f32 1.0, %v5451_v19 }
 0x5b6   :  { %5452 = vrcp.f32 %v1858_v22 }
 0x5b7   :  { %5454 = vrcp.f32 %v1864_v41 }
 0x5c0   :  { %v5453_v13 = vpop.eup %5452 }
 0x5c1   :  { %v1867_v45 = vmul.f32 %v5453_v13, %v1853_v8  ;;  %v5455_v22 = vpop.eup %5454 }
 0x5c2   :  { %v1870_v9 = vsub.f32 1.0, %v5455_v22  ;;  %v1872_v13 = vmul.f32 %v5455_v22, %v6475_v61 }
 0x5c3   :  { %v1868_v54 = vadd.f32 %v1867_v45, %v1851_v4 }
 0x5c4   :  { %v1940_v38 = vpop.f32.mrb[8].mxu0  ;;  %v2011_v50 = vpop.f32.mrb[24].mxu1 }
 0x5c5   :  { %5456 = vtanh.f32 %v1868_v54  ;;  %v5332_v63 = vadd.f32 %v7229_v14, %v1940_v38  ;;  %v1942_v37 = vpop.f32.mrb[9].mxu0  ;;  %v3678_v53 = vpop.f32.mrb[25].mxu1  ;;  %v2012_v45 = vadd.f32 %v2011_v50, %v6108_v3  ;;  %v7394_v50 = vld [vmem:[#allocation15_spill] sm:$0xff] }
 0x5c6   :  { %v5334_v34 = vadd.f32 %v7230_v2, %v1942_v37  ;;  %v7392_v53 = vld [vmem:[#allocation68_spill] sm:$0xff] }
 0x5c7   :  { %v3311_v56 = vmul.f32 -1.442695, %v5332_v63 }
 0x5c8   :  { %v3312_v19 = vmul.f32 -1.442695, %v5334_v34 }
 0x5c9   :  { %5458 = vpow2.f32 %v3311_v56 }
 0x5ca   :  { %5460 = vpow2.f32 %v3312_v19 }
 0x5cf   :  { %v5457_v44 = vpop.eup %5456 }
 0x5d0   :  { %v1871_v18 = vmul.f32 %v5457_v44, %v1870_v9 }
 0x5d2   :  { %v6594_v4 = vadd.f32 %v1872_v13, %v1871_v18  ;;  %v7395_v18 = vld [vmem:[#allocation16_spill] sm:$0xff]  ;;  %v7396_v13 = vld [vmem:[#allocation17_spill] sm:$0xff] }
 0x5d3   :  { %v5459_v8 = vpop.eup %5458 }
 0x5d4   :  { %v2019_v41 = vadd.f32 1.0, %v5459_v8  ;;  %2100 = vmatprep.mubr.f32.mxu0 %v6594_v4  ;;  %2171 = vmatprep.mubr.f32.mxu1 %v6594_v4  ;;  %v5461_v38 = vpop.eup %5460  ;;  %v7397_v8 = vld [vmem:[#allocation18_spill] sm:$0xff] }
 0x5d5   :  { %v2026_v54 = vadd.f32 1.0, %v5461_v38  ;;  %v7399_v38 = vld [vmem:[#allocation20_spill] sm:$0xff] }
 0x5d6   :  { %5462 = vrcp.f32 %v2019_v41  ;;  %v7398_v41 = vld [vmem:[#allocation19_spill] sm:$0xff] }
 0x5d7   :  { %5464 = vrcp.f32 %v2026_v54  ;;  %v7400_v54 = vld [vmem:[#allocation21_spill] sm:$0xff] }
 0x5e0   :  { %v5463_v63 = vpop.eup %5462 }
 0x5e1   :  { %v2029_v37 = vmul.f32 %v5463_v63, %v2012_v45  ;;  %v5465_v61 = vpop.eup %5464  ;;  %v7401_v45 = vld [vmem:[#allocation22_spill] sm:$0xff]  ;;  %v7402_v63 = vld [vmem:[#allocation23_spill] sm:$0xff] }
 0x5e2   :  { %v2032_v56 = vsub.f32 1.0, %v5465_v61  ;;  %v2034_v19 = vmul.f32 %v5465_v61, %v6482_v29  ;;  %v7393_v29 = vld [vmem:[#allocation14_spill] sm:$0xff]  ;;  %v7406_v61 = vld [vmem:[#allocation27_spill] sm:$0xff] }
 0x5e3   :  { %v2030_v44 = vadd.f32 %v2029_v37, %v7392_v53  ;;  %v7403_v37 = vld [vmem:[#allocation24_spill] sm:$0xff]  ;;  %v7404_v53 = vld [vmem:[#allocation25_spill] sm:$0xff] }
 0x5e5   :  { %5466 = vtanh.f32 %v2030_v44  ;;  %v7405_v44 = vld [vmem:[#allocation26_spill] sm:$0xff] }
 0x5ef   :  { %v5467_v34 = vpop.eup %5466 }
 0x5f0   :  { %v2033_v22 = vmul.f32 %v5467_v34, %v2032_v56  ;;  %v7407_v56 = vld [vmem:[#allocation28_spill] sm:$0xff]  ;;  %v7408_v34 = vld [vmem:[#allocation29_spill] sm:$0xff] }
 0x5f2   :  { %v6601_v9 = vadd.f32 %v2034_v19, %v2033_v22  ;;  %v7409_v22 = vld [vmem:[#allocation30_spill] sm:$0xff]  ;;  %v7410_v19 = vld [vmem:[#allocation31_spill] sm:$0xff] }
 0x5f4   :  { %2101 = vmatmul.mubr.f32.vlgmr.msra.gmra.mrb[24].mxu0 %v6601_v9  ;;  %2172 = vmatmul.mubr.f32.vlgmr.msra.gmra.mrb[26].mxu1 %v6601_v9 }
 0x5f5   :  { %4742 = vmatpush1.bf16.msra.mxu0 %v5745_v20  ;;  %4773 = vmatpush3.bf16.msra.mxu1 %v5778_v43 }
 0x5f6   :  { %4744 = vmatprep.subr.bf16.mxu0 %v5747_v21  ;;  %4774 = vmatprep.subr.bf16.mxu1 %v7166_v31 }
 0x5f7   :  { %2261 = vmatprep.mubr.f32.mxu0 %v7177_v26  ;;  %3711 = vmatprep.mubr.msk.f32.mxu1 %vm5644_vm2, %v7177_v26 }
 0x5f9   :  { %4746 = vmatpush1.bf16.msra.mxu0 %v5756_v27  ;;  %4776 = vmatpush3.bf16.msra.mxu1 %v5783_v47 }
 0x5fa   :  { %4748 = vmatprep.subr.bf16.mxu0 %v5759_v28  ;;  %4777 = vmatprep.subr.bf16.mxu1 %v7166_v31 }
 0x5fd   :  { %4750 = vmatpush1.bf16.msra.mxu0 %v5770_v35  ;;  %4779 = vmatpush3.bf16.msra.mxu1 %v5799_v57 }
 0x5fe   :  { %4752 = vmatprep.subr.bf16.mxu0 %v5776_v39  ;;  %4780 = vmatprep.subr.bf16.mxu1 %v7166_v31 }
 0x601   :  { %4754 = vmatpush1.bf16.msra.mxu0 %v5787_v48  ;;  %4782 = vmatpush3.bf16.msra.mxu1 %v5815_v5 }
 0x602   :  { %4756 = vmatprep.subr.bf16.mxu0 %v5793_v52  ;;  %4783 = vmatprep.subr.bf16.mxu1 %v7166_v31 }
 0x605   :  { %4758 = vmatpush1.bf16.msra.mxu0 %v5803_v58  ;;  %4785 = vmatpush3.bf16.msra.mxu1 %v5831_v15 }
 0x606   :  { %4760 = vmatprep.subr.bf16.mxu0 %v5809_v62  ;;  %4786 = vmatprep.subr.bf16.mxu1 %v7166_v31 }
 0x609   :  { %4762 = vmatpush1.bf16.msra.mxu0 %v5819_v6  ;;  %4788 = vmatpush3.bf16.msra.mxu1 %v5847_v30 }
 0x60a   :  { %4764 = vmatprep.subr.bf16.mxu0 %v5825_v10  ;;  %4789 = vmatprep.subr.bf16.mxu1 %v7166_v31 }
 0x60d   :  { %4766 = vmatpush1.bf16.msra.mxu0 %v5835_v16  ;;  %4791 = vmatpush3.bf16.msra.mxu1 %v5861_v42 }
 0x60e   :  { %4768 = vmatprep.subr.bf16.mxu0 %v5841_v23  ;;  %4792 = vmatprep.subr.bf16.mxu1 %v7166_v31 }
 0x611   :  { %4770 = vmatpush1.bf16.msra.mxu0 %v5851_v32  ;;  %4794 = vmatpush3.bf16.msra.mxu1 %v5873_v59 }
 0x612   :  { %4796 = vmatprep.subr.bf16.mxu0 %v5855_v36  ;;  %4860 = vmatprep.subr.bf16.mxu1 %v5876_v60 }
 0x614   :  { %2262 = vmatmul.mubr.f32.vlgmr.msra.gmra.mrb[10].mxu0 %v6601_v9  ;;  %3712 = vmatmul.mubr.f32.vlgmr.msra.gmra.mrb[28].mxu1 %v6601_v9 }
 0x615   :  { %4798 = vmatpush1.bf16.msra.mxu0 %v5865_v49  ;;  %4862 = vmatpush1.bf16.msra.mxu1 %v5886_v11 }
 0x616   :  { %4800 = vmatprep.subr.bf16.mxu0 %v5869_v51  ;;  %4864 = vmatprep.subr.bf16.mxu1 %v5889_v12 }
 0x619   :  { %4802 = vmatpush1.bf16.msra.mxu0 %v5879_v1  ;;  %4866 = vmatpush1.bf16.msra.mxu1 %v5897_v24 }
 0x61a   :  { %4804 = vmatprep.subr.bf16.mxu0 %v5882_v7  ;;  %4868 = vmatprep.subr.bf16.mxu1 %v5901_v25 }
 0x61d   :  { %4806 = vmatpush1.bf16.msra.mxu0 %v5892_v17  ;;  %4870 = vmatpush1.bf16.msra.mxu1 %v5905_v33 }
 0x61e   :  { %4808 = vmatprep.subr.bf16.mxu0 %v5909_v40  ;;  %4872 = vmatprep.subr.bf16.mxu1 %v5911_v46 }
 0x621   :  { %4810 = vmatpush1.bf16.msra.mxu0 %v7393_v29  ;;  %4874 = vmatpush1.bf16.msra.mxu1 %v7394_v50 }
 0x622   :  { %4812 = vmatprep.subr.bf16.mxu0 %v7395_v18  ;;  %4876 = vmatprep.subr.bf16.mxu1 %v7396_v13 }
 0x625   :  { %4814 = vmatpush1.bf16.msra.mxu0 %v7397_v8  ;;  %4878 = vmatpush1.bf16.msra.mxu1 %v7398_v41 }
 0x626   :  { %4816 = vmatprep.subr.bf16.mxu0 %v7399_v38  ;;  %4880 = vmatprep.subr.bf16.mxu1 %v7400_v54  ;;  %v7411_v54 = vld [vmem:[#allocation32_spill] sm:$0xff] }
 0x629   :  { %4818 = vmatpush1.bf16.msra.mxu0 %v7401_v45  ;;  %4882 = vmatpush1.bf16.msra.mxu1 %v7402_v63  ;;  %v7412_v45 = vld [vmem:[#allocation33_spill] sm:$0xff]  ;;  %v7413_v63 = vld [vmem:[#allocation34_spill] sm:$0xff] }
 0x62a   :  { %4820 = vmatprep.subr.bf16.mxu0 %v7403_v37  ;;  %4884 = vmatprep.subr.bf16.mxu1 %v7404_v53  ;;  %v7414_v37 = vld [vmem:[#allocation35_spill] sm:$0xff]  ;;  %v7415_v53 = vld [vmem:[#allocation36_spill] sm:$0xff] }
 0x62d   :  { %4822 = vmatpush1.bf16.msra.mxu0 %v7405_v44  ;;  %4886 = vmatpush1.bf16.msra.mxu1 %v7406_v61  ;;  %v7416_v44 = vld [vmem:[#allocation37_spill] sm:$0xff]  ;;  %v7417_v61 = vld [vmem:[#allocation38_spill] sm:$0xff] }
 0x62e   :  { %4824 = vmatprep.subr.bf16.mxu0 %v7407_v56  ;;  %4888 = vmatprep.subr.bf16.mxu1 %v7408_v34  ;;  %v7418_v56 = vld [vmem:[#allocation39_spill] sm:$0xff]  ;;  %v7419_v34 = vld [vmem:[#allocation40_spill] sm:$0xff] }
 0x631   :  { %4826 = vmatpush1.bf16.msra.mxu0 %v7409_v22  ;;  %4890 = vmatpush1.bf16.msra.mxu1 %v7410_v19  ;;  %v7420_v22 = vld [vmem:[#allocation41_spill] sm:$0xff]  ;;  %v7421_v19 = vld [vmem:[#allocation42_spill] sm:$0xff] }
 0x632   :  { %4828 = vmatprep.subr.bf16.mxu0 %v7411_v54  ;;  %4892 = vmatprep.subr.bf16.mxu1 %v7412_v45  ;;  %v7422_v54 = vld [vmem:[#allocation43_spill] sm:$0xff]  ;;  %v7423_v45 = vld [vmem:[#allocation44_spill] sm:$0xff] }
 0x635   :  { %4830 = vmatpush1.bf16.msra.mxu0 %v7413_v63  ;;  %4894 = vmatpush1.bf16.msra.mxu1 %v7414_v37  ;;  %v7424_v63 = vld [vmem:[#allocation45_spill] sm:$0xff]  ;;  %v7425_v37 = vld [vmem:[#allocation46_spill] sm:$0xff] }
 0x636   :  { %4832 = vmatprep.subr.bf16.mxu0 %v7415_v53  ;;  %4896 = vmatprep.subr.bf16.mxu1 %v7416_v44  ;;  %v7426_v53 = vld [vmem:[#allocation47_spill] sm:$0xff]  ;;  %v7427_v44 = vld [vmem:[#allocation48_spill] sm:$0xff] }
 0x639   :  { %4834 = vmatpush1.bf16.msra.mxu0 %v7417_v61  ;;  %4898 = vmatpush1.bf16.msra.mxu1 %v7418_v56  ;;  %v7428_v61 = vld [vmem:[#allocation49_spill] sm:$0xff]  ;;  %v7429_v56 = vld [vmem:[#allocation50_spill] sm:$0xff] }
 0x63a   :  { %4836 = vmatprep.subr.bf16.mxu0 %v7419_v34  ;;  %4900 = vmatprep.subr.bf16.mxu1 %v7420_v22  ;;  %v7430_v34 = vld [vmem:[#allocation51_spill] sm:$0xff]  ;;  %v7431_v22 = vld [vmem:[#allocation52_spill] sm:$0xff] }
 0x63d   :  { %4838 = vmatpush1.bf16.msra.mxu0 %v7421_v19  ;;  %4902 = vmatpush1.bf16.msra.mxu1 %v7422_v54  ;;  %v7432_v19 = vld [vmem:[#allocation53_spill] sm:$0xff]  ;;  %v7433_v54 = vld [vmem:[#allocation54_spill] sm:$0xff] }
 0x63e   :  { %4840 = vmatprep.subr.bf16.mxu0 %v7423_v45  ;;  %4904 = vmatprep.subr.bf16.mxu1 %v7424_v63  ;;  %v7434_v45 = vld [vmem:[#allocation55_spill] sm:$0xff]  ;;  %v7435_v63 = vld [vmem:[#allocation56_spill] sm:$0xff] }
 0x641   :  { %4842 = vmatpush1.bf16.msra.mxu0 %v7425_v37  ;;  %4906 = vmatpush1.bf16.msra.mxu1 %v7426_v53  ;;  %v7436_v37 = vld [vmem:[#allocation57_spill] sm:$0xff]  ;;  %v7437_v53 = vld [vmem:[#allocation58_spill] sm:$0xff] }
 0x642   :  { %4844 = vmatprep.subr.bf16.mxu0 %v7427_v44  ;;  %4908 = vmatprep.subr.bf16.mxu1 %v7428_v61  ;;  %v7438_v44 = vld [vmem:[#allocation59_spill] sm:$0xff]  ;;  %v7439_v61 = vld [vmem:[#allocation60_spill] sm:$0xff] }
 0x645   :  { %4846 = vmatpush1.bf16.msra.mxu0 %v7429_v56  ;;  %4910 = vmatpush1.bf16.msra.mxu1 %v7430_v34  ;;  %v7440_v56 = vld [vmem:[#allocation61_spill] sm:$0xff]  ;;  %v7441_v34 = vld [vmem:[#allocation62_spill] sm:$0xff] }
 0x646   :  { %4848 = vmatprep.subr.bf16.mxu0 %v7431_v22  ;;  %4912 = vmatprep.subr.bf16.mxu1 %v7432_v19  ;;  %v7442_v22 = vld [vmem:[#allocation63_spill] sm:$0xff]  ;;  %v7443_v19 = vld [vmem:[#allocation13_spill] sm:$0xff] }
 0x649   :  { %4850 = vmatpush1.bf16.msra.mxu0 %v7433_v54  ;;  %4914 = vmatpush1.bf16.msra.mxu1 %v7434_v45  ;;  %v7444_v54 = vld [vmem:[#allocation69_spill] sm:$0xff] }
 0x64a   :  { %4852 = vmatprep.subr.bf16.mxu0 %v7435_v63  ;;  %4916 = vmatprep.subr.bf16.mxu1 %v7436_v37 }
 0x64d   :  { %4854 = vmatpush1.bf16.msra.mxu0 %v7437_v53  ;;  %4918 = vmatpush1.bf16.msra.mxu1 %v7438_v44 }
 0x64e   :  { %4856 = vmatprep.subr.bf16.mxu0 %v7439_v61  ;;  %4920 = vmatprep.subr.bf16.mxu1 %v7440_v56 }
 0x651   :  { %4858 = vmatpush1.bf16.msra.mxu0 %v7441_v34  ;;  %4922 = vmatpush1.bf16.msra.mxu1 %v7442_v22 }
 0x652   :  { %4924 = vmatprep.subr.bf16.mxu0 %v7443_v19  ;;  %4955 = vmatprep.subr.bf16.mxu1 %v7166_v31  ;;  %v7445_v19 = vld [vmem:[#allocation12_spill] sm:$0xff] }
 0x6c7   :  { %v2102_v45 = vpop.f32.mrb[24].mxu0  ;;  %v2173_v63 = vpop.f32.mrb[26].mxu1 }
 0x6c8   :  { %v2103_v37 = vadd.f32 %v2102_v45, %v7444_v54  ;;  %v2104_v38 = vpop.f32.mrb[25].mxu0  ;;  %v2175_v53 = vpop.f32.mrb[27].mxu1  ;;  %v2174_v50 = vadd.f32 %v2173_v63, %v6231_v0 }
 0x6c9   :  { %v2105_v44 = vadd.f32 %v2104_v38, %v7282_v55  ;;  %v2176_v13 = vadd.f32 %v2175_v53, %v7445_v19 }
 0x6ca   :  { %v3313_v41 = vmul.f32 -1.442695, %v2103_v37 }
 0x6cb   :  { %v3314_v61 = vmul.f32 -1.442695, %v2105_v44 }
 0x6cc   :  { %5468 = vpow2.f32 %v3313_v41 }
 0x6cd   :  { %5470 = vpow2.f32 %v3314_v61 }
 0x6d6   :  { %v5469_v56 = vpop.eup %5468 }
 0x6d7   :  { %v2181_v34 = vadd.f32 1.0, %v5469_v56  ;;  %v5471_v22 = vpop.eup %5470 }
 0x6d8   :  { %v2187_v8 = vadd.f32 1.0, %v5471_v22 }
 0x6d9   :  { %5472 = vrcp.f32 %v2181_v34 }
 0x6da   :  { %5474 = vrcp.f32 %v2187_v8 }
 0x6e3   :  { %v5473_v18 = vpop.eup %5472 }
 0x6e4   :  { %v2190_v45 = vmul.f32 %v5473_v18, %v2176_v13  ;;  %v5475_v34 = vpop.eup %5474 }
 0x6e5   :  { %v2193_v53 = vsub.f32 1.0, %v5475_v34  ;;  %v2195_v18 = vmul.f32 %v5475_v34, %v6594_v4 }
 0x6e6   :  { %v2191_v54 = vadd.f32 %v2190_v45, %v2174_v50 }
 0x6e7   :  { %v2263_v29 = vpop.f32.mrb[10].mxu0  ;;  %v2334_v37 = vpop.f32.mrb[28].mxu1 }
 0x6e8   :  { %5476 = vtanh.f32 %v2191_v54  ;;  %v5336_v41 = vadd.f32 %v7229_v14, %v2263_v29  ;;  %v2265_v38 = vpop.f32.mrb[11].mxu0  ;;  %v3713_v44 = vpop.f32.mrb[29].mxu1  ;;  %v2335_v45 = vadd.f32 %v2334_v37, %v6108_v3  ;;  %v7448_v37 = vld [vmem:[#allocation15_spill] sm:$0xff] }
 0x6e9   :  { %v5338_v56 = vadd.f32 %v7230_v2, %v2265_v38  ;;  %v7446_v44 = vld [vmem:[#allocation67_spill] sm:$0xff] }
 0x6ea   :  { %v3315_v61 = vmul.f32 -1.442695, %v5336_v41 }
 0x6eb   :  { %v3316_v22 = vmul.f32 -1.442695, %v5338_v56 }
 0x6ec   :  { %5478 = vpow2.f32 %v3315_v61 }
 0x6ed   :  { %5480 = vpow2.f32 %v3316_v22 }
 0x6f2   :  { %v5477_v19 = vpop.eup %5476 }
 0x6f3   :  { %v2194_v63 = vmul.f32 %v5477_v19, %v2193_v53 }
 0x6f5   :  { %v6713_v50 = vadd.f32 %v2195_v18, %v2194_v63  ;;  %v7449_v63 = vld [vmem:[#allocation16_spill] sm:$0xff]  ;;  %v7450_v18 = vld [vmem:[#allocation17_spill] sm:$0xff] }
 0x6f6   :  { %v5479_v13 = vpop.eup %5478 }
 0x6f7   :  { %v2342_v8 = vadd.f32 1.0, %v5479_v13  ;;  %2423 = vmatprep.mubr.f32.mxu0 %v6713_v50  ;;  %2494 = vmatprep.mubr.f32.mxu1 %v6713_v50  ;;  %v5481_v29 = vpop.eup %5480  ;;  %v7451_v13 = vld [vmem:[#allocation18_spill] sm:$0xff] }
 0x6f8   :  { %v2349_v54 = vadd.f32 1.0, %v5481_v29  ;;  %v7453_v29 = vld [vmem:[#allocation20_spill] sm:$0xff] }
 0x6f9   :  { %5482 = vrcp.f32 %v2342_v8  ;;  %v7452_v8 = vld [vmem:[#allocation19_spill] sm:$0xff] }
 0x6fa   :  { %5484 = vrcp.f32 %v2349_v54  ;;  %v7454_v54 = vld [vmem:[#allocation21_spill] sm:$0xff] }
 0x703   :  { %v5483_v41 = vpop.eup %5482 }
 0x704   :  { %v2352_v38 = vmul.f32 %v5483_v41, %v2335_v45  ;;  %v5485_v4 = vpop.eup %5484  ;;  %v7455_v45 = vld [vmem:[#allocation22_spill] sm:$0xff]  ;;  %v7456_v41 = vld [vmem:[#allocation23_spill] sm:$0xff] }
 0x705   :  { %v2355_v61 = vsub.f32 1.0, %v5485_v4  ;;  %v2357_v22 = vmul.f32 %v5485_v4, %v6601_v9  ;;  %v7447_v9 = vld [vmem:[#allocation14_spill] sm:$0xff]  ;;  %v7460_v4 = vld [vmem:[#allocation27_spill] sm:$0xff] }
 0x706   :  { %v2353_v19 = vadd.f32 %v2352_v38, %v7446_v44  ;;  %v7457_v38 = vld [vmem:[#allocation24_spill] sm:$0xff]  ;;  %v7458_v44 = vld [vmem:[#allocation25_spill] sm:$0xff] }
 0x708   :  { %5486 = vtanh.f32 %v2353_v19  ;;  %v7459_v19 = vld [vmem:[#allocation26_spill] sm:$0xff] }
 0x712   :  { %v5487_v56 = vpop.eup %5486 }
 0x713   :  { %v2356_v34 = vmul.f32 %v5487_v56, %v2355_v61  ;;  %v7461_v61 = vld [vmem:[#allocation28_spill] sm:$0xff]  ;;  %v7462_v56 = vld [vmem:[#allocation29_spill] sm:$0xff] }
 0x715   :  { %v6720_v53 = vadd.f32 %v2357_v22, %v2356_v34  ;;  %v7463_v34 = vld [vmem:[#allocation30_spill] sm:$0xff]  ;;  %v7464_v22 = vld [vmem:[#allocation31_spill] sm:$0xff] }
 0x717   :  { %2424 = vmatmul.mubr.f32.vlgmr.msra.gmra.mrb[26].mxu0 %v6720_v53  ;;  %2495 = vmatmul.mubr.f32.vlgmr.msra.gmra.mrb[30].mxu1 %v6720_v53 }
 0x718   :  { %4926 = vmatpush1.bf16.msra.mxu0 %v5745_v20  ;;  %4957 = vmatpush3.bf16.msra.mxu1 %v5778_v43 }
 0x719   :  { %4928 = vmatprep.subr.bf16.mxu0 %v5747_v21  ;;  %4958 = vmatprep.subr.bf16.mxu1 %v7166_v31 }
 0x71a   :  { %2584 = vmatprep.mubr.f32.mxu0 %v7177_v26  ;;  %3746 = vmatprep.mubr.msk.f32.mxu1 %vm5644_vm2, %v7177_v26 }
 0x71c   :  { %4930 = vmatpush1.bf16.msra.mxu0 %v5756_v27  ;;  %4960 = vmatpush3.bf16.msra.mxu1 %v5783_v47 }
 0x71d   :  { %4932 = vmatprep.subr.bf16.mxu0 %v5759_v28  ;;  %4961 = vmatprep.subr.bf16.mxu1 %v7166_v31 }
 0x720   :  { %4934 = vmatpush1.bf16.msra.mxu0 %v5770_v35  ;;  %4963 = vmatpush3.bf16.msra.mxu1 %v5799_v57 }
 0x721   :  { %4936 = vmatprep.subr.bf16.mxu0 %v5776_v39  ;;  %4964 = vmatprep.subr.bf16.mxu1 %v7166_v31 }
 0x724   :  { %4938 = vmatpush1.bf16.msra.mxu0 %v5787_v48  ;;  %4966 = vmatpush3.bf16.msra.mxu1 %v5815_v5 }
 0x725   :  { %4940 = vmatprep.subr.bf16.mxu0 %v5793_v52  ;;  %4967 = vmatprep.subr.bf16.mxu1 %v7166_v31 }
 0x728   :  { %4942 = vmatpush1.bf16.msra.mxu0 %v5803_v58  ;;  %4969 = vmatpush3.bf16.msra.mxu1 %v5831_v15 }
 0x729   :  { %4944 = vmatprep.subr.bf16.mxu0 %v5809_v62  ;;  %4970 = vmatprep.subr.bf16.mxu1 %v7166_v31 }
 0x72c   :  { %4946 = vmatpush1.bf16.msra.mxu0 %v5819_v6  ;;  %4972 = vmatpush3.bf16.msra.mxu1 %v5847_v30 }
 0x72d   :  { %4948 = vmatprep.subr.bf16.mxu0 %v5825_v10  ;;  %4973 = vmatprep.subr.bf16.mxu1 %v7166_v31 }
 0x730   :  { %4950 = vmatpush1.bf16.msra.mxu0 %v5835_v16  ;;  %4975 = vmatpush3.bf16.msra.mxu1 %v5861_v42 }
 0x731   :  { %4952 = vmatprep.subr.bf16.mxu0 %v5841_v23  ;;  %4976 = vmatprep.subr.bf16.mxu1 %v7166_v31 }
 0x734   :  { %4954 = vmatpush1.bf16.msra.mxu0 %v5851_v32  ;;  %4978 = vmatpush3.bf16.msra.mxu1 %v5873_v59 }
 0x735   :  { %4980 = vmatprep.subr.bf16.mxu0 %v5855_v36  ;;  %5044 = vmatprep.subr.bf16.mxu1 %v5876_v60 }
 0x737   :  { %2585 = vmatmul.mubr.f32.vlgmr.msra.gmra.mrb[12].mxu0 %v6720_v53  ;;  %3747 = vmatmul.mubr.f32.vlgmr.msra.gmra.mrb[32].mxu1 %v6720_v53 }
 0x738   :  { %4982 = vmatpush1.bf16.msra.mxu0 %v5865_v49  ;;  %5046 = vmatpush1.bf16.msra.mxu1 %v5886_v11 }
 0x739   :  { %4984 = vmatprep.subr.bf16.mxu0 %v5869_v51  ;;  %5048 = vmatprep.subr.bf16.mxu1 %v5889_v12 }
 0x73c   :  { %4986 = vmatpush1.bf16.msra.mxu0 %v5879_v1  ;;  %5050 = vmatpush1.bf16.msra.mxu1 %v5897_v24 }
 0x73d   :  { %4988 = vmatprep.subr.bf16.mxu0 %v5882_v7  ;;  %5052 = vmatprep.subr.bf16.mxu1 %v5901_v25 }
 0x740   :  { %4990 = vmatpush1.bf16.msra.mxu0 %v5892_v17  ;;  %5054 = vmatpush1.bf16.msra.mxu1 %v5905_v33 }
 0x741   :  { %4992 = vmatprep.subr.bf16.mxu0 %v5909_v40  ;;  %5056 = vmatprep.subr.bf16.mxu1 %v5911_v46 }
 0x744   :  { %4994 = vmatpush1.bf16.msra.mxu0 %v7447_v9  ;;  %5058 = vmatpush1.bf16.msra.mxu1 %v7448_v37 }
 0x745   :  { %4996 = vmatprep.subr.bf16.mxu0 %v7449_v63  ;;  %5060 = vmatprep.subr.bf16.mxu1 %v7450_v18 }
 0x748   :  { %4998 = vmatpush1.bf16.msra.mxu0 %v7451_v13  ;;  %5062 = vmatpush1.bf16.msra.mxu1 %v7452_v8 }
 0x749   :  { %5000 = vmatprep.subr.bf16.mxu0 %v7453_v29  ;;  %5064 = vmatprep.subr.bf16.mxu1 %v7454_v54  ;;  %v7465_v54 = vld [vmem:[#allocation32_spill] sm:$0xff] }
 0x74c   :  { %5002 = vmatpush1.bf16.msra.mxu0 %v7455_v45  ;;  %5066 = vmatpush1.bf16.msra.mxu1 %v7456_v41  ;;  %v7466_v45 = vld [vmem:[#allocation33_spill] sm:$0xff]  ;;  %v7467_v41 = vld [vmem:[#allocation34_spill] sm:$0xff] }
 0x74d   :  { %5004 = vmatprep.subr.bf16.mxu0 %v7457_v38  ;;  %5068 = vmatprep.subr.bf16.mxu1 %v7458_v44  ;;  %v7468_v38 = vld [vmem:[#allocation35_spill] sm:$0xff]  ;;  %v7469_v44 = vld [vmem:[#allocation36_spill] sm:$0xff] }
 0x750   :  { %5006 = vmatpush1.bf16.msra.mxu0 %v7459_v19  ;;  %5070 = vmatpush1.bf16.msra.mxu1 %v7460_v4  ;;  %v7470_v19 = vld [vmem:[#allocation37_spill] sm:$0xff]  ;;  %v7471_v4 = vld [vmem:[#allocation38_spill] sm:$0xff] }
 0x751   :  { %5008 = vmatprep.subr.bf16.mxu0 %v7461_v61  ;;  %5072 = vmatprep.subr.bf16.mxu1 %v7462_v56  ;;  %v7472_v61 = vld [vmem:[#allocation39_spill] sm:$0xff]  ;;  %v7473_v56 = vld [vmem:[#allocation40_spill] sm:$0xff] }
 0x754   :  { %5010 = vmatpush1.bf16.msra.mxu0 %v7463_v34  ;;  %5074 = vmatpush1.bf16.msra.mxu1 %v7464_v22  ;;  %v7474_v34 = vld [vmem:[#allocation41_spill] sm:$0xff]  ;;  %v7475_v22 = vld [vmem:[#allocation42_spill] sm:$0xff] }
 0x755   :  { %5012 = vmatprep.subr.bf16.mxu0 %v7465_v54  ;;  %5076 = vmatprep.subr.bf16.mxu1 %v7466_v45  ;;  %v7476_v54 = vld [vmem:[#allocation43_spill] sm:$0xff]  ;;  %v7477_v45 = vld [vmem:[#allocation44_spill] sm:$0xff] }
 0x758   :  { %5014 = vmatpush1.bf16.msra.mxu0 %v7467_v41  ;;  %5078 = vmatpush1.bf16.msra.mxu1 %v7468_v38  ;;  %v7478_v41 = vld [vmem:[#allocation45_spill] sm:$0xff]  ;;  %v7479_v38 = vld [vmem:[#allocation46_spill] sm:$0xff] }
 0x759   :  { %5016 = vmatprep.subr.bf16.mxu0 %v7469_v44  ;;  %5080 = vmatprep.subr.bf16.mxu1 %v7470_v19  ;;  %v7480_v44 = vld [vmem:[#allocation47_spill] sm:$0xff]  ;;  %v7481_v19 = vld [vmem:[#allocation48_spill] sm:$0xff] }
 0x75c   :  { %5018 = vmatpush1.bf16.msra.mxu0 %v7471_v4  ;;  %5082 = vmatpush1.bf16.msra.mxu1 %v7472_v61  ;;  %v7482_v4 = vld [vmem:[#allocation49_spill] sm:$0xff]  ;;  %v7483_v61 = vld [vmem:[#allocation50_spill] sm:$0xff] }
 0x75d   :  { %5020 = vmatprep.subr.bf16.mxu0 %v7473_v56  ;;  %5084 = vmatprep.subr.bf16.mxu1 %v7474_v34  ;;  %v7484_v56 = vld [vmem:[#allocation51_spill] sm:$0xff]  ;;  %v7485_v34 = vld [vmem:[#allocation52_spill] sm:$0xff] }
 0x760   :  { %5022 = vmatpush1.bf16.msra.mxu0 %v7475_v22  ;;  %5086 = vmatpush1.bf16.msra.mxu1 %v7476_v54  ;;  %v7486_v22 = vld [vmem:[#allocation53_spill] sm:$0xff]  ;;  %v7487_v54 = vld [vmem:[#allocation54_spill] sm:$0xff] }
 0x761   :  { %5024 = vmatprep.subr.bf16.mxu0 %v7477_v45  ;;  %5088 = vmatprep.subr.bf16.mxu1 %v7478_v41  ;;  %v7488_v45 = vld [vmem:[#allocation55_spill] sm:$0xff]  ;;  %v7489_v41 = vld [vmem:[#allocation56_spill] sm:$0xff] }
 0x764   :  { %5026 = vmatpush1.bf16.msra.mxu0 %v7479_v38  ;;  %5090 = vmatpush1.bf16.msra.mxu1 %v7480_v44  ;;  %v7490_v38 = vld [vmem:[#allocation57_spill] sm:$0xff]  ;;  %v7491_v44 = vld [vmem:[#allocation58_spill] sm:$0xff] }
 0x765   :  { %5028 = vmatprep.subr.bf16.mxu0 %v7481_v19  ;;  %5092 = vmatprep.subr.bf16.mxu1 %v7482_v4  ;;  %v7492_v19 = vld [vmem:[#allocation59_spill] sm:$0xff]  ;;  %v7493_v4 = vld [vmem:[#allocation60_spill] sm:$0xff] }
 0x768   :  { %5030 = vmatpush1.bf16.msra.mxu0 %v7483_v61  ;;  %5094 = vmatpush1.bf16.msra.mxu1 %v7484_v56  ;;  %v7494_v61 = vld [vmem:[#allocation61_spill] sm:$0xff]  ;;  %v7495_v56 = vld [vmem:[#allocation62_spill] sm:$0xff] }
 0x769   :  { %5032 = vmatprep.subr.bf16.mxu0 %v7485_v34  ;;  %5096 = vmatprep.subr.bf16.mxu1 %v7486_v22  ;;  %v7496_v34 = vld [vmem:[#allocation63_spill] sm:$0xff]  ;;  %v7497_v22 = vld [vmem:[#allocation13_spill] sm:$0xff] }
 0x76c   :  { %5034 = vmatpush1.bf16.msra.mxu0 %v7487_v54  ;;  %5098 = vmatpush1.bf16.msra.mxu1 %v7488_v45  ;;  %v7498_v54 = vld [vmem:[#allocation69_spill] sm:$0xff] }
 0x76d   :  { %5036 = vmatprep.subr.bf16.mxu0 %v7489_v41  ;;  %5100 = vmatprep.subr.bf16.mxu1 %v7490_v38 }
 0x770   :  { %5038 = vmatpush1.bf16.msra.mxu0 %v7491_v44  ;;  %5102 = vmatpush1.bf16.msra.mxu1 %v7492_v19 }
 0x771   :  { %5040 = vmatprep.subr.bf16.mxu0 %v7493_v4  ;;  %5104 = vmatprep.subr.bf16.mxu1 %v7494_v61 }
 0x774   :  { %5042 = vmatpush1.bf16.msra.mxu0 %v7495_v56  ;;  %5106 = vmatpush1.bf16.msra.mxu1 %v7496_v34 }
 0x775   :  { %5108 = vmatprep.subr.bf16.mxu0 %v7497_v22  ;;  %5139 = vmatprep.subr.bf16.mxu1 %v7166_v31  ;;  %v7499_v22 = vld [vmem:[#allocation12_spill] sm:$0xff] }
 0x7ea   :  { %v2425_v45 = vpop.f32.mrb[26].mxu0  ;;  %v2496_v41 = vpop.f32.mrb[30].mxu1 }
 0x7eb   :  { %v2426_v38 = vadd.f32 %v2425_v45, %v7498_v54  ;;  %v2427_v29 = vpop.f32.mrb[27].mxu0  ;;  %v2498_v44 = vpop.f32.mrb[31].mxu1  ;;  %v2497_v37 = vadd.f32 %v2496_v41, %v6231_v0 }
 0x7ec   :  { %v2428_v19 = vadd.f32 %v2427_v29, %v7282_v55  ;;  %v2499_v18 = vadd.f32 %v2498_v44, %v7499_v22 }
 0x7ed   :  { %v3317_v8 = vmul.f32 -1.442695, %v2426_v38 }
 0x7ee   :  { %v3318_v4 = vmul.f32 -1.442695, %v2428_v19 }
 0x7ef   :  { %5488 = vpow2.f32 %v3317_v8 }
 0x7f0   :  { %5490 = vpow2.f32 %v3318_v4 }
 0x7f9   :  { %v5489_v61 = vpop.eup %5488 }
 0x7fa   :  { %v2504_v56 = vadd.f32 1.0, %v5489_v61  ;;  %v5491_v34 = vpop.eup %5490 }
 0x7fb   :  { %v2510_v13 = vadd.f32 1.0, %v5491_v34 }
 0x7fc   :  { %5492 = vrcp.f32 %v2504_v56 }
 0x7fd   :  { %5494 = vrcp.f32 %v2510_v13 }
 0x806   :  { %v5493_v63 = vpop.eup %5492 }
 0x807   :  { %v2513_v45 = vmul.f32 %v5493_v63, %v2499_v18  ;;  %v5495_v56 = vpop.eup %5494 }
 0x808   :  { %v2516_v44 = vsub.f32 1.0, %v5495_v56  ;;  %v2518_v63 = vmul.f32 %v5495_v56, %v6713_v50 }
 0x809   :  { %v2514_v54 = vadd.f32 %v2513_v45, %v2497_v37 }
 0x80a   :  { %v2586_v9 = vpop.f32.mrb[12].mxu0  ;;  %v2657_v38 = vpop.f32.mrb[32].mxu1 }
 0x80b   :  { %5496 = vtanh.f32 %v2514_v54  ;;  %v5340_v8 = vadd.f32 %v7229_v14, %v2586_v9  ;;  %v2588_v29 = vpop.f32.mrb[13].mxu0  ;;  %v3748_v19 = vpop.f32.mrb[33].mxu1  ;;  %v2658_v45 = vadd.f32 %v2657_v38, %v6108_v3  ;;  %v7539_v38 = vld [vmem:[#allocation52_spill] sm:$0xff] }
 0x80c   :  { %v5342_v61 = vadd.f32 %v7230_v2, %v2588_v29  ;;  %v7500_v19 = vld [vmem:[#allocation71_spill] sm:$0xff] }
 0x80d   :  { %v3319_v4 = vmul.f32 -1.442695, %v5340_v8 }
 0x80e   :  { %v3320_v34 = vmul.f32 -1.442695, %v5342_v61 }
 0x80f   :  { %5498 = vpow2.f32 %v3319_v4 }
 0x810   :  { %5500 = vpow2.f32 %v3320_v34 }
 0x815   :  { %v5497_v22 = vpop.eup %5496 }
 0x816   :  { %v2517_v41 = vmul.f32 %v5497_v22, %v2516_v44 }
 0x818   :  { %v6832_v37 = vadd.f32 %v2518_v63, %v2517_v41  ;;  %v7540_v41 = vld [vmem:[#allocation53_spill] sm:$0xff]  ;;  %v7541_v63 = vld [vmem:[#allocation54_spill] sm:$0xff] }
 0x819   :  { %v5499_v18 = vpop.eup %5498 }
 0x81a   :  { %v2665_v13 = vadd.f32 1.0, %v5499_v18  ;;  %2746 = vmatprep.mubr.f32.mxu0 %v6832_v37  ;;  %2817 = vmatprep.mubr.f32.mxu1 %v6832_v37  ;;  %v5501_v9 = vpop.eup %5500  ;;  %v7542_v18 = vld [vmem:[#allocation55_spill] sm:$0xff] }
 0x81b   :  { %v2672_v54 = vadd.f32 1.0, %v5501_v9  ;;  %v7544_v9 = vld [vmem:[#allocation57_spill] sm:$0xff] }
 0x81c   :  { %5502 = vrcp.f32 %v2665_v13  ;;  %v7543_v13 = vld [vmem:[#allocation56_spill] sm:$0xff] }
 0x81d   :  { %5504 = vrcp.f32 %v2672_v54  ;;  %v7545_v54 = vld [vmem:[#allocation58_spill] sm:$0xff] }
 0x826   :  { %v5503_v8 = vpop.eup %5502 }
 0x827   :  { %v2675_v29 = vmul.f32 %v5503_v8, %v2658_v45  ;;  %v5505_v50 = vpop.eup %5504  ;;  %v7546_v45 = vld [vmem:[#allocation59_spill] sm:$0xff]  ;;  %v7547_v8 = vld [vmem:[#allocation60_spill] sm:$0xff] }
 0x828   :  { %v2678_v4 = vsub.f32 1.0, %v5505_v50  ;;  %v2680_v34 = vmul.f32 %v5505_v50, %v6720_v53  ;;  %v7538_v53 = vld [vmem:[#allocation51_spill] sm:$0xff] }
 0x829   :  { %v2676_v22 = vadd.f32 %v2675_v29, %v7500_v19  ;;  %v7548_v29 = vld [vmem:[#allocation61_spill] sm:$0xff]  ;;  %v7549_v19 = vld [vmem:[#allocation62_spill] sm:$0xff] }
 0x82b   :  { %5506 = vtanh.f32 %v2676_v22  ;;  %v7550_v22 = vld [vmem:[#allocation63_spill] sm:$0xff] }
 0x835   :  { %v5507_v61 = vpop.eup %5506 }
 0x836   :  { %v2679_v56 = vmul.f32 %v5507_v61, %v2678_v4  ;;  %v7551_v61 = vld [vmem:[#allocation69_spill] sm:$0xff] }
 0x838   :  { %v6839_v44 = vadd.f32 %v2680_v34, %v2679_v56 }
 0x83a   :  { %2747 = vmatmul.mubr.f32.vlgmr.msra.gmra.mrb[28].mxu0 %v6839_v44  ;;  %2818 = vmatmul.mubr.f32.vlgmr.msra.gmra.mrb[34].mxu1 %v6839_v44 }
 0x83b   :  { %5110 = vmatpush1.bf16.msra.mxu0 %v5745_v20  ;;  %5141 = vmatpush3.bf16.msra.mxu1 %v5778_v43  ;;  %v7501_v20 = vld [vmem:[#allocation14_spill] sm:$0xff]  ;;  %v7507_v43 = vld [vmem:[#allocation20_spill] sm:$0xff] }
 0x83c   :  { %5112 = vmatprep.subr.bf16.mxu0 %v5747_v21  ;;  %5142 = vmatprep.subr.bf16.mxu1 %v7166_v31  ;;  %v7502_v21 = vld [vmem:[#allocation15_spill] sm:$0xff] }
 0x83d   :  { %2907 = vmatprep.mubr.f32.mxu0 %v7177_v26  ;;  %3781 = vmatprep.mubr.msk.f32.mxu1 %vm5644_vm2, %v7177_v26 }
 0x83f   :  { %5114 = vmatpush1.bf16.msra.mxu0 %v5756_v27  ;;  %5144 = vmatpush3.bf16.msra.mxu1 %v5783_v47  ;;  %v7503_v27 = vld [vmem:[#allocation16_spill] sm:$0xff]  ;;  %v7508_v47 = vld [vmem:[#allocation21_spill] sm:$0xff] }
 0x840   :  { %5116 = vmatprep.subr.bf16.mxu0 %v5759_v28  ;;  %5145 = vmatprep.subr.bf16.mxu1 %v7166_v31  ;;  %v7504_v28 = vld [vmem:[#allocation17_spill] sm:$0xff] }
 0x843   :  { %5118 = vmatpush1.bf16.msra.mxu0 %v5770_v35  ;;  %5147 = vmatpush3.bf16.msra.mxu1 %v5799_v57  ;;  %v7505_v35 = vld [vmem:[#allocation18_spill] sm:$0xff]  ;;  %v7511_v57 = vld [vmem:[#allocation24_spill] sm:$0xff] }
 0x844   :  { %5120 = vmatprep.subr.bf16.mxu0 %v5776_v39  ;;  %5148 = vmatprep.subr.bf16.mxu1 %v7166_v31  ;;  %v7506_v39 = vld [vmem:[#allocation19_spill] sm:$0xff] }
 0x847   :  { %5122 = vmatpush1.bf16.msra.mxu0 %v5787_v48  ;;  %5150 = vmatpush3.bf16.msra.mxu1 %v5815_v5  ;;  %v7509_v48 = vld [vmem:[#allocation22_spill] sm:$0xff]  ;;  %v7514_v5 = vld [vmem:[#allocation27_spill] sm:$0xff] }
 0x848   :  { %5124 = vmatprep.subr.bf16.mxu0 %v5793_v52  ;;  %5151 = vmatprep.subr.bf16.mxu1 %v7166_v31  ;;  %v7510_v52 = vld [vmem:[#allocation23_spill] sm:$0xff] }
 0x84b   :  { %5126 = vmatpush1.bf16.msra.mxu0 %v5803_v58  ;;  %5153 = vmatpush3.bf16.msra.mxu1 %v5831_v15  ;;  %v7512_v58 = vld [vmem:[#allocation25_spill] sm:$0xff]  ;;  %v7517_v15 = vld [vmem:[#allocation30_spill] sm:$0xff] }
 0x84c   :  { %5128 = vmatprep.subr.bf16.mxu0 %v5809_v62  ;;  %5154 = vmatprep.subr.bf16.mxu1 %v7166_v31  ;;  %v7513_v62 = vld [vmem:[#allocation26_spill] sm:$0xff] }
 0x84f   :  { %5130 = vmatpush1.bf16.msra.mxu0 %v5819_v6  ;;  %5156 = vmatpush3.bf16.msra.mxu1 %v5847_v30  ;;  %v7515_v6 = vld [vmem:[#allocation28_spill] sm:$0xff]  ;;  %v7520_v30 = vld [vmem:[#allocation33_spill] sm:$0xff] }
 0x850   :  { %5132 = vmatprep.subr.bf16.mxu0 %v5825_v10  ;;  %5157 = vmatprep.subr.bf16.mxu1 %v7166_v31  ;;  %v7516_v10 = vld [vmem:[#allocation29_spill] sm:$0xff] }
 0x853   :  { %5134 = vmatpush1.bf16.msra.mxu0 %v5835_v16  ;;  %5159 = vmatpush3.bf16.msra.mxu1 %v5861_v42  ;;  %v7518_v16 = vld [vmem:[#allocation31_spill] sm:$0xff]  ;;  %v7523_v42 = vld [vmem:[#allocation36_spill] sm:$0xff] }
 0x854   :  { %5136 = vmatprep.subr.bf16.mxu0 %v5841_v23  ;;  %5160 = vmatprep.subr.bf16.mxu1 %v7166_v31  ;;  %v7519_v23 = vld [vmem:[#allocation32_spill] sm:$0xff] }
 0x857   :  { %5138 = vmatpush1.bf16.msra.mxu0 %v5851_v32  ;;  %5162 = vmatpush3.bf16.msra.mxu1 %v5873_v59  ;;  %v7521_v32 = vld [vmem:[#allocation34_spill] sm:$0xff]  ;;  %v7526_v59 = vld [vmem:[#allocation39_spill] sm:$0xff] }
 0x858   :  { %5164 = vmatprep.subr.bf16.mxu0 %v5855_v36  ;;  %5228 = vmatprep.subr.bf16.mxu1 %v5876_v60  ;;  %v7522_v36 = vld [vmem:[#allocation35_spill] sm:$0xff]  ;;  %v7527_v60 = vld [vmem:[#allocation40_spill] sm:$0xff] }
 0x85a   :  { %2908 = vmatmul.mubr.f32.vlgmr.msra.gmra.mrb[14].mxu0 %v6839_v44  ;;  %3782 = vmatmul.mubr.f32.vlgmr.msra.gmra.mrb[36].mxu1 %v6839_v44 }
 0x85b   :  { %5166 = vmatpush1.bf16.msra.mxu0 %v5865_v49  ;;  %5230 = vmatpush1.bf16.msra.mxu1 %v5886_v11  ;;  %v7524_v49 = vld [vmem:[#allocation37_spill] sm:$0xff]  ;;  %v7530_v11 = vld [vmem:[#allocation43_spill] sm:$0xff] }
 0x85c   :  { %5168 = vmatprep.subr.bf16.mxu0 %v5869_v51  ;;  %5232 = vmatprep.subr.bf16.mxu1 %v5889_v12  ;;  %v7525_v51 = vld [vmem:[#allocation38_spill] sm:$0xff]  ;;  %v7531_v12 = vld [vmem:[#allocation44_spill] sm:$0xff] }
 0x85f   :  { %5170 = vmatpush1.bf16.msra.mxu0 %v5879_v1  ;;  %5234 = vmatpush1.bf16.msra.mxu1 %v5897_v24  ;;  %v7528_v1 = vld [vmem:[#allocation41_spill] sm:$0xff]  ;;  %v7533_v24 = vld [vmem:[#allocation46_spill] sm:$0xff] }
 0x860   :  { %5172 = vmatprep.subr.bf16.mxu0 %v5882_v7  ;;  %5236 = vmatprep.subr.bf16.mxu1 %v5901_v25  ;;  %v7529_v7 = vld [vmem:[#allocation42_spill] sm:$0xff]  ;;  %v7534_v25 = vld [vmem:[#allocation47_spill] sm:$0xff] }
 0x863   :  { %5174 = vmatpush1.bf16.msra.mxu0 %v5892_v17  ;;  %5238 = vmatpush1.bf16.msra.mxu1 %v5905_v33  ;;  %v7532_v17 = vld [vmem:[#allocation45_spill] sm:$0xff]  ;;  %v7535_v33 = vld [vmem:[#allocation48_spill] sm:$0xff] }
 0x864   :  { %5176 = vmatprep.subr.bf16.mxu0 %v5909_v40  ;;  %5240 = vmatprep.subr.bf16.mxu1 %v5911_v46  ;;  %v7536_v40 = vld [vmem:[#allocation49_spill] sm:$0xff]  ;;  %v7537_v46 = vld [vmem:[#allocation50_spill] sm:$0xff] }
 0x867   :  { %5178 = vmatpush1.bf16.msra.mxu0 %v7501_v20  ;;  %5242 = vmatpush1.bf16.msra.mxu1 %v7502_v21 }
 0x868   :  { %5180 = vmatprep.subr.bf16.mxu0 %v7503_v27  ;;  %5244 = vmatprep.subr.bf16.mxu1 %v7504_v28 }
 0x86b   :  { %5182 = vmatpush1.bf16.msra.mxu0 %v7505_v35  ;;  %5246 = vmatpush1.bf16.msra.mxu1 %v7506_v39 }
 0x86c   :  { %5184 = vmatprep.subr.bf16.mxu0 %v7507_v43  ;;  %5248 = vmatprep.subr.bf16.mxu1 %v7508_v47 }
 0x86f   :  { %5186 = vmatpush1.bf16.msra.mxu0 %v7509_v48  ;;  %5250 = vmatpush1.bf16.msra.mxu1 %v7510_v52  ;;  %v7552_v48 = vld [vmem:[#allocation12_spill] sm:$0xff] }
 0x870   :  { %5188 = vmatprep.subr.bf16.mxu0 %v7511_v57  ;;  %5252 = vmatprep.subr.bf16.mxu1 %v7512_v58 }
 0x873   :  { %5190 = vmatpush1.bf16.msra.mxu0 %v7513_v62  ;;  %5254 = vmatpush1.bf16.msra.mxu1 %v7514_v5 }
 0x874   :  { %5192 = vmatprep.subr.bf16.mxu0 %v7515_v6  ;;  %5256 = vmatprep.subr.bf16.mxu1 %v7516_v10 }
 0x877   :  { %5194 = vmatpush1.bf16.msra.mxu0 %v7517_v15  ;;  %5258 = vmatpush1.bf16.msra.mxu1 %v7518_v16 }
 0x878   :  { %5196 = vmatprep.subr.bf16.mxu0 %v7519_v23  ;;  %5260 = vmatprep.subr.bf16.mxu1 %v7520_v30 }
 0x87b   :  { %5198 = vmatpush1.bf16.msra.mxu0 %v7521_v32  ;;  %5262 = vmatpush1.bf16.msra.mxu1 %v7522_v36 }
 0x87c   :  { %5200 = vmatprep.subr.bf16.mxu0 %v7523_v42  ;;  %5264 = vmatprep.subr.bf16.mxu1 %v7524_v49 }
 0x87f   :  { %5202 = vmatpush1.bf16.msra.mxu0 %v7525_v51  ;;  %5266 = vmatpush1.bf16.msra.mxu1 %v7526_v59 }
 0x880   :  { %5204 = vmatprep.subr.bf16.mxu0 %v7527_v60  ;;  %5268 = vmatprep.subr.bf16.mxu1 %v7528_v1 }
 0x883   :  { %5206 = vmatpush1.bf16.msra.mxu0 %v7529_v7  ;;  %5270 = vmatpush1.bf16.msra.mxu1 %v7530_v11 }
 0x884   :  { %5208 = vmatprep.subr.bf16.mxu0 %v7531_v12  ;;  %5272 = vmatprep.subr.bf16.mxu1 %v7532_v17 }
 0x887   :  { %5210 = vmatpush1.bf16.msra.mxu0 %v7533_v24  ;;  %5274 = vmatpush1.bf16.msra.mxu1 %v7534_v25  ;;  %v7553_v25 = vld [vmem:[#allocation70_spill] sm:$0xff] }
 0x888   :  { %5212 = vmatprep.subr.bf16.mxu0 %v7535_v33  ;;  %5276 = vmatprep.subr.bf16.mxu1 %v7536_v40 }
 0x88b   :  { %5214 = vmatpush1.bf16.msra.mxu0 %v7537_v46  ;;  %5278 = vmatpush1.bf16.msra.mxu1 %v7538_v53 }
 0x88c   :  { %5216 = vmatprep.subr.bf16.mxu0 %v7539_v38  ;;  %5280 = vmatprep.subr.bf16.mxu1 %v7540_v41 }
 0x88f   :  { %5218 = vmatpush1.bf16.msra.mxu0 %v7541_v63  ;;  %5282 = vmatpush1.bf16.msra.mxu1 %v7542_v18  ;;  %v3166_v63 = vld [vmem:[#allocation7] sm:$0xff] }
 0x890   :  { %5220 = vmatprep.subr.bf16.mxu0 %v7543_v13  ;;  %5284 = vmatprep.subr.bf16.mxu1 %v7544_v9  ;;  %v3168_v13 = vld [vmem:[#allocation7 + $0x10] sm:$0xff]  ;;  %v3169_v9 = vld [vmem:[#allocation7 + $0x18] sm:$0xff] }
 0x893   :  { %5222 = vmatpush1.bf16.msra.mxu0 %v7545_v54  ;;  %5286 = vmatpush1.bf16.msra.mxu1 %v7546_v45  ;;  %v5295_v54 = vpack.c.bf16 %v3169_v9, %v3168_v13  ;;  %v3170_v45 = vld [vmem:[#allocation7 + $0x20] sm:$0xff] }
 0x894   :  { %5224 = vmatprep.subr.bf16.mxu0 %v7547_v8  ;;  %5288 = vmatprep.subr.bf16.mxu1 %v7548_v29  ;;  %v3172_v29 = vld [vmem:[#allocation7 + $0x30] sm:$0xff] }
 0x897   :  { %5226 = vmatpush1.bf16.msra.mxu0 %v7549_v19  ;;  %5290 = vmatpush1.bf16.msra.mxu1 %v7550_v22  ;;  %v3174_v22 = vld [vmem:[#allocation7 + $0x40] sm:$0xff] }
 0x898   :  { %5291 = vmatprep.subr.bf16.mxu0 %v7166_v31 }
 0x90d   :  { %v2748_v50 = vpop.f32.mrb[28].mxu0  ;;  %v2819_v4 = vpop.f32.mrb[34].mxu1 }
 0x90e   :  { %v2749_v56 = vadd.f32 %v2748_v50, %v7551_v61  ;;  %v2750_v34 = vpop.f32.mrb[29].mxu0  ;;  %v2821_v20 = vpop.f32.mrb[35].mxu1  ;;  %v2820_v58 = vadd.f32 %v2819_v4, %v6231_v0  ;;  %v3175_v50 = vld [vmem:[#allocation7 + $0x48] sm:$0xff] }
 0x90f   :  { %v2751_v27 = vadd.f32 %v2750_v34, %v7282_v55  ;;  %v2822_v52 = vadd.f32 %v2821_v20, %v7552_v48  ;;  %v5304_v4 = vpack.c.bf16 %v3175_v50, %v3174_v22  ;;  %v3177_v34 = vld [vmem:[#allocation7 + $0x58] sm:$0xff] }
 0x910   :  { %v3321_v21 = vmul.f32 -1.442695, %v2749_v56  ;;  %v3176_v56 = vld [vmem:[#allocation7 + $0x50] sm:$0xff] }
 0x911   :  { %v3322_v28 = vmul.f32 -1.442695, %v2751_v27  ;;  %v5307_v20 = vpack.c.bf16 %v3177_v34, %v3176_v56  ;;  %v3179_v27 = vld [vmem:[#allocation7 + $0x68] sm:$0xff] }
 0x912   :  { %5508 = vpow2.f32 %v3321_v21  ;;  %v3178_v21 = vld [vmem:[#allocation7 + $0x60] sm:$0xff] }
 0x913   :  { %5510 = vpow2.f32 %v3322_v28  ;;  %v5310_v28 = vpack.c.bf16 %v3179_v27, %v3178_v21 }
 0x91c   :  { %v5509_v35 = vpop.eup %5508 }
 0x91d   :  { %v2827_v39 = vadd.f32 1.0, %v5509_v35  ;;  %v5511_v43 = vpop.eup %5510  ;;  %v3180_v35 = vld [vmem:[#allocation7 + $0x70] sm:$0xff] }
 0x91e   :  { %v2833_v47 = vadd.f32 1.0, %v5511_v43 }
 0x91f   :  { %5512 = vrcp.f32 %v2827_v39  ;;  %v3181_v39 = vld [vmem:[#allocation7 + $0x78] sm:$0xff] }
 0x920   :  { %5514 = vrcp.f32 %v2833_v47  ;;  %v5313_v43 = vpack.c.bf16 %v3181_v39, %v3180_v35 }
 0x929   :  { %v5513_v57 = vpop.eup %5512 }
 0x92a   :  { %v2836_v62 = vmul.f32 %v5513_v57, %v2822_v52  ;;  %v5515_v36 = vpop.eup %5514 }
 0x92b   :  { %v2839_v49 = vsub.f32 1.0, %v5515_v36  ;;  %v2841_v60 = vmul.f32 %v5515_v36, %v6832_v37 }
 0x92c   :  { %v2837_v5 = vadd.f32 %v2836_v62, %v2820_v58 }
 0x92d   :  { %v2909_v6 = vpop.f32.mrb[14].mxu0  ;;  %v2980_v10 = vpop.f32.mrb[36].mxu1 }
 0x92e   :  { %5516 = vtanh.f32 %v2837_v5  ;;  %v5344_v15 = vadd.f32 %v7229_v14, %v2909_v6  ;;  %v2911_v16 = vpop.f32.mrb[15].mxu0  ;;  %v3783_v23 = vpop.f32.mrb[37].mxu1  ;;  %v2981_v12 = vadd.f32 %v2980_v10, %v6108_v3  ;;  %v3167_v3 = vld [vmem:[#allocation7 + $0x8] sm:$0xff] }
 0x92f   :  { %v5346_v32 = vadd.f32 %v7230_v2, %v2911_v16  ;;  %v5292_v18 = vpack.c.bf16 %v3167_v3, %v3166_v63 }
 0x930   :  { %v3323_v30 = vmul.f32 -1.442695, %v5344_v15 }
 0x931   :  { %v3324_v42 = vmul.f32 -1.442695, %v5346_v32 }
 0x932   :  { %5518 = vpow2.f32 %v3323_v30 }
 0x933   :  { %5520 = vpow2.f32 %v3324_v42 }
 0x938   :  { %v5517_v51 = vpop.eup %5516 }
 0x939   :  { %v2840_v59 = vmul.f32 %v5517_v51, %v2839_v49 }
 0x93b   :  { %v6950_v1 = vadd.f32 %v2841_v60, %v2840_v59 }
 0x93c   :  { %v5519_v7 = vpop.eup %5518 }
 0x93d   :  { %v2988_v11 = vadd.f32 1.0, %v5519_v7  ;;  %3069 = vmatprep.mubr.f32.mxu0 %v6950_v1  ;;  %3140 = vmatprep.mubr.f32.mxu1 %v6950_v1  ;;  %v5521_v14 = vpop.eup %5520 }
 0x93e   :  { %v2995_v2 = vadd.f32 1.0, %v5521_v14 }
 0x93f   :  { %5522 = vrcp.f32 %v2988_v11  ;;  %v3327_v11 = vld [vmem:[%s6994_s8] ss:$0 sm:$0xff] }
 0x940   :  { %5524 = vrcp.f32 %v2995_v2 }
 0x949   :  { %v5523_v17 = vpop.eup %5522 }
 0x94a   :  { %v2998_v24 = vmul.f32 %v5523_v17, %v2981_v12  ;;  %v5525_v37 = vpop.eup %5524 }
 0x94b   :  { %v3001_v40 = vsub.f32 1.0, %v5525_v37  ;;  %v3003_v38 = vmul.f32 %v5525_v37, %v6839_v44  ;;  %v3171_v44 = vld [vmem:[#allocation7 + $0x28] sm:$0xff] }
 0x94c   :  { %v2999_v33 = vadd.f32 %v2998_v24, %v7553_v25  ;;  %v5298_v8 = vpack.c.bf16 %v3171_v44, %v3170_v45 }
 0x94e   :  { %5526 = vtanh.f32 %v2999_v33 }
 0x958   :  { %v5527_v46 = vpop.eup %5526 }
 0x959   :  { %v3002_v53 = vmul.f32 %v5527_v46, %v3001_v40 }
 0x95b   :  { %v3004_v41 = vadd.f32 %v3003_v38, %v3002_v53 }
 0x95d   :  { %3070 = vmatmul.mubr.f32.vlgmr.msra.gmra.mrb[30].mxu0 %v3004_v41  ;;  %3141 = vmatmul.mubr.f32.vlgmr.msra.gmra.mrb[38].mxu1 %v3004_v41 }
 0x95e   :  { %3816 = vmatprep.mubr.msk.f32.mxu0 %vm5644_vm2, %v7177_v26  ;;  %5293 = vmatpush3.bf16.msra.mxu0 %v5292_v18  ;;  %v3173_v26 = vld [vmem:[#allocation7 + $0x38] sm:$0xff] }
 0x95f   :  { %5294 = vmatprep.subr.bf16.mxu0 %v7166_v31  ;;  %v5301_v19 = vpack.c.bf16 %v3173_v26, %v3172_v29 }
 0x962   :  { %5296 = vmatpush3.bf16.msra.mxu0 %v5295_v54 }
 0x963   :  { %5297 = vmatprep.subr.bf16.mxu0 %v7166_v31 }
 0x966   :  { %5299 = vmatpush3.bf16.msra.mxu0 %v5298_v8 }
 0x967   :  { %5300 = vmatprep.subr.bf16.mxu0 %v7166_v31 }
 0x96a   :  { %5302 = vmatpush3.bf16.msra.mxu0 %v5301_v19 }
 0x96b   :  { %5303 = vmatprep.subr.bf16.mxu0 %v7166_v31 }
 0x96e   :  { %5305 = vmatpush3.bf16.msra.mxu0 %v5304_v4 }
 0x96f   :  { %5306 = vmatprep.subr.bf16.mxu0 %v7166_v31 }
 0x972   :  { %5308 = vmatpush3.bf16.msra.mxu0 %v5307_v20 }
 0x973   :  { %5309 = vmatprep.subr.bf16.mxu0 %v7166_v31 }
 0x976   :  { %5311 = vmatpush3.bf16.msra.mxu0 %v5310_v28 }
 0x977   :  { %5312 = vmatprep.subr.bf16.mxu0 %v7166_v31 }
 0x97a   :  { %5314 = vmatpush3.bf16.msra.mxu0 %v5313_v43 }
 0xa30   :  { %v3071_v47 = vpop.f32.mrb[30].mxu0  ;;  %v3142_v52 = vpop.f32.mrb[38].mxu1 }
 0xa31   :  { %v3072_v57 = vadd.f32 %v3071_v47, %v7551_v61  ;;  %v3073_v58 = vpop.f32.mrb[31].mxu0  ;;  %v3144_v62 = vpop.f32.mrb[39].mxu1  ;;  %v3143_v36 = vadd.f32 %v3142_v52, %v6231_v0 }
 0xa32   :  { %v3074_v6 = vadd.f32 %v3073_v58, %v7282_v55  ;;  %v3145_v31 = vadd.f32 %v3144_v62, %v7552_v48 }
 0xa33   :  { %v3325_v5 = vmul.f32 -1.442695, %v3072_v57 }
 0xa34   :  { %v3326_v10 = vmul.f32 -1.442695, %v3074_v6 }
 0xa35   :  { %5528 = vpow2.f32 %v3325_v5 }
 0xa36   :  { %5530 = vpow2.f32 %v3326_v10 }
 0xa3f   :  { %v5529_v15 = vpop.eup %5528 }
 0xa40   :  { %v3150_v16 = vadd.f32 1.0, %v5529_v15  ;;  %v5531_v23 = vpop.eup %5530 }
 0xa41   :  { %v3156_v30 = vadd.f32 1.0, %v5531_v23 }
 0xa42   :  { %5532 = vrcp.f32 %v3150_v16 }
 0xa43   :  { %5534 = vrcp.f32 %v3156_v30 }
 0xa4c   :  { %v5533_v32 = vpop.eup %5532 }
 0xa4d   :  { %v3159_v61 = vmul.f32 %v5533_v32, %v3145_v31  ;;  %v5535_v49 = vpop.eup %5534 }
 0xa4e   :  { %v3162_v51 = vsub.f32 1.0, %v5535_v49  ;;  %v3164_v60 = vmul.f32 %v5535_v49, %v6950_v1 }
 0xa4f   :  { %v3160_v42 = vadd.f32 %v3159_v61, %v3143_v36 }
 0xa51   :  { %5536 = vtanh.f32 %v3160_v42 }
 0xa5b   :  { %v5537_v55 = vpop.eup %5536 }
 0xa5c   :  { %v3163_v59 = vmul.f32 %v5537_v55, %v3162_v51 }
 0xa5e   :  { %v3165_v7 = vadd.f32 %v3164_v60, %v3163_v59 }
 0xa60   :  { %3817 = vmatmul.mubr.f32.vlgmr.msra.gmra.mrb[32].mxu0 %v3165_v7 }
 0xb33   :  { %v3255_v48 = vpop.f32.mrb[32].mxu0 }
 0xb34   :  { %v3256_v0 = vadd.f32 %v3327_v11, %v3255_v48  ;;  %v3818_v14 = vpop.f32.mrb[33].mxu0 }
 0xb36   :  { %3259 = vst [vmem:[#allocation8] sm:$0xff] %v3256_v0 }
 0xb37   :  { %5615 = shalt.err (!%p5612_p0)
}
 0xb38   :  { %s5616_s7 = scalar_lea.hbm %s6995_s9, 128 }
 0xb39   :  { %p5617_p1 = scmp.ne.s32.totalorder %s6995_s9, %s5616_s7  ;;  %p5620_p2 = scmp.lt.u32.totalorder %s5616_s7, %s6995_s9 }
 0xb3b   :  { %p5622_p3 = pnand %p5620_p2, %p5617_p1 }
 0xb3d   :  { %5625 = shalt.err (!%p5622_p3)
}
 0xb3e   :  { %3269 = dma.vmem_to_hbm [thread:$0]  %s3267_s26, 128, %s6995_s9, [#allocation4]  }
 0xb3f   :  { %5630 = dma.done.wait [#allocation4], 128  }
 0xb40   :  { %5631 = vsyncadd [#allocation4], 4294967168 }
 0xb41   :  { %3273 = vsyncpa [#allocation3], 1 }
 0xb42   :  { %3274 = vsyncpa [#allocation6], 1 }
 0xb43   :  { %3275 = vsyncpa [#allocation4], 1 }

</bundles_post_ra>
